<compile_context>
chip_gen: v7x
topology: tpu7x:2x2x1
jax: 0.10.0
libtpu: 0.0.40
codegen_flags: <defaults>
</compile_context>

<pallas_src>
import functools
import itertools

import jax
import jax.numpy as jnp
from jax import lax
from jax.experimental import pallas as pl
from jax.experimental.pallas import tpu as pltpu


def _round_up(x, m):
    return (x + m - 1) // m * m


def _conv3d_gn_relu_kernel(x_ref, w_ref, gavg_ref, gamma_ref, beta_ref,
                           mask_ref, o_ref, patch_ref, *, ksize, hp, wp, eps,
                           chunk, active):
    # x_ref     : (Cin, L_in)   f32  zero-padded, flattened sample (channel-major)
    # w_ref     : (Cout, Kp)    bf16 conv weight, rows ordered (dz,dy,dx,ci),
    #                                contraction zero-padded to Kp
    # gavg_ref  : (Cout, Cout)  f32  block-diagonal group-average matrix
    # gamma_ref : (Cout, 1)     f32
    # beta_ref  : (Cout, 1)     f32
    # mask_ref  : (1, L)        f32  1.0 at valid output positions, else 0.0
    # o_ref     : (Cout, L)     f32  output (channel-major, flattened)
    # patch_ref : (Kp, L)       f32  scratch: im2col matrix for this sample
    kd = kh = kw = ksize
    cin = x_ref.shape[0]
    cout, l = o_ref.shape
    kp = patch_ref.shape[0]
    k = cin * kd * kh * kw

    # ---- Phase 0: in-kernel im2col, one (Cin, L) slab per tap ----------------
    # Scratch is per-core: zero the padded contraction rows every step (cannot
    # gate this on program_id == 0 under a "parallel" grid axis).
    if kp > k:
        patch_ref[pl.ds(k, kp - k), :] = jnp.zeros((kp - k, l),
                                                   patch_ref.dtype)
    for t, (dz, dy, dx) in enumerate(
            itertools.product(range(kd), range(kh), range(kw))):
        off = (dz * hp + dy) * wp + dx
        patch_ref[pl.ds(t * cin, cin), :] = x_ref[:, pl.ds(off, l)]

    # Static chunk schedule: full `chunk`-wide tiles plus a smaller tail.
    chunks = [(s, min(chunk, l - s)) for s in range(0, l, chunk)]

    # ---- Phase 1: conv matmul (bf16 operands, f32 acc) + masked stats --------
    wmat = w_ref[...]                                     # (Cout, Kp) bf16
    s1 = jnp.zeros((cout, 1), jnp.float32)
    s2 = jnp.zeros((cout, 1), jnp.float32)
    for s, sz in chunks:
        pch = patch_ref[:, pl.ds(s, sz)].astype(jnp.bfloat16)           # (Kp, sz)
        conv = jnp.dot(wmat, pch, preferred_element_type=jnp.float32)   # (Cout, sz)
        m = mask_ref[:, pl.ds(s, sz)]                                   # (1, sz)
        cm = conv * m
        s1 = s1 + jnp.sum(cm, axis=1, keepdims=True)
        s2 = s2 + jnp.sum(cm * conv, axis=1, keepdims=True)
        o_ref[:, pl.ds(s, sz)] = conv                     # stash raw conv result

    # ---- Phase 2: GroupNorm stats (one compact matmul = reduce + broadcast) --
    mean_c = jnp.dot(gavg_ref[...], s1, preferred_element_type=jnp.float32)
    ex2_c = jnp.dot(gavg_ref[...], s2, preferred_element_type=jnp.float32)
    var_c = jnp.maximum(ex2_c - mean_c * mean_c, 0.0)     # clamp (bf16 safety)
    inv_c = lax.rsqrt(var_c + jnp.float32(eps))
    scale = inv_c * gamma_ref[...]                        # (Cout, 1)
    shift = beta_ref[...] - mean_c * scale                # (Cout, 1)

    # ---- Phase 3: normalize (+ ReLU) in place, lane-dense stores -------------
    for s, sz in chunks:
        conv = o_ref[:, pl.ds(s, sz)]
        y = conv * scale + shift
        if active:
            y = jnp.maximum(y, 0.0)
        o_ref[:, pl.ds(s, sz)] = y


def conv3d_block(x_ncdhw, weight, gamma, beta, *, num_groups=32, eps=1e-5,
                 active=True, lane_chunk=256):
    """x_ncdhw: (N, Cin, D, H, W) f32; weight: (Cout, Cin, k, k, k) (odd k)."""
    N, Cin, D, H, W = x_ncdhw.shape
    Cout, Cin_w, kd, kh, kw = weight.shape
    assert Cin_w == Cin and kd == kh == kw and kd % 2 == 1
    ksize = kd
    pad = ksize // 2
    G = num_groups
    assert Cout % G == 0
    cpg = Cout // G
    Dp, Hp, Wp = D + 2 * pad, H + 2 * pad, W + 2 * pad
    P = Dp * Hp * Wp
    DHW = D * H * W
    LANES = 128

    # Output columns only span od < D of the padded flat grid (fewer wasted
    # lanes); taps still use constant flat offsets into the padded input.
    n_cols = D * Hp * Wp
    L = _round_up(n_cols, LANES)
    max_off = ((ksize - 1) * Hp + (ksize - 1)) * Wp + (ksize - 1)
    L_in = _round_up(L + max_off, LANES)
    K = Cin * ksize ** 3
    Kp = _round_up(K, LANES)

    # -------- glue: zero-pad ('same'), flatten; stays channel-major (NCDHW) ---
    xp = jnp.pad(x_ncdhw.astype(jnp.float32),
                 ((0, 0), (0, 0), (pad, pad), (pad, pad), (pad, pad)))
    xflat = xp.reshape(N, Cin, P)
    xflat = jnp.pad(xflat, ((0, 0), (0, 0), (0, L_in - P)))        # (N,Cin,L_in)

    # -------- weight rows ordered (dz,dy,dx,ci), zero-padded to Kp, bf16 ------
    w2d = weight.astype(jnp.float32).transpose(0, 2, 3, 4, 1).reshape(Cout, K)
    w2d = jnp.pad(w2d, ((0, 0), (0, Kp - K))).astype(jnp.bfloat16)  # (Cout,Kp)

    # -------- block-diagonal group-averaging matrix (reduce + broadcast) ------
    grp = jnp.repeat(jnp.eye(G, dtype=jnp.float32), cpg, axis=0)    # (Cout, G)
    gavg = (grp @ grp.T) / jnp.float32(cpg * DHW)                   # (Cout,Cout)

    gamma2 = gamma.reshape(Cout, 1).astype(jnp.float32)
    beta2 = beta.reshape(Cout, 1).astype(jnp.float32)

    # -------- lane-validity mask for padded / rounded-up flat positions -------
    pos = jnp.arange(L)
    od, oh, ow = pos // (Hp * Wp), (pos // Wp) % Hp, pos % Wp
    mask = ((od < D) & (oh < H) & (ow < W)).astype(jnp.float32).reshape(1, L)

    kernel = functools.partial(
        _conv3d_gn_relu_kernel, ksize=ksize, hp=Hp, wp=Wp, eps=eps,
        chunk=lane_chunk, active=active)

    cost = pl.CostEstimate(
        flops=int(2 * N * Cout * Kp * L + 4 * N * Cout * Cout),
        transcendentals=int(N * Cout),
        bytes_accessed=int(N * Cin * L_in * 4 + Cout * Kp * 2 + Cout * Cout * 4
                           + 2 * Cout * 4 + L * 4 + N * Cout * L * 4))

    out_flat = pl.pallas_call(
        kernel,
        out_shape=jax.ShapeDtypeStruct((N, Cout, L), jnp.float32),
        grid=(N,),
        in_specs=[
            pl.BlockSpec((None, Cin, L_in), lambda n: (n, 0, 0)),  # x (sample)
            pl.BlockSpec((Cout, Kp), lambda n: (0, 0)),            # weight
            pl.BlockSpec((Cout, Cout), lambda n: (0, 0)),          # group avg
            pl.BlockSpec((Cout, 1), lambda n: (0, 0)),             # gamma
            pl.BlockSpec((Cout, 1), lambda n: (0, 0)),             # beta
            pl.BlockSpec((1, L), lambda n: (0, 0)),                # validity mask
        ],
        out_specs=pl.BlockSpec((None, Cout, L), lambda n: (n, 0, 0)),
        scratch_shapes=[pltpu.VMEM((Kp, L), jnp.float32)],
        compiler_params=pltpu.CompilerParams(
            dimension_semantics=("parallel",),
            vmem_limit_bytes=32 * 1024 * 1024),
        cost_estimate=cost,
    )(xflat, w2d, gavg, gamma2, beta2, mask)

    # -------- glue: drop invalid columns; already NCDHW channel order ---------
    out = out_flat[:, :, :n_cols].reshape(N, Cout, D, Hp, Wp)
    return out[:, :, :, :H, :W]


def _reference(x_ncdhw, weight, gamma, beta, *, num_groups=32, eps=1e-5):
    """Plain-JAX (f32) reference matching the PyTorch module semantics."""
    N, Cin, D, H, W = x_ncdhw.shape
    Cout = weight.shape[0]
    conv = lax.conv_general_dilated(
        x_ncdhw, weight, window_strides=(1, 1, 1), padding="SAME",
        dimension_numbers=("NCDHW", "OIDHW", "NCDHW"))
    G = num_groups
    cpg = Cout // G
    r = conv.reshape(N, G, cpg, D, H, W)
    mean = r.mean(axis=(2, 3, 4, 5), keepdims=True)
    var = r.var(axis=(2, 3, 4, 5), keepdims=True)
    rn = (r - mean) / jnp.sqrt(var + eps)
    rn = rn.reshape(N, Cout, D, H, W)
    rn = rn * gamma.reshape(1, Cout, 1, 1, 1) + beta.reshape(1, Cout, 1, 1, 1)
    return jnp.maximum(rn, 0.0)


if __name__ == "__main__":
    # Shapes consistent with the module: Conv3d(4 -> 64, k=3, padding='same'),
    # GroupNorm(32, 64), input NCDHW = (2, 4, 8, 8, 8).
    N, Cin, D, H, W = 2, 4, 8, 8, 8
    Cout = 64

    key = jax.random.PRNGKey(0)
    kx, kw_, kg, kb = jax.random.split(key, 4)
    x = jax.random.normal(kx, (N, Cin, D, H, W), dtype=jnp.float32)
    weight = jax.random.normal(kw_, (Cout, Cin, 3, 3, 3), dtype=jnp.float32) * 0.05
    gamma = 1.0 + 0.1 * jax.random.normal(kg, (Cout,), dtype=jnp.float32)
    beta = 0.1 * jax.random.normal(kb, (Cout,), dtype=jnp.float32)

    out = jax.block_until_ready(jax.jit(conv3d_block)(x, weight, gamma, beta))

    ref = _reference(x, weight, gamma, beta)
    assert out.shape == (N, Cout, D, H, W), out.shape
    max_err = float(jnp.max(jnp.abs(out - ref)))
    # bf16 MXU operands => bf16-appropriate tolerance vs the pure-f32 reference;
    # GroupNorm rescaling keeps the error well inside this.
    assert jnp.allclose(out, ref, atol=2e-2, rtol=2e-2), max_err

    print("KERNEL_OK")
</pallas_src>

<mosaic_0001>
module attributes {stable_mosaic.version = 11 : i64} {
  func.func @_conv3d_gn_relu_kernel(%arg0: i32, %arg1: memref<1x4x1152xf32, #tpu.memory_space<vmem>>, %arg2: memref<64x128xbf16, #tpu.memory_space<vmem>>, %arg3: memref<64x64xf32, #tpu.memory_space<vmem>>, %arg4: memref<64x1xf32, #tpu.memory_space<vmem>>, %arg5: memref<64x1xf32, #tpu.memory_space<vmem>>, %arg6: memref<1x896xf32, #tpu.memory_space<vmem>>, %arg7: memref<1x64x896xf32, #tpu.memory_space<vmem>>, %arg8: memref<128x896xf32, #tpu.memory_space<vmem>>) attributes {dimension_semantics = [#tpu.dimension_semantics<parallel>], iteration_bounds = array<i64: 2>, scalar_prefetch = 0 : i64, scratch_operands = 1 : i64, tpu.core_type = #tpu.core_type<tc>, window_params = [{transform_indices = @transform_0, window_bounds = array<i64: 1, 4, 1152>}, {pipeline_mode = #tpu.pipeline_mode<synchronous>, transform_indices = @transform_1, window_bounds = array<i64: 64, 128>}, {pipeline_mode = #tpu.pipeline_mode<synchronous>, transform_indices = @transform_2, window_bounds = array<i64: 64, 64>}, {pipeline_mode = #tpu.pipeline_mode<synchronous>, transform_indices = @transform_3, window_bounds = array<i64: 64, 1>}, {pipeline_mode = #tpu.pipeline_mode<synchronous>, transform_indices = @transform_4, window_bounds = array<i64: 64, 1>}, {pipeline_mode = #tpu.pipeline_mode<synchronous>, transform_indices = @transform_5, window_bounds = array<i64: 1, 896>}, {transform_indices = @transform_6, window_bounds = array<i64: 1, 64, 896>}]} {
    %cst = arith.constant 0.000000e+00 : f32
    %0 = vector.broadcast %cst : f32 to vector<20x896xf32>
    %c108 = arith.constant 108 : index
    %c0 = arith.constant 0 : index
    %1 = vector.load %arg8[%c108, %c0] : memref<128x896xf32, #tpu.memory_space<vmem>>, vector<20x896xf32>
    tpu.vector_store %arg8[%c108, %c0], %0 {strides = array<i32>} : memref<128x896xf32, #tpu.memory_space<vmem>>, vector<20x896xf32>,
    %c0_0 = arith.constant 0 : index
    %c0_1 = arith.constant 0 : index
    %c0_2 = arith.constant 0 : index
    %2 = vector.load %arg1[%c0_0, %c0_1, %c0_2] : memref<1x4x1152xf32, #tpu.memory_space<vmem>>, vector<1x4x896xf32>
    %3 = vector.shape_cast %2 : vector<1x4x896xf32> to vector<4x896xf32>
    %c0_3 = arith.constant 0 : index
    %c0_4 = arith.constant 0 : index
    %4 = vector.load %arg8[%c0_3, %c0_4] : memref<128x896xf32, #tpu.memory_space<vmem>>, vector<4x896xf32>
    tpu.vector_store %arg8[%c0_3, %c0_4], %3 {strides = array<i32>} : memref<128x896xf32, #tpu.memory_space<vmem>>, vector<4x896xf32>,
    %c0_5 = arith.constant 0 : index
    %c0_6 = arith.constant 0 : index
    %c1 = arith.constant 1 : index
    %5 = vector.load %arg1[%c0_5, %c0_6, %c1] : memref<1x4x1152xf32, #tpu.memory_space<vmem>>, vector<1x4x896xf32>
    %6 = vector.shape_cast %5 : vector<1x4x896xf32> to vector<4x896xf32>
    %c4 = arith.constant 4 : index
    %c0_7 = arith.constant 0 : index
    %7 = vector.load %arg8[%c4, %c0_7] : memref<128x896xf32, #tpu.memory_space<vmem>>, vector<4x896xf32>
    tpu.vector_store %arg8[%c4, %c0_7], %6 {strides = array<i32>} : memref<128x896xf32, #tpu.memory_space<vmem>>, vector<4x896xf32>,
    %c0_8 = arith.constant 0 : index
    %c0_9 = arith.constant 0 : index
    %c2 = arith.constant 2 : index
    %8 = vector.load %arg1[%c0_8, %c0_9, %c2] : memref<1x4x1152xf32, #tpu.memory_space<vmem>>, vector<1x4x896xf32>
    %9 = vector.shape_cast %8 : vector<1x4x896xf32> to vector<4x896xf32>
    %c8 = arith.constant 8 : index
    %c0_10 = arith.constant 0 : index
    %10 = vector.load %arg8[%c8, %c0_10] : memref<128x896xf32, #tpu.memory_space<vmem>>, vector<4x896xf32>
    tpu.vector_store %arg8[%c8, %c0_10], %9 {strides = array<i32>} : memref<128x896xf32, #tpu.memory_space<vmem>>, vector<4x896xf32>,
    %c0_11 = arith.constant 0 : index
    %c0_12 = arith.constant 0 : index
    %c10 = arith.constant 10 : index
    %11 = vector.load %arg1[%c0_11, %c0_12, %c10] : memref<1x4x1152xf32, #tpu.memory_space<vmem>>, vector<1x4x896xf32>
    %12 = vector.shape_cast %11 : vector<1x4x896xf32> to vector<4x896xf32>
    %c12 = arith.constant 12 : index
    %c0_13 = arith.constant 0 : index
    %13 = vector.load %arg8[%c12, %c0_13] : memref<128x896xf32, #tpu.memory_space<vmem>>, vector<4x896xf32>
    tpu.vector_store %arg8[%c12, %c0_13], %12 {strides = array<i32>} : memref<128x896xf32, #tpu.memory_space<vmem>>, vector<4x896xf32>,
    %c0_14 = arith.constant 0 : index
    %c0_15 = arith.constant 0 : index
    %c11 = arith.constant 11 : index
    %14 = vector.load %arg1[%c0_14, %c0_15, %c11] : memref<1x4x1152xf32, #tpu.memory_space<vmem>>, vector<1x4x896xf32>
    %15 = vector.shape_cast %14 : vector<1x4x896xf32> to vector<4x896xf32>
    %c16 = arith.constant 16 : index
    %c0_16 = arith.constant 0 : index
    %16 = vector.load %arg8[%c16, %c0_16] : memref<128x896xf32, #tpu.memory_space<vmem>>, vector<4x896xf32>
    tpu.vector_store %arg8[%c16, %c0_16], %15 {strides = array<i32>} : memref<128x896xf32, #tpu.memory_space<vmem>>, vector<4x896xf32>,
    %c0_17 = arith.constant 0 : index
    %c0_18 = arith.constant 0 : index
    %c12_19 = arith.constant 12 : index
    %17 = vector.load %arg1[%c0_17, %c0_18, %c12_19] : memref<1x4x1152xf32, #tpu.memory_space<vmem>>, vector<1x4x896xf32>
    %18 = vector.shape_cast %17 : vector<1x4x896xf32> to vector<4x896xf32>
    %c20 = arith.constant 20 : index
    %c0_20 = arith.constant 0 : index
    %19 = vector.load %arg8[%c20, %c0_20] : memref<128x896xf32, #tpu.memory_space<vmem>>, vector<4x896xf32>
    tpu.vector_store %arg8[%c20, %c0_20], %18 {strides = array<i32>} : memref<128x896xf32, #tpu.memory_space<vmem>>, vector<4x896xf32>,
    %c0_21 = arith.constant 0 : index
    %c0_22 = arith.constant 0 : index
    %c20_23 = arith.constant 20 : index
    %20 = vector.load %arg1[%c0_21, %c0_22, %c20_23] : memref<1x4x1152xf32, #tpu.memory_space<vmem>>, vector<1x4x896xf32>
    %21 = vector.shape_cast %20 : vector<1x4x896xf32> to vector<4x896xf32>
    %c24 = arith.constant 24 : index
    %c0_24 = arith.constant 0 : index
    %22 = vector.load %arg8[%c24, %c0_24] : memref<128x896xf32, #tpu.memory_space<vmem>>, vector<4x896xf32>
    tpu.vector_store %arg8[%c24, %c0_24], %21 {strides = array<i32>} : memref<128x896xf32, #tpu.memory_space<vmem>>, vector<4x896xf32>,
    %c0_25 = arith.constant 0 : index
    %c0_26 = arith.constant 0 : index
    %c21 = arith.constant 21 : index
    %23 = vector.load %arg1[%c0_25, %c0_26, %c21] : memref<1x4x1152xf32, #tpu.memory_space<vmem>>, vector<1x4x896xf32>
    %24 = vector.shape_cast %23 : vector<1x4x896xf32> to vector<4x896xf32>
    %c28 = arith.constant 28 : index
    %c0_27 = arith.constant 0 : index
    %25 = vector.load %arg8[%c28, %c0_27] : memref<128x896xf32, #tpu.memory_space<vmem>>, vector<4x896xf32>
    tpu.vector_store %arg8[%c28, %c0_27], %24 {strides = array<i32>} : memref<128x896xf32, #tpu.memory_space<vmem>>, vector<4x896xf32>,
    %c0_28 = arith.constant 0 : index
    %c0_29 = arith.constant 0 : index
    %c22 = arith.constant 22 : index
    %26 = vector.load %arg1[%c0_28, %c0_29, %c22] : memref<1x4x1152xf32, #tpu.memory_space<vmem>>, vector<1x4x896xf32>
    %27 = vector.shape_cast %26 : vector<1x4x896xf32> to vector<4x896xf32>
    %c32 = arith.constant 32 : index
    %c0_30 = arith.constant 0 : index
    %28 = vector.load %arg8[%c32, %c0_30] : memref<128x896xf32, #tpu.memory_space<vmem>>, vector<4x896xf32>
    tpu.vector_store %arg8[%c32, %c0_30], %27 {strides = array<i32>} : memref<128x896xf32, #tpu.memory_space<vmem>>, vector<4x896xf32>,
    %c0_31 = arith.constant 0 : index
    %c0_32 = arith.constant 0 : index
    %c100 = arith.constant 100 : index
    %29 = vector.load %arg1[%c0_31, %c0_32, %c100] : memref<1x4x1152xf32, #tpu.memory_space<vmem>>, vector<1x4x896xf32>
    %30 = vector.shape_cast %29 : vector<1x4x896xf32> to vector<4x896xf32>
    %c36 = arith.constant 36 : index
    %c0_33 = arith.constant 0 : index
    %31 = vector.load %arg8[%c36, %c0_33] : memref<128x896xf32, #tpu.memory_space<vmem>>, vector<4x896xf32>
    tpu.vector_store %arg8[%c36, %c0_33], %30 {strides = array<i32>} : memref<128x896xf32, #tpu.memory_space<vmem>>, vector<4x896xf32>,
    %c0_34 = arith.constant 0 : index
    %c0_35 = arith.constant 0 : index
    %c101 = arith.constant 101 : index
    %32 = vector.load %arg1[%c0_34, %c0_35, %c101] : memref<1x4x1152xf32, #tpu.memory_space<vmem>>, vector<1x4x896xf32>
    %33 = vector.shape_cast %32 : vector<1x4x896xf32> to vector<4x896xf32>
    %c40 = arith.constant 40 : index
    %c0_36 = arith.constant 0 : index
    %34 = vector.load %arg8[%c40, %c0_36] : memref<128x896xf32, #tpu.memory_space<vmem>>, vector<4x896xf32>
    tpu.vector_store %arg8[%c40, %c0_36], %33 {strides = array<i32>} : memref<128x896xf32, #tpu.memory_space<vmem>>, vector<4x896xf32>,
    %c0_37 = arith.constant 0 : index
    %c0_38 = arith.constant 0 : index
    %c102 = arith.constant 102 : index
    %35 = vector.load %arg1[%c0_37, %c0_38, %c102] : memref<1x4x1152xf32, #tpu.memory_space<vmem>>, vector<1x4x896xf32>
    %36 = vector.shape_cast %35 : vector<1x4x896xf32> to vector<4x896xf32>
    %c44 = arith.constant 44 : index
    %c0_39 = arith.constant 0 : index
    %37 = vector.load %arg8[%c44, %c0_39] : memref<128x896xf32, #tpu.memory_space<vmem>>, vector<4x896xf32>
    tpu.vector_store %arg8[%c44, %c0_39], %36 {strides = array<i32>} : memref<128x896xf32, #tpu.memory_space<vmem>>, vector<4x896xf32>,
    %c0_40 = arith.constant 0 : index
    %c0_41 = arith.constant 0 : index
    %c110 = arith.constant 110 : index
    %38 = vector.load %arg1[%c0_40, %c0_41, %c110] : memref<1x4x1152xf32, #tpu.memory_space<vmem>>, vector<1x4x896xf32>
    %39 = vector.shape_cast %38 : vector<1x4x896xf32> to vector<4x896xf32>
    %c48 = arith.constant 48 : index
    %c0_42 = arith.constant 0 : index
    %40 = vector.load %arg8[%c48, %c0_42] : memref<128x896xf32, #tpu.memory_space<vmem>>, vector<4x896xf32>
    tpu.vector_store %arg8[%c48, %c0_42], %39 {strides = array<i32>} : memref<128x896xf32, #tpu.memory_space<vmem>>, vector<4x896xf32>,
    %c0_43 = arith.constant 0 : index
    %c0_44 = arith.constant 0 : index
    %c111 = arith.constant 111 : index
    %41 = vector.load %arg1[%c0_43, %c0_44, %c111] : memref<1x4x1152xf32, #tpu.memory_space<vmem>>, vector<1x4x896xf32>
    %42 = vector.shape_cast %41 : vector<1x4x896xf32> to vector<4x896xf32>
    %c52 = arith.constant 52 : index
    %c0_45 = arith.constant 0 : index
    %43 = vector.load %arg8[%c52, %c0_45] : memref<128x896xf32, #tpu.memory_space<vmem>>, vector<4x896xf32>
    tpu.vector_store %arg8[%c52, %c0_45], %42 {strides = array<i32>} : memref<128x896xf32, #tpu.memory_space<vmem>>, vector<4x896xf32>,
    %c0_46 = arith.constant 0 : index
    %c0_47 = arith.constant 0 : index
    %c112 = arith.constant 112 : index
    %44 = vector.load %arg1[%c0_46, %c0_47, %c112] : memref<1x4x1152xf32, #tpu.memory_space<vmem>>, vector<1x4x896xf32>
    %45 = vector.shape_cast %44 : vector<1x4x896xf32> to vector<4x896xf32>
    %c56 = arith.constant 56 : index
    %c0_48 = arith.constant 0 : index
    %46 = vector.load %arg8[%c56, %c0_48] : memref<128x896xf32, #tpu.memory_space<vmem>>, vector<4x896xf32>
    tpu.vector_store %arg8[%c56, %c0_48], %45 {strides = array<i32>} : memref<128x896xf32, #tpu.memory_space<vmem>>, vector<4x896xf32>,
    %c0_49 = arith.constant 0 : index
    %c0_50 = arith.constant 0 : index
    %c120 = arith.constant 120 : index
    %47 = vector.load %arg1[%c0_49, %c0_50, %c120] : memref<1x4x1152xf32, #tpu.memory_space<vmem>>, vector<1x4x896xf32>
    %48 = vector.shape_cast %47 : vector<1x4x896xf32> to vector<4x896xf32>
    %c60 = arith.constant 60 : index
    %c0_51 = arith.constant 0 : index
    %49 = vector.load %arg8[%c60, %c0_51] : memref<128x896xf32, #tpu.memory_space<vmem>>, vector<4x896xf32>
    tpu.vector_store %arg8[%c60, %c0_51], %48 {strides = array<i32>} : memref<128x896xf32, #tpu.memory_space<vmem>>, vector<4x896xf32>,
    %c0_52 = arith.constant 0 : index
    %c0_53 = arith.constant 0 : index
    %c121 = arith.constant 121 : index
    %50 = vector.load %arg1[%c0_52, %c0_53, %c121] : memref<1x4x1152xf32, #tpu.memory_space<vmem>>, vector<1x4x896xf32>
    %51 = vector.shape_cast %50 : vector<1x4x896xf32> to vector<4x896xf32>
    %c64 = arith.constant 64 : index
    %c0_54 = arith.constant 0 : index
    %52 = vector.load %arg8[%c64, %c0_54] : memref<128x896xf32, #tpu.memory_space<vmem>>, vector<4x896xf32>
    tpu.vector_store %arg8[%c64, %c0_54], %51 {strides = array<i32>} : memref<128x896xf32, #tpu.memory_space<vmem>>, vector<4x896xf32>,
    %c0_55 = arith.constant 0 : index
    %c0_56 = arith.constant 0 : index
    %c122 = arith.constant 122 : index
    %53 = vector.load %arg1[%c0_55, %c0_56, %c122] : memref<1x4x1152xf32, #tpu.memory_space<vmem>>, vector<1x4x896xf32>
    %54 = vector.shape_cast %53 : vector<1x4x896xf32> to vector<4x896xf32>
    %c68 = arith.constant 68 : index
    %c0_57 = arith.constant 0 : index
    %55 = vector.load %arg8[%c68, %c0_57] : memref<128x896xf32, #tpu.memory_space<vmem>>, vector<4x896xf32>
    tpu.vector_store %arg8[%c68, %c0_57], %54 {strides = array<i32>} : memref<128x896xf32, #tpu.memory_space<vmem>>, vector<4x896xf32>,
    %c0_58 = arith.constant 0 : index
    %c0_59 = arith.constant 0 : index
    %c200 = arith.constant 200 : index
    %56 = vector.load %arg1[%c0_58, %c0_59, %c200] : memref<1x4x1152xf32, #tpu.memory_space<vmem>>, vector<1x4x896xf32>
    %57 = vector.shape_cast %56 : vector<1x4x896xf32> to vector<4x896xf32>
    %c72 = arith.constant 72 : index
    %c0_60 = arith.constant 0 : index
    %58 = vector.load %arg8[%c72, %c0_60] : memref<128x896xf32, #tpu.memory_space<vmem>>, vector<4x896xf32>
    tpu.vector_store %arg8[%c72, %c0_60], %57 {strides = array<i32>} : memref<128x896xf32, #tpu.memory_space<vmem>>, vector<4x896xf32>,
    %c0_61 = arith.constant 0 : index
    %c0_62 = arith.constant 0 : index
    %c201 = arith.constant 201 : index
    %59 = vector.load %arg1[%c0_61, %c0_62, %c201] : memref<1x4x1152xf32, #tpu.memory_space<vmem>>, vector<1x4x896xf32>
    %60 = vector.shape_cast %59 : vector<1x4x896xf32> to vector<4x896xf32>
    %c76 = arith.constant 76 : index
    %c0_63 = arith.constant 0 : index
    %61 = vector.load %arg8[%c76, %c0_63] : memref<128x896xf32, #tpu.memory_space<vmem>>, vector<4x896xf32>
    tpu.vector_store %arg8[%c76, %c0_63], %60 {strides = array<i32>} : memref<128x896xf32, #tpu.memory_space<vmem>>, vector<4x896xf32>,
    %c0_64 = arith.constant 0 : index
    %c0_65 = arith.constant 0 : index
    %c202 = arith.constant 202 : index
    %62 = vector.load %arg1[%c0_64, %c0_65, %c202] : memref<1x4x1152xf32, #tpu.memory_space<vmem>>, vector<1x4x896xf32>
    %63 = vector.shape_cast %62 : vector<1x4x896xf32> to vector<4x896xf32>
    %c80 = arith.constant 80 : index
    %c0_66 = arith.constant 0 : index
    %64 = vector.load %arg8[%c80, %c0_66] : memref<128x896xf32, #tpu.memory_space<vmem>>, vector<4x896xf32>
    tpu.vector_store %arg8[%c80, %c0_66], %63 {strides = array<i32>} : memref<128x896xf32, #tpu.memory_space<vmem>>, vector<4x896xf32>,
    %c0_67 = arith.constant 0 : index
    %c0_68 = arith.constant 0 : index
    %c210 = arith.constant 210 : index
    %65 = vector.load %arg1[%c0_67, %c0_68, %c210] : memref<1x4x1152xf32, #tpu.memory_space<vmem>>, vector<1x4x896xf32>
    %66 = vector.shape_cast %65 : vector<1x4x896xf32> to vector<4x896xf32>
    %c84 = arith.constant 84 : index
    %c0_69 = arith.constant 0 : index
    %67 = vector.load %arg8[%c84, %c0_69] : memref<128x896xf32, #tpu.memory_space<vmem>>, vector<4x896xf32>
    tpu.vector_store %arg8[%c84, %c0_69], %66 {strides = array<i32>} : memref<128x896xf32, #tpu.memory_space<vmem>>, vector<4x896xf32>,
    %c0_70 = arith.constant 0 : index
    %c0_71 = arith.constant 0 : index
    %c211 = arith.constant 211 : index
    %68 = vector.load %arg1[%c0_70, %c0_71, %c211] : memref<1x4x1152xf32, #tpu.memory_space<vmem>>, vector<1x4x896xf32>
    %69 = vector.shape_cast %68 : vector<1x4x896xf32> to vector<4x896xf32>
    %c88 = arith.constant 88 : index
    %c0_72 = arith.constant 0 : index
    %70 = vector.load %arg8[%c88, %c0_72] : memref<128x896xf32, #tpu.memory_space<vmem>>, vector<4x896xf32>
    tpu.vector_store %arg8[%c88, %c0_72], %69 {strides = array<i32>} : memref<128x896xf32, #tpu.memory_space<vmem>>, vector<4x896xf32>,
    %c0_73 = arith.constant 0 : index
    %c0_74 = arith.constant 0 : index
    %c212 = arith.constant 212 : index
    %71 = vector.load %arg1[%c0_73, %c0_74, %c212] : memref<1x4x1152xf32, #tpu.memory_space<vmem>>, vector<1x4x896xf32>
    %72 = vector.shape_cast %71 : vector<1x4x896xf32> to vector<4x896xf32>
    %c92 = arith.constant 92 : index
    %c0_75 = arith.constant 0 : index
    %73 = vector.load %arg8[%c92, %c0_75] : memref<128x896xf32, #tpu.memory_space<vmem>>, vector<4x896xf32>
    tpu.vector_store %arg8[%c92, %c0_75], %72 {strides = array<i32>} : memref<128x896xf32, #tpu.memory_space<vmem>>, vector<4x896xf32>,
    %c0_76 = arith.constant 0 : index
    %c0_77 = arith.constant 0 : index
    %c220 = arith.constant 220 : index
    %74 = vector.load %arg1[%c0_76, %c0_77, %c220] : memref<1x4x1152xf32, #tpu.memory_space<vmem>>, vector<1x4x896xf32>
    %75 = vector.shape_cast %74 : vector<1x4x896xf32> to vector<4x896xf32>
    %c96 = arith.constant 96 : index
    %c0_78 = arith.constant 0 : index
    %76 = vector.load %arg8[%c96, %c0_78] : memref<128x896xf32, #tpu.memory_space<vmem>>, vector<4x896xf32>
    tpu.vector_store %arg8[%c96, %c0_78], %75 {strides = array<i32>} : memref<128x896xf32, #tpu.memory_space<vmem>>, vector<4x896xf32>,
    %c0_79 = arith.constant 0 : index
    %c0_80 = arith.constant 0 : index
    %c221 = arith.constant 221 : index
    %77 = vector.load %arg1[%c0_79, %c0_80, %c221] : memref<1x4x1152xf32, #tpu.memory_space<vmem>>, vector<1x4x896xf32>
    %78 = vector.shape_cast %77 : vector<1x4x896xf32> to vector<4x896xf32>
    %c100_81 = arith.constant 100 : index
    %c0_82 = arith.constant 0 : index
    %79 = vector.load %arg8[%c100_81, %c0_82] : memref<128x896xf32, #tpu.memory_space<vmem>>, vector<4x896xf32>
    tpu.vector_store %arg8[%c100_81, %c0_82], %78 {strides = array<i32>} : memref<128x896xf32, #tpu.memory_space<vmem>>, vector<4x896xf32>,
    %c0_83 = arith.constant 0 : index
    %c0_84 = arith.constant 0 : index
    %c222 = arith.constant 222 : index
    %80 = vector.load %arg1[%c0_83, %c0_84, %c222] : memref<1x4x1152xf32, #tpu.memory_space<vmem>>, vector<1x4x896xf32>
    %81 = vector.shape_cast %80 : vector<1x4x896xf32> to vector<4x896xf32>
    %c104 = arith.constant 104 : index
    %c0_85 = arith.constant 0 : index
    %82 = vector.load %arg8[%c104, %c0_85] : memref<128x896xf32, #tpu.memory_space<vmem>>, vector<4x896xf32>
    tpu.vector_store %arg8[%c104, %c0_85], %81 {strides = array<i32>} : memref<128x896xf32, #tpu.memory_space<vmem>>, vector<4x896xf32>,
    %c0_86 = arith.constant 0 : index
    %c0_87 = arith.constant 0 : index
    %83 = vector.load %arg2[%c0_86, %c0_87] : memref<64x128xbf16, #tpu.memory_space<vmem>>, vector<64x128xbf16>
    %cst_88 = arith.constant 0.000000e+00 : f32
    %84 = vector.broadcast %cst_88 : f32 to vector<64x1xf32>
    %cst_89 = arith.constant 0.000000e+00 : f32
    %85 = vector.broadcast %cst_89 : f32 to vector<64x1xf32>
    %c0_90 = arith.constant 0 : index
    %c0_91 = arith.constant 0 : index
    %86 = vector.load %arg8[%c0_90, %c0_91] : memref<128x896xf32, #tpu.memory_space<vmem>>, vector<128x256xf32>
    %87 = arith.truncf %86 : vector<128x256xf32> to vector<128x256xbf16>
    %cst_92 = arith.constant dense<0.000000e+00> : vector<64x256xf32>
    %88 = tpu.matmul %83, %87, %cst_92 {dimension_numbers = #tpu.dot_dimension_numbers<[1], [0], [0], [1], [0, 0, 1, 1], [], []>} : vector<64x128xbf16>, vector<128x256xbf16>, vector<64x256xf32> -> vector<64x256xf32>
    %c0_93 = arith.constant 0 : index
    %c0_94 = arith.constant 0 : index
    %89 = vector.load %arg6[%c0_93, %c0_94] : memref<1x896xf32, #tpu.memory_space<vmem>>, vector<1x256xf32>
    %90 = vector.broadcast %89 : vector<1x256xf32> to vector<64x256xf32>
    %91 = arith.mulf %88, %90 : vector<64x256xf32>
    %cst_95 = arith.constant dense<0.000000e+00> : vector<64xf32>
    %92 = vector.multi_reduction <add>, %91, %cst_95 [1] : vector<64x256xf32> to vector<64xf32>
    %93 = vector.shape_cast %92 : vector<64xf32> to vector<64x1xf32>
    %94 = arith.addf %84, %93 : vector<64x1xf32>
    %95 = arith.mulf %91, %88 : vector<64x256xf32>
    %cst_96 = arith.constant dense<0.000000e+00> : vector<64xf32>
    %96 = vector.multi_reduction <add>, %95, %cst_96 [1] : vector<64x256xf32> to vector<64xf32>
    %97 = vector.shape_cast %96 : vector<64xf32> to vector<64x1xf32>
    %98 = arith.addf %85, %97 : vector<64x1xf32>
    %c0_97 = arith.constant 0 : index
    %c0_98 = arith.constant 0 : index
    %c0_99 = arith.constant 0 : index
    %99 = vector.load %arg7[%c0_97, %c0_98, %c0_99] : memref<1x64x896xf32, #tpu.memory_space<vmem>>, vector<1x64x256xf32>
    %100 = vector.shape_cast %99 : vector<1x64x256xf32> to vector<64x256xf32>
    %101 = vector.shape_cast %88 : vector<64x256xf32> to vector<1x64x256xf32>
    tpu.vector_store %arg7[%c0_97, %c0_98, %c0_99], %101 {strides = array<i32>} : memref<1x64x896xf32, #tpu.memory_space<vmem>>, vector<1x64x256xf32>,
    %c0_100 = arith.constant 0 : index
    %c256 = arith.constant 256 : index
    %102 = vector.load %arg8[%c0_100, %c256] : memref<128x896xf32, #tpu.memory_space<vmem>>, vector<128x256xf32>
    %103 = arith.truncf %102 : vector<128x256xf32> to vector<128x256xbf16>
    %cst_101 = arith.constant dense<0.000000e+00> : vector<64x256xf32>
    %104 = tpu.matmul %83, %103, %cst_101 {dimension_numbers = #tpu.dot_dimension_numbers<[1], [0], [0], [1], [0, 0, 1, 1], [], []>} : vector<64x128xbf16>, vector<128x256xbf16>, vector<64x256xf32> -> vector<64x256xf32>
    %c0_102 = arith.constant 0 : index
    %c256_103 = arith.constant 256 : index
    %105 = vector.load %arg6[%c0_102, %c256_103] : memref<1x896xf32, #tpu.memory_space<vmem>>, vector<1x256xf32>
    %106 = vector.broadcast %105 : vector<1x256xf32> to vector<64x256xf32>
    %107 = arith.mulf %104, %106 : vector<64x256xf32>
    %cst_104 = arith.constant dense<0.000000e+00> : vector<64xf32>
    %108 = vector.multi_reduction <add>, %107, %cst_104 [1] : vector<64x256xf32> to vector<64xf32>
    %109 = vector.shape_cast %108 : vector<64xf32> to vector<64x1xf32>
    %110 = arith.addf %94, %109 : vector<64x1xf32>
    %111 = arith.mulf %107, %104 : vector<64x256xf32>
    %cst_105 = arith.constant dense<0.000000e+00> : vector<64xf32>
    %112 = vector.multi_reduction <add>, %111, %cst_105 [1] : vector<64x256xf32> to vector<64xf32>
    %113 = vector.shape_cast %112 : vector<64xf32> to vector<64x1xf32>
    %114 = arith.addf %98, %113 : vector<64x1xf32>
    %c0_106 = arith.constant 0 : index
    %c0_107 = arith.constant 0 : index
    %c256_108 = arith.constant 256 : index
    %115 = vector.load %arg7[%c0_106, %c0_107, %c256_108] : memref<1x64x896xf32, #tpu.memory_space<vmem>>, vector<1x64x256xf32>
    %116 = vector.shape_cast %115 : vector<1x64x256xf32> to vector<64x256xf32>
    %117 = vector.shape_cast %104 : vector<64x256xf32> to vector<1x64x256xf32>
    tpu.vector_store %arg7[%c0_106, %c0_107, %c256_108], %117 {strides = array<i32>} : memref<1x64x896xf32, #tpu.memory_space<vmem>>, vector<1x64x256xf32>,
    %c0_109 = arith.constant 0 : index
    %c512 = arith.constant 512 : index
    %118 = vector.load %arg8[%c0_109, %c512] : memref<128x896xf32, #tpu.memory_space<vmem>>, vector<128x256xf32>
    %119 = arith.truncf %118 : vector<128x256xf32> to vector<128x256xbf16>
    %cst_110 = arith.constant dense<0.000000e+00> : vector<64x256xf32>
    %120 = tpu.matmul %83, %119, %cst_110 {dimension_numbers = #tpu.dot_dimension_numbers<[1], [0], [0], [1], [0, 0, 1, 1], [], []>} : vector<64x128xbf16>, vector<128x256xbf16>, vector<64x256xf32> -> vector<64x256xf32>
    %c0_111 = arith.constant 0 : index
    %c512_112 = arith.constant 512 : index
    %121 = vector.load %arg6[%c0_111, %c512_112] : memref<1x896xf32, #tpu.memory_space<vmem>>, vector<1x256xf32>
    %122 = vector.broadcast %121 : vector<1x256xf32> to vector<64x256xf32>
    %123 = arith.mulf %120, %122 : vector<64x256xf32>
    %cst_113 = arith.constant dense<0.000000e+00> : vector<64xf32>
    %124 = vector.multi_reduction <add>, %123, %cst_113 [1] : vector<64x256xf32> to vector<64xf32>
    %125 = vector.shape_cast %124 : vector<64xf32> to vector<64x1xf32>
    %126 = arith.addf %110, %125 : vector<64x1xf32>
    %127 = arith.mulf %123, %120 : vector<64x256xf32>
    %cst_114 = arith.constant dense<0.000000e+00> : vector<64xf32>
    %128 = vector.multi_reduction <add>, %127, %cst_114 [1] : vector<64x256xf32> to vector<64xf32>
    %129 = vector.shape_cast %128 : vector<64xf32> to vector<64x1xf32>
    %130 = arith.addf %114, %129 : vector<64x1xf32>
    %c0_115 = arith.constant 0 : index
    %c0_116 = arith.constant 0 : index
    %c512_117 = arith.constant 512 : index
    %131 = vector.load %arg7[%c0_115, %c0_116, %c512_117] : memref<1x64x896xf32, #tpu.memory_space<vmem>>, vector<1x64x256xf32>
    %132 = vector.shape_cast %131 : vector<1x64x256xf32> to vector<64x256xf32>
    %133 = vector.shape_cast %120 : vector<64x256xf32> to vector<1x64x256xf32>
    tpu.vector_store %arg7[%c0_115, %c0_116, %c512_117], %133 {strides = array<i32>} : memref<1x64x896xf32, #tpu.memory_space<vmem>>, vector<1x64x256xf32>,
    %c0_118 = arith.constant 0 : index
    %c768 = arith.constant 768 : index
    %134 = vector.load %arg8[%c0_118, %c768] : memref<128x896xf32, #tpu.memory_space<vmem>>, vector<128x128xf32>
    %135 = arith.truncf %134 : vector<128x128xf32> to vector<128x128xbf16>
    %cst_119 = arith.constant dense<0.000000e+00> : vector<64x128xf32>
    %136 = tpu.matmul %83, %135, %cst_119 {dimension_numbers = #tpu.dot_dimension_numbers<[1], [0], [0], [1], [0, 0, 1, 1], [], []>} : vector<64x128xbf16>, vector<128x128xbf16>, vector<64x128xf32> -> vector<64x128xf32>
    %c0_120 = arith.constant 0 : index
    %c768_121 = arith.constant 768 : index
    %137 = vector.load %arg6[%c0_120, %c768_121] : memref<1x896xf32, #tpu.memory_space<vmem>>, vector<1x128xf32>
    %138 = vector.broadcast %137 : vector<1x128xf32> to vector<64x128xf32>
    %139 = arith.mulf %136, %138 : vector<64x128xf32>
    %cst_122 = arith.constant dense<0.000000e+00> : vector<64xf32>
    %140 = vector.multi_reduction <add>, %139, %cst_122 [1] : vector<64x128xf32> to vector<64xf32>
    %141 = vector.shape_cast %140 : vector<64xf32> to vector<64x1xf32>
    %142 = arith.addf %126, %141 : vector<64x1xf32>
    %143 = arith.mulf %139, %136 : vector<64x128xf32>
    %cst_123 = arith.constant dense<0.000000e+00> : vector<64xf32>
    %144 = vector.multi_reduction <add>, %143, %cst_123 [1] : vector<64x128xf32> to vector<64xf32>
    %145 = vector.shape_cast %144 : vector<64xf32> to vector<64x1xf32>
    %146 = arith.addf %130, %145 : vector<64x1xf32>
    %c0_124 = arith.constant 0 : index
    %c0_125 = arith.constant 0 : index
    %c768_126 = arith.constant 768 : index
    %147 = vector.load %arg7[%c0_124, %c0_125, %c768_126] : memref<1x64x896xf32, #tpu.memory_space<vmem>>, vector<1x64x128xf32>
    %148 = vector.shape_cast %147 : vector<1x64x128xf32> to vector<64x128xf32>
    %149 = vector.shape_cast %136 : vector<64x128xf32> to vector<1x64x128xf32>
    tpu.vector_store %arg7[%c0_124, %c0_125, %c768_126], %149 {strides = array<i32>} : memref<1x64x896xf32, #tpu.memory_space<vmem>>, vector<1x64x128xf32>,
    %c0_127 = arith.constant 0 : index
    %c0_128 = arith.constant 0 : index
    %150 = vector.load %arg3[%c0_127, %c0_128] : memref<64x64xf32, #tpu.memory_space<vmem>>, vector<64x64xf32>
    %cst_129 = arith.constant dense<0.000000e+00> : vector<64x1xf32>
    %151 = tpu.matmul %150, %142, %cst_129 {dimension_numbers = #tpu.dot_dimension_numbers<[1], [0], [0], [1], [0, 0, 1, 1], [], []>} : vector<64x64xf32>, vector<64x1xf32>, vector<64x1xf32> -> vector<64x1xf32>
    %c0_130 = arith.constant 0 : index
    %c0_131 = arith.constant 0 : index
    %152 = vector.load %arg3[%c0_130, %c0_131] : memref<64x64xf32, #tpu.memory_space<vmem>>, vector<64x64xf32>
    %cst_132 = arith.constant dense<0.000000e+00> : vector<64x1xf32>
    %153 = tpu.matmul %152, %146, %cst_132 {dimension_numbers = #tpu.dot_dimension_numbers<[1], [0], [0], [1], [0, 0, 1, 1], [], []>} : vector<64x64xf32>, vector<64x1xf32>, vector<64x1xf32> -> vector<64x1xf32>
    %154 = arith.mulf %151, %151 : vector<64x1xf32>
    %155 = arith.subf %153, %154 : vector<64x1xf32>
    %cst_133 = arith.constant 0.000000e+00 : f32
    %156 = vector.broadcast %cst_133 : f32 to vector<64x1xf32>
    %157 = arith.maximumf %155, %156 : vector<64x1xf32>
    %cst_134 = arith.constant 9.99999974E-6 : f32
    %158 = vector.broadcast %cst_134 : f32 to vector<64x1xf32>
    %159 = arith.addf %157, %158 : vector<64x1xf32>
    %160 = math.rsqrt %159 : vector<64x1xf32>
    %c0_135 = arith.constant 0 : index
    %c0_136 = arith.constant 0 : index
    %161 = vector.load %arg4[%c0_135, %c0_136] : memref<64x1xf32, #tpu.memory_space<vmem>>, vector<64x1xf32>
    %162 = arith.mulf %160, %161 : vector<64x1xf32>
    %c0_137 = arith.constant 0 : index
    %c0_138 = arith.constant 0 : index
    %163 = vector.load %arg5[%c0_137, %c0_138] : memref<64x1xf32, #tpu.memory_space<vmem>>, vector<64x1xf32>
    %164 = arith.mulf %151, %162 : vector<64x1xf32>
    %165 = arith.subf %163, %164 : vector<64x1xf32>
    %c0_139 = arith.constant 0 : index
    %c0_140 = arith.constant 0 : index
    %c0_141 = arith.constant 0 : index
    %166 = vector.load %arg7[%c0_139, %c0_140, %c0_141] : memref<1x64x896xf32, #tpu.memory_space<vmem>>, vector<1x64x256xf32>
    %167 = vector.shape_cast %166 : vector<1x64x256xf32> to vector<64x256xf32>
    %168 = vector.broadcast %162 : vector<64x1xf32> to vector<64x256xf32>
    %169 = arith.mulf %167, %168 : vector<64x256xf32>
    %170 = vector.broadcast %165 : vector<64x1xf32> to vector<64x256xf32>
    %171 = arith.addf %169, %170 : vector<64x256xf32>
    %cst_142 = arith.constant 0.000000e+00 : f32
    %172 = vector.broadcast %cst_142 : f32 to vector<64x256xf32>
    %173 = arith.maximumf %171, %172 : vector<64x256xf32>
    %c0_143 = arith.constant 0 : index
    %c0_144 = arith.constant 0 : index
    %c0_145 = arith.constant 0 : index
    %174 = vector.load %arg7[%c0_143, %c0_144, %c0_145] : memref<1x64x896xf32, #tpu.memory_space<vmem>>, vector<1x64x256xf32>
    %175 = vector.shape_cast %174 : vector<1x64x256xf32> to vector<64x256xf32>
    %176 = vector.shape_cast %173 : vector<64x256xf32> to vector<1x64x256xf32>
    tpu.vector_store %arg7[%c0_143, %c0_144, %c0_145], %176 {strides = array<i32>} : memref<1x64x896xf32, #tpu.memory_space<vmem>>, vector<1x64x256xf32>,
    %c0_146 = arith.constant 0 : index
    %c0_147 = arith.constant 0 : index
    %c256_148 = arith.constant 256 : index
    %177 = vector.load %arg7[%c0_146, %c0_147, %c256_148] : memref<1x64x896xf32, #tpu.memory_space<vmem>>, vector<1x64x256xf32>
    %178 = vector.shape_cast %177 : vector<1x64x256xf32> to vector<64x256xf32>
    %179 = vector.broadcast %162 : vector<64x1xf32> to vector<64x256xf32>
    %180 = arith.mulf %178, %179 : vector<64x256xf32>
    %181 = vector.broadcast %165 : vector<64x1xf32> to vector<64x256xf32>
    %182 = arith.addf %180, %181 : vector<64x256xf32>
    %cst_149 = arith.constant 0.000000e+00 : f32
    %183 = vector.broadcast %cst_149 : f32 to vector<64x256xf32>
    %184 = arith.maximumf %182, %183 : vector<64x256xf32>
    %c0_150 = arith.constant 0 : index
    %c0_151 = arith.constant 0 : index
    %c256_152 = arith.constant 256 : index
    %185 = vector.load %arg7[%c0_150, %c0_151, %c256_152] : memref<1x64x896xf32, #tpu.memory_space<vmem>>, vector<1x64x256xf32>
    %186 = vector.shape_cast %185 : vector<1x64x256xf32> to vector<64x256xf32>
    %187 = vector.shape_cast %184 : vector<64x256xf32> to vector<1x64x256xf32>
    tpu.vector_store %arg7[%c0_150, %c0_151, %c256_152], %187 {strides = array<i32>} : memref<1x64x896xf32, #tpu.memory_space<vmem>>, vector<1x64x256xf32>,
    %c0_153 = arith.constant 0 : index
    %c0_154 = arith.constant 0 : index
    %c512_155 = arith.constant 512 : index
    %188 = vector.load %arg7[%c0_153, %c0_154, %c512_155] : memref<1x64x896xf32, #tpu.memory_space<vmem>>, vector<1x64x256xf32>
    %189 = vector.shape_cast %188 : vector<1x64x256xf32> to vector<64x256xf32>
    %190 = vector.broadcast %162 : vector<64x1xf32> to vector<64x256xf32>
    %191 = arith.mulf %189, %190 : vector<64x256xf32>
    %192 = vector.broadcast %165 : vector<64x1xf32> to vector<64x256xf32>
    %193 = arith.addf %191, %192 : vector<64x256xf32>
    %cst_156 = arith.constant 0.000000e+00 : f32
    %194 = vector.broadcast %cst_156 : f32 to vector<64x256xf32>
    %195 = arith.maximumf %193, %194 : vector<64x256xf32>
    %c0_157 = arith.constant 0 : index
    %c0_158 = arith.constant 0 : index
    %c512_159 = arith.constant 512 : index
    %196 = vector.load %arg7[%c0_157, %c0_158, %c512_159] : memref<1x64x896xf32, #tpu.memory_space<vmem>>, vector<1x64x256xf32>
    %197 = vector.shape_cast %196 : vector<1x64x256xf32> to vector<64x256xf32>
    %198 = vector.shape_cast %195 : vector<64x256xf32> to vector<1x64x256xf32>
    tpu.vector_store %arg7[%c0_157, %c0_158, %c512_159], %198 {strides = array<i32>} : memref<1x64x896xf32, #tpu.memory_space<vmem>>, vector<1x64x256xf32>,
    %c0_160 = arith.constant 0 : index
    %c0_161 = arith.constant 0 : index
    %c768_162 = arith.constant 768 : index
    %199 = vector.load %arg7[%c0_160, %c0_161, %c768_162] : memref<1x64x896xf32, #tpu.memory_space<vmem>>, vector<1x64x128xf32>
    %200 = vector.shape_cast %199 : vector<1x64x128xf32> to vector<64x128xf32>
    %201 = vector.broadcast %162 : vector<64x1xf32> to vector<64x128xf32>
    %202 = arith.mulf %200, %201 : vector<64x128xf32>
    %203 = vector.broadcast %165 : vector<64x1xf32> to vector<64x128xf32>
    %204 = arith.addf %202, %203 : vector<64x128xf32>
    %cst_163 = arith.constant 0.000000e+00 : f32
    %205 = vector.broadcast %cst_163 : f32 to vector<64x128xf32>
    %206 = arith.maximumf %204, %205 : vector<64x128xf32>
    %c0_164 = arith.constant 0 : index
    %c0_165 = arith.constant 0 : index
    %c768_166 = arith.constant 768 : index
    %207 = vector.load %arg7[%c0_164, %c0_165, %c768_166] : memref<1x64x896xf32, #tpu.memory_space<vmem>>, vector<1x64x128xf32>
    %208 = vector.shape_cast %207 : vector<1x64x128xf32> to vector<64x128xf32>
    %209 = vector.shape_cast %206 : vector<64x128xf32> to vector<1x64x128xf32>
    tpu.vector_store %arg7[%c0_164, %c0_165, %c768_166], %209 {strides = array<i32>} : memref<1x64x896xf32, #tpu.memory_space<vmem>>, vector<1x64x128xf32>,
    return
  }
  func.func @transform_0(%arg0: i32) -> (i32, i32, i32) {
    %c0_i32 = arith.constant 0 : i32
    %c0_i32_0 = arith.constant 0 : i32
    %c0_i32_1 = arith.constant 0 : i32
    return %arg0, %c0_i32, %c0_i32_0 : i32, i32, i32
  }
  func.func @transform_1(%arg0: i32) -> (i32, i32) {
    %c0_i32 = arith.constant 0 : i32
    %c0_i32_0 = arith.constant 0 : i32
    %c0_i32_1 = arith.constant 0 : i32
    return %c0_i32, %c0_i32_0 : i32, i32
  }
  func.func @transform_2(%arg0: i32) -> (i32, i32) {
    %c0_i32 = arith.constant 0 : i32
    %c0_i32_0 = arith.constant 0 : i32
    %c0_i32_1 = arith.constant 0 : i32
    return %c0_i32, %c0_i32_0 : i32, i32
  }
  func.func @transform_3(%arg0: i32) -> (i32, i32) {
    %c0_i32 = arith.constant 0 : i32
    %c0_i32_0 = arith.constant 0 : i32
    %c0_i32_1 = arith.constant 0 : i32
    return %c0_i32, %c0_i32_0 : i32, i32
  }
  func.func @transform_4(%arg0: i32) -> (i32, i32) {
    %c0_i32 = arith.constant 0 : i32
    %c0_i32_0 = arith.constant 0 : i32
    %c0_i32_1 = arith.constant 0 : i32
    return %c0_i32, %c0_i32_0 : i32, i32
  }
  func.func @transform_5(%arg0: i32) -> (i32, i32) {
    %c0_i32 = arith.constant 0 : i32
    %c0_i32_0 = arith.constant 0 : i32
    %c0_i32_1 = arith.constant 0 : i32
    return %c0_i32, %c0_i32_0 : i32, i32
  }
  func.func @transform_6(%arg0: i32) -> (i32, i32, i32) {
    %c0_i32 = arith.constant 0 : i32
    %c0_i32_0 = arith.constant 0 : i32
    %c0_i32_1 = arith.constant 0 : i32
    return %arg0, %c0_i32, %c0_i32_0 : i32, i32, i32
  }
}

</mosaic_0001>

<bundles_post_ra>
// kernel: conv3d_block.1
= control target key start
LH: loop header
LB: loop body
LE: loop exit
PB: predicated region body
PF: predicated region fallthrough
CT: control target
= control target key end

     0   :  { %s3611_s21 = smov 0   ;;  %s5308_s0 = inlined_call_operand.vmem [shape: f32[2,4,1152], index: 0, kind: input, shape index: {}]   ;;  %s5309_s1 = inlined_call_operand.vmem [shape: bf16[64,128], index: 1, kind: input, shape index: {}]   ;;  %s5310_s2 = inlined_call_operand.vmem [shape: f32[64,64], index: 2, kind: input, shape index: {}]   ;;  %s5311_s3 = inlined_call_operand.vmem [shape: f32[64,1], index: 3, kind: input, shape index: {}]   ;;  %s5312_s4 = inlined_call_operand.vmem [shape: f32[64,1], index: 4, kind: input, shape index: {}]   ;;  %s5313_s5 = inlined_call_operand.vmem [shape: f32[1,896], index: 5, kind: input, shape index: {}]   ;;  %s5314_s6 = inlined_call_operand.vmem [shape: f32[2,64,896], index: 6, kind: output, shape index: {}]  }
   0x1 LB: > { %s3267_s22 = sadd.s32 4294967295, %s3545_s21   ;;  %p3271_p0 = scmp.ge.s32.totalorder %s3545_s21, 1  ;;  %s3545_s21 = sphi %s3611_s21, %s16_s21  }
   0x2   : > { %p212_p1 = scmp.lt.s32.totalorder %s3545_s21, 3 }
   0x4   : > { %p213_p2 = pnand %p3271_p0, %p212_p1 }
   0x5   : > { %p242_p3 = scmp.lt.s32.totalorder (!%p213_p2), %s3267_s22, 1  ;;  %s3547_s27 = smov (!%p213_p2), 126   ;;  %vm5326_vm0 = vcmask (!%p213_p2), 1031168   ;;  %vm5325_vm1 = vcmask (!%p213_p2), 965632   ;;  %vm5327_vm2 = vcmask (!%p213_p2), 1039360   ;;  %vm5333_vm3 = vcmask (!%p213_p2), 957440  }
   0x6   : > { %216 = sbr.rel (%p213_p2) target bundleno = 1448 (0x5a8), region = 44  ;;  %s3548_s28 = smov (!%p213_p2), 127   ;;  %vm5332_vm4 = vcmask (!%p213_p2), 949248   ;;  %vm5330_vm5 = vcmask (!%p213_p2), 883712   ;;  %vm5331_vm6 = vcmask (!%p213_p2), 875520   ;;  %vm5345_vm7 = vcmask (!%p213_p2), 867328  }
   0x7   : > { %s3549_s29 = smov (!%p213_p2), 118   ;;  %s5328_s30 = smov (!%p213_p2), 117   ;;  %vm5341_vm8 = vcmask (!%p213_p2), 228352   ;;  %vm5339_vm9 = vcmask (!%p213_p2), 220160   ;;  %vm5340_vm10 = vcmask (!%p213_p2), 211968   ;;  %vm872_vm11 = vcmask (!%p213_p2), 146432  }
   0x8   : > { %s5329_s7 = smov (!%p213_p2), 116   ;;  %s5317_s8 = smov (!%p213_p2), 108   ;;  %vm5344_vm12 = vcmask (!%p213_p2), 138240   ;;  %vm5343_vm13 = vcmask (!%p213_p2), 130048   ;;  %vm5342_vm14 = vcmask (!%p213_p2), 64512   ;;  %vm1072_vm15 = vcmask (!%p213_p2), 56320  }
   0x9   : > { %s5315_s9 = smov (!%p213_p2), 107   ;;  %s5336_s10 = smov (!%p213_p2), 106  }
   0xa   : > { %s5319_s11 = smov (!%p213_p2), 28   ;;  %s5321_s12 = smov (!%p213_p2), 27  }
   0xb   : > { %s5323_s13 = smov (!%p213_p2), 26   ;;  %s3558_s14 = smov (!%p213_p2), 18  }
   0xc   : > { %s3559_s15 = smov (!%p213_p2), 17   ;;  %s3560_s16 = smov (!%p213_p2), 16  }
   0xd   : > { %s5397_s22 = smov (!%p242_p3, %s3267_s22), 1  ;;  %s3561_s17 = smov 8  }
   0xe   : > { %s3461_s23 = smul.u32 36, %s5397_s22  ;;  %s3562_s18 = smov 7  }
   0xf   : > { %s3563_s19 = smov 6   ;;  %s3564_s20 = smov 56  }
  0x10   : > { %s3625_s26 = scalar_lea.vmem %s5308_s0, %s3461_s23  ;;  %s3565_s23 = smov 55  }
  0x11   : > { %v3628_v0 = vld [vmem:[%s3625_s26 + $0x8] sm:$0xff]  ;;  %v3631_v1 = vld [vmem:[%s3625_s26] sm:$0xff]  ;;  %v3742_v6 = vld [vmem:[%s3625_s26 + $0x10] sm:$0xff]  ;;  %s3566_s24 = smov 54   ;;  %s3567_s25 = smov 46  }
  0x12   : > { %360 = vrot.lane.b32.xlu1 %v3628_v0, %s3547_s27  ;;  %v3637_v2 = vcombine.high %v3628_v0, %v3628_v0  ;;  %308 = vrot.lane.b32.xlu0 %v3631_v1, %s3548_s28  ;;  %v3643_v3 = vcombine.high %v3631_v1, %v3631_v1  ;;  %287 = vst [vmem:[#allocation2] sm:$0xf] %v3631_v1  ;;  %289 = vst [vmem:[#allocation2 + $0x10] sm:$0xf] %v3628_v0  ;;  %v3765_v8 = vld [vmem:[%s3625_s26 + $0x4] sm:$0xff]  ;;  %v3780_v10 = vld [vmem:[%s3625_s26 + $0xc] sm:$0xff] }
  0x13   : > { %v3655_v4 = vcombine.low %v3628_v0, %v3628_v0  ;;  %v3659_v5 = vcombine.low %v3631_v1, %v3631_v1  ;;  %v3750_v7 = vcombine.low %v3742_v6, %v3742_v6  ;;  %v3773_v9 = vcombine.high %v3765_v8, %v3765_v8 }
  0x14   : > { %288 = vst [vmem:[#allocation2 + $0x8] sm:$0xf] %v3643_v3  ;;  %290 = vst [vmem:[#allocation2 + $0x18] sm:$0xf] %v3637_v2  ;;  %v3788_v11 = vcombine.low %v3780_v10, %v3780_v10  ;;  %v3800_v17 = vcombine.low %v3765_v8, %v3765_v8 }
  0x16   : > { %358 = vrot.lane.b32.xlu1 %v3643_v3, %s3547_s27  ;;  %408 = vrot.lane.b32.xlu0 %v3631_v1, %s3549_s29 }
  0x1a   : > { %410 = vrot.lane.b32.xlu1 %v3655_v4, %s3549_s29  ;;  %310 = vrot.lane.b32.xlu0 %v3655_v4, %s3548_s28 }
  0x1e   : > { %356 = vrot.lane.b32.xlu1 %v3631_v1, %s3547_s27  ;;  %306 = vrot.lane.b32.xlu0 %v3659_v5, %s3548_s28 }
  0x22   : > { %458 = vrot.lane.b32.xlu1 %v3643_v3, %s5328_s30  ;;  %406 = vrot.lane.b32.xlu0 %v3659_v5, %s3549_s29 }
  0x26   : > { %508 = vrot.lane.b32.xlu1 %v3631_v1, %s5329_s7  ;;  %460 = vrot.lane.b32.xlu0 %v3628_v0, %s5328_s30 }
  0x2a   : > { %558 = vrot.lane.b32.xlu1 %v3643_v3, %s5317_s8  ;;  %510 = vrot.lane.b32.xlu0 %v3655_v4, %s5329_s7 }
  0x2e   : > { %608 = vrot.lane.b32.xlu1 %v3631_v1, %s5315_s9  ;;  %560 = vrot.lane.b32.xlu0 %v3628_v0, %s5317_s8 }
  0x32   : > { %456 = vrot.lane.b32.xlu1 %v3631_v1, %s5328_s30  ;;  %610 = vrot.lane.b32.xlu0 %v3655_v4, %s5315_s9 }
  0x36   : > { %556 = vrot.lane.b32.xlu1 %v3631_v1, %s5317_s8  ;;  %506 = vrot.lane.b32.xlu0 %v3659_v5, %s5329_s7 }
  0x3a   : > { %658 = vrot.lane.b32.xlu1 %v3643_v3, %s5336_s10  ;;  %606 = vrot.lane.b32.xlu0 %v3659_v5, %s5315_s9 }
  0x3e   : > { %708 = vrot.lane.b32.xlu1 %v3631_v1, %s5319_s11  ;;  %660 = vrot.lane.b32.xlu0 %v3628_v0, %s5336_s10 }
  0x42   : > { %758 = vrot.lane.b32.xlu1 %v3643_v3, %s5321_s12  ;;  %710 = vrot.lane.b32.xlu0 %v3655_v4, %s5319_s11 }
  0x46   : > { %808 = vrot.lane.b32.xlu1 %v3631_v1, %s5323_s13  ;;  %760 = vrot.lane.b32.xlu0 %v3628_v0, %s5321_s12 }
  0x4a   : > { %656 = vrot.lane.b32.xlu1 %v3631_v1, %s5336_s10  ;;  %810 = vrot.lane.b32.xlu0 %v3655_v4, %s5323_s13 }
  0x4e   : > { %756 = vrot.lane.b32.xlu1 %v3631_v1, %s5321_s12  ;;  %706 = vrot.lane.b32.xlu0 %v3659_v5, %s5319_s11 }
  0x52   : > { %858 = vrot.lane.b32.xlu1 %v3643_v3, %s3558_s14  ;;  %806 = vrot.lane.b32.xlu0 %v3659_v5, %s5323_s13 }
  0x56   : > { %908 = vrot.lane.b32.xlu1 %v3631_v1, %s3559_s15  ;;  %860 = vrot.lane.b32.xlu0 %v3628_v0, %s3558_s14 }
  0x5a   : > { %958 = vrot.lane.b32.xlu1 %v3643_v3, %s3560_s16  ;;  %910 = vrot.lane.b32.xlu0 %v3655_v4, %s3559_s15 }
  0x5e   : > { %1008 = vrot.lane.b32.xlu1 %v3631_v1, %s3561_s17  ;;  %960 = vrot.lane.b32.xlu0 %v3628_v0, %s3560_s16 }
  0x62   : > { %856 = vrot.lane.b32.xlu1 %v3631_v1, %s3558_s14  ;;  %1010 = vrot.lane.b32.xlu0 %v3655_v4, %s3561_s17 }
  0x66   : > { %956 = vrot.lane.b32.xlu1 %v3631_v1, %s3560_s16  ;;  %906 = vrot.lane.b32.xlu0 %v3659_v5, %s3559_s15 }
  0x6a   : > { %312 = vrot.lane.b32.xlu1 %v3628_v0, %s3548_s28  ;;  %1006 = vrot.lane.b32.xlu0 %v3659_v5, %s3561_s17 }
  0x6e   : > { %362 = vrot.lane.b32.xlu1 %v3637_v2, %s3547_s27  ;;  %314 = vrot.lane.b32.xlu0 %v3750_v7, %s3548_s28 }
  0x72   : > { %412 = vrot.lane.b32.xlu1 %v3628_v0, %s3549_s29  ;;  %364 = vrot.lane.b32.xlu0 %v3742_v6, %s3547_s27 }
  0x76   : > { %1058 = vrot.lane.b32.xlu1 %v3643_v3, %s3562_s18  ;;  %414 = vrot.lane.b32.xlu0 %v3750_v7, %s3549_s29 }
  0x7a   : > { %1108 = vrot.lane.b32.xlu1 %v3631_v1, %s3563_s19  ;;  %1060 = vrot.lane.b32.xlu0 %v3628_v0, %s3562_s18 }
  0x7e   : > { %1158 = vrot.lane.b32.xlu1 %v3773_v9, %s3564_s20  ;;  %1110 = vrot.lane.b32.xlu0 %v3655_v4, %s3563_s19 }
  0x82   : > { %1208 = vrot.lane.b32.xlu1 %v3765_v8, %s3565_s23  ;;  %1160 = vrot.lane.b32.xlu0 %v3780_v10, %s3564_s20 }
  0x84   : > { %v3790_v12 = vpop.permute.xlu1 %360  ;;  %v309_v13 = vpop.permute.xlu0 %308 }
  0x86   : > { %1056 = vrot.lane.b32.xlu1 %v3631_v1, %s3562_s18  ;;  %1210 = vrot.lane.b32.xlu0 %v3788_v11, %s3565_s23 }
  0x88   : > { %v359_v14 = vpop.permute.xlu1 %358  ;;  %v409_v15 = vpop.permute.xlu0 %408 }
  0x89   : > { %v374_v16 = vsel %vm5326_vm0, %v359_v14, %v3790_v12 }
  0x8a   : > { %388 = vst [vmem:[#allocation2 + $0x40] sm:$0xf] %v374_v16  ;;  %1156 = vrot.lane.b32.xlu1 %v3765_v8, %s3564_s20  ;;  %1106 = vrot.lane.b32.xlu0 %v3659_v5, %s3563_s19 }
  0x8c   : > { %v3806_v18 = vpop.permute.xlu1 %410  ;;  %v3808_v19 = vpop.permute.xlu0 %310 }
  0x8d   : > { %v424_v20 = vsel %vm5325_vm1, %v409_v15, %v3806_v18  ;;  %v324_v21 = vsel %vm5327_vm2, %v309_v13, %v3808_v19 }
  0x8e   : > { %438 = vst [vmem:[#allocation2 + $0x40] sm:$0xf0] %v424_v20  ;;  %338 = vst [vmem:[#allocation2 + $0x8] sm:$0xf0] %v324_v21  ;;  %462 = vrot.lane.b32.xlu1 %v3637_v2, %s5328_s30  ;;  %1206 = vrot.lane.b32.xlu0 %v3800_v17, %s3565_s23 }
  0x90   : > { %v357_v22 = vpop.permute.xlu1 %356  ;;  %v307_v23 = vpop.permute.xlu0 %306 }
  0x91   : > { %v373_v24 = vsel %vm5326_vm0, %v357_v22, %v359_v14  ;;  %v323_v25 = vsel %vm5327_vm2, %v307_v23, %v309_v13 }
  0x92   : > { %387 = vst [vmem:[#allocation2 + $0x38] sm:$0xf] %v373_v24  ;;  %337 = vst [vmem:[#allocation2] sm:$0xf0] %v323_v25  ;;  %512 = vrot.lane.b32.xlu1 %v3628_v0, %s5329_s7  ;;  %464 = vrot.lane.b32.xlu0 %v3742_v6, %s5328_s30 }
  0x94   : > { %v459_v26 = vpop.permute.xlu1 %458  ;;  %v407_v27 = vpop.permute.xlu0 %406 }
  0x95   : > { %v423_v28 = vsel %vm5325_vm1, %v407_v27, %v409_v15  ;;  %v1603_v29 = vld [vmem:[#allocation2 + $0x8] sm:$0xff]  ;;  %v1605_v30 = vld [vmem:[#allocation2 + $0x40] sm:$0xff] }
  0x96   : > { %437 = vst [vmem:[#allocation2 + $0x38] sm:$0xf0] %v423_v28  ;;  %562 = vrot.lane.b32.xlu1 %v3637_v2, %s5317_s8  ;;  %514 = vrot.lane.b32.xlu0 %v3750_v7, %s5329_s7  ;;  %v1635_v31 = vpack.c.bf16 %v1605_v30, %v1603_v29 }
  0x98   : > { %v509_v32 = vpop.permute.xlu1 %508  ;;  %v3829_v33 = vpop.permute.xlu0 %460  ;;  %1674 = vmatprep.subr.bf16.mxu0 %v1635_v31 }
  0x99   : > { %v474_v34 = vsel %vm5333_vm3, %v459_v26, %v3829_v33  ;;  %v1602_v38 = vld [vmem:[#allocation2] sm:$0xff] }
  0x9a   : > { %488 = vst [vmem:[#allocation2 + $0x78] sm:$0xf] %v474_v34  ;;  %612 = vrot.lane.b32.xlu1 %v3628_v0, %s5315_s9  ;;  %564 = vrot.lane.b32.xlu0 %v3742_v6, %s5317_s8  ;;  %s5334_s8 = smov 44  }
  0x9c   : > { %v559_v35 = vpop.permute.xlu1 %558  ;;  %v3837_v36 = vpop.permute.xlu0 %510 }
  0x9d   : > { %v524_v37 = vsel %vm5332_vm4, %v509_v32, %v3837_v36  ;;  %v1604_v39 = vld [vmem:[#allocation2 + $0x38] sm:$0xff] }
  0x9e   : > { %538 = vst [vmem:[#allocation2 + $0x78] sm:$0xf0] %v524_v37  ;;  %1258 = vrot.lane.b32.xlu1 %v3773_v9, %s3566_s24  ;;  %614 = vrot.lane.b32.xlu0 %v3750_v7, %s5315_s9  ;;  %v1634_v40 = vpack.c.bf16 %v1604_v39, %v1602_v38  ;;  %s5337_s9 = smov 45  }
  0xa0   : > { %v609_v41 = vpop.permute.xlu1 %608  ;;  %v3845_v42 = vpop.permute.xlu0 %560  ;;  %1675 = vmatpush1.bf16.msra.mxu0 %v1634_v40 }
  0xa1   : > { %v574_v43 = vsel %vm5330_vm5, %v559_v35, %v3845_v42 }
  0xa2   : > { %588 = vst [vmem:[#allocation2 + $0xb0] sm:$0xf] %v574_v43  ;;  %1308 = vrot.lane.b32.xlu1 %v3765_v8, %s3567_s25  ;;  %1260 = vrot.lane.b32.xlu0 %v3780_v10, %s3566_s24 }
  0xa4   : > { %v457_v44 = vpop.permute.xlu1 %456  ;;  %v3853_v45 = vpop.permute.xlu0 %610 }
  0xa5   : > { %v473_v46 = vsel %vm5333_vm3, %v457_v44, %v459_v26  ;;  %v624_v47 = vsel %vm5331_vm6, %v609_v41, %v3853_v45  ;;  %v1607_v55 = vld [vmem:[#allocation2 + $0x78] sm:$0xff] }
  0xa6   : > { %487 = vst [vmem:[#allocation2 + $0x70] sm:$0xf] %v473_v46  ;;  %638 = vst [vmem:[#allocation2 + $0xb0] sm:$0xf0] %v624_v47  ;;  %1358 = vrot.lane.b32.xlu1 %v3773_v9, %s5337_s9  ;;  %1310 = vrot.lane.b32.xlu0 %v3788_v11, %s3567_s25 }
  0xa8   : > { %v557_v48 = vpop.permute.xlu1 %556  ;;  %v507_v49 = vpop.permute.xlu0 %506 }
  0xa9   : > { %v573_v50 = vsel %vm5330_vm5, %v557_v48, %v559_v35  ;;  %v523_v51 = vsel %vm5332_vm4, %v507_v49, %v509_v32  ;;  %v3571_v32 = vmov 0.0  }
  0xaa   : > { %587 = vst [vmem:[#allocation2 + $0xa8] sm:$0xf] %v573_v50  ;;  %537 = vst [vmem:[#allocation2 + $0x70] sm:$0xf0] %v523_v51  ;;  %1408 = vrot.lane.b32.xlu1 %v3765_v8, %s5334_s8  ;;  %1360 = vrot.lane.b32.xlu0 %v3780_v10, %s5337_s9 }
  0xab   : > { %254 = vst [vmem:[#allocation2 + $0x2e0] sm:$0xf0] %v3571_v32  ;;  %253 = vst [vmem:[#allocation2 + $0x2d8] sm:$0xf0] %v3571_v32 }
  0xac   : > { %v659_v52 = vpop.permute.xlu1 %658  ;;  %v607_v53 = vpop.permute.xlu0 %606  ;;  %255 = vst [vmem:[#allocation2 + $0x2e8] sm:$0xf0] %v3571_v32  ;;  %256 = vst [vmem:[#allocation2 + $0x2f0] sm:$0xf0] %v3571_v32 }
  0xad   : > { %v623_v54 = vsel %vm5331_vm6, %v607_v53, %v609_v41  ;;  %v1609_v56 = vld [vmem:[#allocation2 + $0xb0] sm:$0xff]  ;;  %257 = vst [vmem:[#allocation2 + $0x2f8] sm:$0xf0] %v3571_v32  ;;  %258 = vst [vmem:[#allocation2 + $0x300] sm:$0xf0] %v3571_v32 }
  0xae   : > { %637 = vst [vmem:[#allocation2 + $0xa8] sm:$0xf0] %v623_v54  ;;  %1256 = vrot.lane.b32.xlu1 %v3765_v8, %s3566_s24  ;;  %1410 = vrot.lane.b32.xlu0 %v3788_v11, %s5334_s8  ;;  %v1637_v57 = vpack.c.bf16 %v1609_v56, %v1607_v55  ;;  %259 = vst [vmem:[#allocation2 + $0x308] sm:$0xf0] %v3571_v32  ;;  %v276_v55 = vld [vmem:[%s3625_s26 + $0x10] sm:$0xff] }
  0xaf   : > { %291 = vst [vmem:[#allocation2 + $0x20] sm:$0xf] %v276_v55 }
  0xb0   : > { %v709_v58 = vpop.permute.xlu1 %708  ;;  %v3873_v59 = vpop.permute.xlu0 %660  ;;  %1676 = vmatprep.subr.bf16.mxu0 %v1637_v57  ;;  %v283_v57 = vcombine.high %v276_v55, %v276_v55 }
  0xb1   : > { %v674_v60 = vsel %vm5345_vm7, %v659_v52, %v3873_v59  ;;  %v1606_v1 = vld [vmem:[#allocation2 + $0x70] sm:$0xff] }
  0xb2   : > { %688 = vst [vmem:[#allocation2 + $0xe8] sm:$0xf] %v674_v60  ;;  %1356 = vrot.lane.b32.xlu1 %v3765_v8, %s5337_s9  ;;  %1306 = vrot.lane.b32.xlu0 %v3800_v17, %s3567_s25  ;;  %292 = vst [vmem:[#allocation2 + $0x28] sm:$0xf] %v283_v57 }
  0xb4   : > { %v759_v61 = vpop.permute.xlu1 %758  ;;  %v3881_v62 = vpop.permute.xlu0 %710 }
  0xb5   : > { %v724_v63 = vsel %vm5341_vm8, %v709_v58, %v3881_v62  ;;  %v1608_v3 = vld [vmem:[#allocation2 + $0xa8] sm:$0xff] }
  0xb6   : > { %738 = vst [vmem:[#allocation2 + $0xe8] sm:$0xf0] %v724_v63  ;;  %662 = vrot.lane.b32.xlu1 %v3637_v2, %s5336_s10  ;;  %1406 = vrot.lane.b32.xlu0 %v3800_v17, %s5334_s8  ;;  %v1636_v4 = vpack.c.bf16 %v1608_v3, %v1606_v1 }
  0xb8   : > { %v809_v5 = vpop.permute.xlu1 %808  ;;  %v3889_v13 = vpop.permute.xlu0 %760  ;;  %1677 = vmatpush1.bf16.msra.mxu0 %v1636_v4 }
  0xb9   : > { %v774_v14 = vsel %vm5339_vm9, %v759_v61, %v3889_v13 }
  0xba   : > { %788 = vst [vmem:[#allocation2 + $0x120] sm:$0xf] %v774_v14  ;;  %712 = vrot.lane.b32.xlu1 %v3628_v0, %s5319_s11  ;;  %664 = vrot.lane.b32.xlu0 %v3742_v6, %s5336_s10 }
  0xbc   : > { %v657_v15 = vpop.permute.xlu1 %656  ;;  %v3897_v16 = vpop.permute.xlu0 %810 }
  0xbd   : > { %v673_v20 = vsel %vm5345_vm7, %v657_v15, %v659_v52  ;;  %v824_v21 = vsel %vm5340_vm10, %v809_v5, %v3897_v16  ;;  %v1611_v29 = vld [vmem:[#allocation2 + $0xe8] sm:$0xff] }
  0xbe   : > { %687 = vst [vmem:[#allocation2 + $0xe0] sm:$0xf] %v673_v20  ;;  %838 = vst [vmem:[#allocation2 + $0x120] sm:$0xf0] %v824_v21  ;;  %762 = vrot.lane.b32.xlu1 %v3637_v2, %s5321_s12  ;;  %714 = vrot.lane.b32.xlu0 %v3750_v7, %s5319_s11  ;;  %s3570_s11 = smov 36  }
  0xc0   : > { %v757_v22 = vpop.permute.xlu1 %756  ;;  %v707_v23 = vpop.permute.xlu0 %706 }
  0xc1   : > { %v773_v24 = vsel %vm5339_vm9, %v757_v22, %v759_v61  ;;  %v723_v25 = vsel %vm5341_vm8, %v707_v23, %v709_v58 }
  0xc2   : > { %787 = vst [vmem:[#allocation2 + $0x118] sm:$0xf] %v773_v24  ;;  %737 = vst [vmem:[#allocation2 + $0xe0] sm:$0xf0] %v723_v25  ;;  %812 = vrot.lane.b32.xlu1 %v3628_v0, %s5323_s13  ;;  %764 = vrot.lane.b32.xlu0 %v3742_v6, %s5321_s12  ;;  %s3572_s12 = smov 35  }
  0xc4   : > { %v859_v26 = vpop.permute.xlu1 %858  ;;  %v807_v27 = vpop.permute.xlu0 %806 }
  0xc5   : > { %v823_v28 = vsel %vm5340_vm10, %v807_v27, %v809_v5  ;;  %v1613_v30 = vld [vmem:[#allocation2 + $0x120] sm:$0xff]  ;;  %v3975_v5 = vld [vmem:[%s3625_s26 + $0x18] sm:$0xff]  ;;  %v3997_v27 = vcombine.high %v3742_v6, %v3742_v6 }
  0xc6   : > { %837 = vst [vmem:[#allocation2 + $0x118] sm:$0xf0] %v823_v28  ;;  %1458 = vrot.lane.b32.xlu1 %v3773_v9, %s3570_s11  ;;  %814 = vrot.lane.b32.xlu0 %v3750_v7, %s5323_s13  ;;  %v1639_v31 = vpack.c.bf16 %v1613_v30, %v1611_v29  ;;  %s3573_s13 = smov 34   ;;  %v3989_v24 = vcombine.low %v3975_v5, %v3975_v5 }
  0xc8   : > { %v909_v34 = vpop.permute.xlu1 %908  ;;  %v3917_v35 = vpop.permute.xlu0 %860  ;;  %1678 = vmatprep.subr.bf16.mxu0 %v1639_v31  ;;  %v3574_v31 = vmov 0  }
  0xc9   : > { %v874_v37 = vsel %vm872_vm11, %v859_v26, %v3917_v35  ;;  %v1610_v41 = vld [vmem:[#allocation2 + $0xe0] sm:$0xff]  ;;  %1706 = vmatprep.mubr.bf16.mxu0 %v3574_v31  ;;  %1951 = vmatprep.mubr.bf16.mxu1 %v3574_v31 }
  0xca   : > { %888 = vst [vmem:[#allocation2 + $0x158] sm:$0xf] %v874_v37  ;;  %1508 = vrot.lane.b32.xlu1 %v3765_v8, %s3572_s12  ;;  %1460 = vrot.lane.b32.xlu0 %v3780_v10, %s3570_s11 }
  0xcb   : > { %3499 = vset.pattern.permute.xlu0 %v3574_v31  ;;  %3500 = vset.pattern.permute.xlu1 %v3574_v31 }
  0xcc   : > { %v959_v38 = vpop.permute.xlu1 %958  ;;  %v3925_v39 = vpop.permute.xlu0 %910 }
  0xcd   : > { %v924_v40 = vsel %vm5344_vm12, %v909_v34, %v3925_v39  ;;  %v1612_v43 = vld [vmem:[#allocation2 + $0x118] sm:$0xff] }
  0xce   : > { %938 = vst [vmem:[#allocation2 + $0x158] sm:$0xf0] %v924_v40  ;;  %1558 = vrot.lane.b32.xlu1 %v3773_v9, %s3573_s13  ;;  %1510 = vrot.lane.b32.xlu0 %v3788_v11, %s3572_s12  ;;  %v1638_v44 = vpack.c.bf16 %v1612_v43, %v1610_v41 }
  0xd0   : > { %v1009_v46 = vpop.permute.xlu1 %1008  ;;  %v3933_v47 = vpop.permute.xlu0 %960  ;;  %1679 = vmatpush1.bf16.msra.mxu0 %v1638_v44 }
  0xd1   : > { %v974_v48 = vsel %vm5343_vm13, %v959_v38, %v3933_v47 }
  0xd2   : > { %988 = vst [vmem:[#allocation2 + $0x190] sm:$0xf] %v974_v48  ;;  %1456 = vrot.lane.b32.xlu1 %v3765_v8, %s3570_s11  ;;  %1560 = vrot.lane.b32.xlu0 %v3780_v10, %s3573_s13 }
  0xd4   : > { %v857_v9 = vpop.permute.xlu1 %856  ;;  %v3941_v11 = vpop.permute.xlu0 %1010 }
  0xd5   : > { %v873_v49 = vsel %vm872_vm11, %v857_v9, %v859_v26  ;;  %v1024_v50 = vsel %vm5342_vm14, %v1009_v46, %v3941_v11  ;;  %v1615_v60 = vld [vmem:[#allocation2 + $0x158] sm:$0xff] }
  0xd6   : > { %887 = vst [vmem:[#allocation2 + $0x150] sm:$0xf] %v873_v49  ;;  %1038 = vst [vmem:[#allocation2 + $0x190] sm:$0xf0] %v1024_v50  ;;  %1556 = vrot.lane.b32.xlu1 %v3765_v8, %s3573_s13  ;;  %1506 = vrot.lane.b32.xlu0 %v3800_v17, %s3572_s12 }
  0xd8   : > { %v957_v51 = vpop.permute.xlu1 %956  ;;  %v907_v52 = vpop.permute.xlu0 %906 }
  0xd9   : > { %v973_v53 = vsel %vm5343_vm13, %v957_v51, %v959_v38  ;;  %v923_v54 = vsel %vm5344_vm12, %v907_v52, %v909_v34 }
  0xda   : > { %987 = vst [vmem:[#allocation2 + $0x188] sm:$0xf] %v973_v53  ;;  %937 = vst [vmem:[#allocation2 + $0x150] sm:$0xf0] %v923_v54  ;;  %864 = vrot.lane.b32.xlu1 %v3742_v6, %s3558_s14  ;;  %862 = vrot.lane.b32.xlu0 %v3637_v2, %s3558_s14  ;;  %v4038_v54 = vcombine.high %v3780_v10, %v3780_v10 }
  0xdc   : > { %v313_v56 = vpop.permute.xlu1 %312  ;;  %v1007_v8 = vpop.permute.xlu0 %1006 }
  0xdd   : > { %v325_v17 = vsel %vm5327_vm2, %v3808_v19, %v313_v56  ;;  %v1023_v58 = vsel %vm5342_vm14, %v1007_v8, %v1009_v46  ;;  %v1617_v61 = vld [vmem:[#allocation2 + $0x190] sm:$0xff] }
  0xde   : > { %339 = vst [vmem:[#allocation2 + $0x10] sm:$0xf0] %v325_v17  ;;  %1037 = vst [vmem:[#allocation2 + $0x188] sm:$0xf0] %v1023_v58  ;;  %914 = vrot.lane.b32.xlu1 %v3750_v7, %s3559_s15  ;;  %912 = vrot.lane.b32.xlu0 %v3628_v0, %s3559_s15  ;;  %v1641_v63 = vpack.c.bf16 %v1617_v61, %v1615_v60 }
  0xe0   : > { %v363_v1 = vpop.permute.xlu1 %362  ;;  %v3964_v3 = vpop.permute.xlu0 %314  ;;  %1680 = vmatprep.subr.bf16.mxu0 %v1641_v63 }
  0xe1   : > { %v375_v19 = vsel %vm5326_vm0, %v3790_v12, %v363_v1  ;;  %v326_v4 = vsel %vm5327_vm2, %v313_v56, %v3964_v3  ;;  %v1614_v21 = vld [vmem:[#allocation2 + $0x150] sm:$0xff]  ;;  %vm1222_vm2 = vcmask 449536  }
  0xe2   : > { %389 = vst [vmem:[#allocation2 + $0x48] sm:$0xf] %v375_v19  ;;  %340 = vst [vmem:[#allocation2 + $0x18] sm:$0xf0] %v326_v4  ;;  %964 = vrot.lane.b32.xlu1 %v3742_v6, %s3560_s16  ;;  %962 = vrot.lane.b32.xlu0 %v3637_v2, %s3560_s16 }
  0xe4   : > { %v413_v14 = vpop.permute.xlu1 %412  ;;  %v3977_v15 = vpop.permute.xlu0 %364 }
  0xe5   : > { %v425_v20 = vsel %vm5325_vm1, %v3806_v18, %v413_v14  ;;  %v376_v12 = vsel %vm5326_vm0, %v363_v1, %v3977_v15  ;;  %v1616_v22 = vld [vmem:[#allocation2 + $0x188] sm:$0xff]  ;;  %vm1172_vm0 = vcmask 457728   ;;  %v1871_v44 = vld [vmem:[#allocation2 + $0x10] sm:$0xff] }
  0xe6   : > { %439 = vst [vmem:[#allocation2 + $0x48] sm:$0xf0] %v425_v20  ;;  %390 = vst [vmem:[#allocation2 + $0x50] sm:$0xf] %v376_v12  ;;  %1014 = vrot.lane.b32.xlu1 %v3750_v7, %s3561_s17  ;;  %1012 = vrot.lane.b32.xlu0 %v3628_v0, %s3561_s17  ;;  %v1640_v23 = vpack.c.bf16 %v1616_v22, %v1614_v21 }
  0xe8   : > { %v1059_v25 = vpop.permute.xlu1 %1058  ;;  %v3991_v18 = vpop.permute.xlu0 %414  ;;  %1681 = vmatpush1.bf16.msra.mxu0 %v1640_v23 }
  0xe9   : > { %v426_v26 = vsel %vm5325_vm1, %v413_v14, %v3991_v18  ;;  %vm1122_vm1 = vcmask 48128   ;;  %v1872_v40 = vld [vmem:[#allocation2 + $0x18] sm:$0xff] }
  0xea   : > { %440 = vst [vmem:[#allocation2 + $0x50] sm:$0xf0] %v426_v26  ;;  %318 = vrot.lane.b32.xlu1 %v3989_v24, %s3548_s28  ;;  %316 = vrot.lane.b32.xlu0 %v3742_v6, %s3548_s28 }
  0xec   : > { %v1109_v28 = vpop.permute.xlu1 %1108  ;;  %v4003_v29 = vpop.permute.xlu0 %1060 }
  0xed   : > { %v1074_v30 = vsel %vm1072_vm15, %v1059_v25, %v4003_v29  ;;  %v1873_v37 = vld [vmem:[#allocation2 + $0x48] sm:$0xff] }
  0xee   : > { %1088 = vst [vmem:[#allocation2 + $0x1c8] sm:$0xf] %v1074_v30  ;;  %368 = vrot.lane.b32.xlu1 %v3975_v5, %s3547_s27  ;;  %366 = vrot.lane.b32.xlu0 %v3997_v27, %s3547_s27  ;;  %v1903_v46 = vpack.c.bf16 %v1873_v37, %v1871_v44 }
  0xf0   : > { %v1159_v32 = vpop.permute.xlu1 %1158  ;;  %v4013_v34 = vpop.permute.xlu0 %1110 }
  0xf1   : > { %v1124_v38 = vsel %vm1122_vm1, %v1109_v28, %v4013_v34  ;;  %v1874_v41 = vld [vmem:[#allocation2 + $0x50] sm:$0xff] }
  0xf2   : > { %1138 = vst [vmem:[#allocation2 + $0x1c8] sm:$0xf0] %v1124_v38  ;;  %418 = vrot.lane.b32.xlu1 %v3989_v24, %s3549_s29  ;;  %416 = vrot.lane.b32.xlu0 %v3742_v6, %s3549_s29  ;;  %v1904_v43 = vpack.c.bf16 %v1874_v41, %v1872_v40 }
  0xf4   : > { %v1209_v48 = vpop.permute.xlu1 %1208  ;;  %v4023_v9 = vpop.permute.xlu0 %1160  ;;  %1919 = vmatprep.subr.bf16.mxu1 %v1904_v43 }
  0xf5   : > { %v1174_v49 = vsel %vm1172_vm0, %v1159_v32, %v4023_v9  ;;  %1920 = vmatpush1.bf16.msra.mxu1 %v1903_v46 }
  0xf6   : > { %1188 = vst [vmem:[#allocation2 + $0x200] sm:$0xf] %v1174_v49  ;;  %1064 = vrot.lane.b32.xlu1 %v3742_v6, %s3562_s18  ;;  %1062 = vrot.lane.b32.xlu0 %v3637_v2, %s3562_s18  ;;  %v4045_v2 = vld [vmem:[%s3625_s26 + $0x14] sm:$0xff] }
  0xf8   : > { %v1057_v50 = vpop.permute.xlu1 %1056  ;;  %v4031_v51 = vpop.permute.xlu0 %1210 }
  0xf9   : > { %v1073_v52 = vsel %vm1072_vm15, %v1057_v50, %v1059_v25  ;;  %v1224_v53 = vsel %vm1222_vm2, %v1209_v48, %v4031_v51  ;;  %v1619_v61 = vld [vmem:[#allocation2 + $0x1c8] sm:$0xff] }
  0xfa   : > { %1087 = vst [vmem:[#allocation2 + $0x1c0] sm:$0xf] %v1073_v52  ;;  %1238 = vst [vmem:[#allocation2 + $0x200] sm:$0xf0] %v1224_v53  ;;  %1114 = vrot.lane.b32.xlu1 %v3750_v7, %s3563_s19  ;;  %1112 = vrot.lane.b32.xlu0 %v3628_v0, %s3563_s19  ;;  %v4055_v7 = vcombine.low %v4045_v2, %v4045_v2 }
  0xfc   : > { %v1157_v55 = vpop.permute.xlu1 %1156  ;;  %v1107_v56 = vpop.permute.xlu0 %1106 }
  0xfd   : > { %v1173_v8 = vsel %vm1172_vm0, %v1157_v55, %v1159_v32  ;;  %v1123_v57 = vsel %vm1122_vm1, %v1107_v56, %v1109_v28 }
  0xfe   : > { %1187 = vst [vmem:[#allocation2 + $0x1f8] sm:$0xf] %v1173_v8  ;;  %1137 = vst [vmem:[#allocation2 + $0x1c0] sm:$0xf0] %v1123_v57  ;;  %1164 = vrot.lane.b32.xlu1 %v4045_v2, %s3564_s20  ;;  %1162 = vrot.lane.b32.xlu0 %v4038_v54, %s3564_s20 }
 0x100   : > { %v463_v0 = vpop.permute.xlu1 %462  ;;  %v1207_v17 = vpop.permute.xlu0 %1206 }
 0x101   : > { %v475_v58 = vsel %vm5333_vm3, %v3829_v33, %v463_v0  ;;  %v1223_v60 = vsel %vm1222_vm2, %v1207_v17, %v1209_v48  ;;  %v1621_v63 = vld [vmem:[#allocation2 + $0x200] sm:$0xff] }
 0x102   : > { %489 = vst [vmem:[#allocation2 + $0x80] sm:$0xf] %v475_v58  ;;  %1237 = vst [vmem:[#allocation2 + $0x1f8] sm:$0xf0] %v1223_v60  ;;  %1214 = vrot.lane.b32.xlu1 %v4055_v7, %s3565_s23  ;;  %1212 = vrot.lane.b32.xlu0 %v3780_v10, %s3565_s23  ;;  %v1643_v1 = vpack.c.bf16 %v1621_v63, %v1619_v61 }
 0x104   : > { %v513_v19 = vpop.permute.xlu1 %512  ;;  %v4064_v4 = vpop.permute.xlu0 %464  ;;  %1682 = vmatprep.subr.bf16.mxu0 %v1643_v1 }
 0x105   : > { %v525_v33 = vsel %vm5332_vm4, %v3837_v36, %v513_v19  ;;  %v476_v14 = vsel %vm5333_vm3, %v463_v0, %v4064_v4  ;;  %v1618_v22 = vld [vmem:[#allocation2 + $0x1c0] sm:$0xff]  ;;  %vm1422_vm3 = vcmask 359424  }
 0x106   : > { %539 = vst [vmem:[#allocation2 + $0x80] sm:$0xf0] %v525_v33  ;;  %490 = vst [vmem:[#allocation2 + $0x88] sm:$0xf] %v476_v14  ;;  %468 = vrot.lane.b32.xlu1 %v3975_v5, %s5328_s30  ;;  %466 = vrot.lane.b32.xlu0 %v3997_v27, %s5328_s30  ;;  %s5346_s30 = smov 108  }
 0x108   : > { %v563_v20 = vpop.permute.xlu1 %562  ;;  %v4074_v12 = vpop.permute.xlu0 %514 }
 0x109   : > { %v575_v21 = vsel %vm5330_vm5, %v3845_v42, %v563_v20  ;;  %v526_v36 = vsel %vm5332_vm4, %v513_v19, %v4074_v12  ;;  %v1620_v23 = vld [vmem:[#allocation2 + $0x1f8] sm:$0xff]  ;;  %vm1372_vm4 = vcmask 367616  }
 0x10a   : > { %589 = vst [vmem:[#allocation2 + $0xb8] sm:$0xf] %v575_v21  ;;  %540 = vst [vmem:[#allocation2 + $0x88] sm:$0xf0] %v526_v36  ;;  %518 = vrot.lane.b32.xlu1 %v3989_v24, %s5329_s7  ;;  %516 = vrot.lane.b32.xlu0 %v3742_v6, %s5329_s7  ;;  %v1642_v25 = vpack.c.bf16 %v1620_v23, %v1618_v22  ;;  %s5347_s7 = smov 107  }
 0x10c   : > { %v613_v26 = vpop.permute.xlu1 %612  ;;  %v4084_v28 = vpop.permute.xlu0 %564  ;;  %1683 = vmatpush1.bf16.msra.mxu0 %v1642_v25 }
 0x10d   : > { %v625_v42 = vsel %vm5331_vm6, %v3853_v45, %v613_v26  ;;  %v576_v30 = vsel %vm5330_vm5, %v563_v20, %v4084_v28  ;;  %vm1272_vm5 = vcmask 441344   ;;  %v1875_v53 = vld [vmem:[#allocation2 + $0x80] sm:$0xff] }
 0x10e   : > { %639 = vst [vmem:[#allocation2 + $0xb8] sm:$0xf0] %v625_v42  ;;  %590 = vst [vmem:[#allocation2 + $0xc0] sm:$0xf] %v576_v30  ;;  %568 = vrot.lane.b32.xlu1 %v3975_v5, %s5346_s30  ;;  %566 = vrot.lane.b32.xlu0 %v3997_v27, %s5346_s30 }
 0x110   : > { %v1259_v32 = vpop.permute.xlu1 %1258  ;;  %v4094_v37 = vpop.permute.xlu0 %614 }
 0x111   : > { %v626_v38 = vsel %vm5331_vm6, %v613_v26, %v4094_v37  ;;  %vm1322_vm6 = vcmask 375808   ;;  %v1876_v49 = vld [vmem:[#allocation2 + $0x88] sm:$0xff] }
 0x112   : > { %640 = vst [vmem:[#allocation2 + $0xc0] sm:$0xf0] %v626_v38  ;;  %618 = vrot.lane.b32.xlu1 %v3989_v24, %s5347_s7  ;;  %616 = vrot.lane.b32.xlu0 %v3742_v6, %s5347_s7 }
 0x114   : > { %v1309_v45 = vpop.permute.xlu1 %1308  ;;  %v4102_v40 = vpop.permute.xlu0 %1260 }
 0x115   : > { %v1274_v41 = vsel %vm1272_vm5, %v1259_v32, %v4102_v40  ;;  %v1877_v46 = vld [vmem:[#allocation2 + $0xb8] sm:$0xff] }
 0x116   : > { %1288 = vst [vmem:[#allocation2 + $0x238] sm:$0xf] %v1274_v41  ;;  %1264 = vrot.lane.b32.xlu1 %v4045_v2, %s3566_s24  ;;  %1262 = vrot.lane.b32.xlu0 %v4038_v54, %s3566_s24  ;;  %v1905_v55 = vpack.c.bf16 %v1877_v46, %v1875_v53 }
 0x118   : > { %v1359_v43 = vpop.permute.xlu1 %1358  ;;  %v4110_v44 = vpop.permute.xlu0 %1310 }
 0x119   : > { %v1324_v48 = vsel %vm1322_vm6, %v1309_v45, %v4110_v44  ;;  %v1878_v50 = vld [vmem:[#allocation2 + $0xc0] sm:$0xff] }
 0x11a   : > { %1338 = vst [vmem:[#allocation2 + $0x238] sm:$0xf0] %v1324_v48  ;;  %1314 = vrot.lane.b32.xlu1 %v4055_v7, %s3567_s25  ;;  %1312 = vrot.lane.b32.xlu0 %v3780_v10, %s3567_s25  ;;  %v1906_v52 = vpack.c.bf16 %v1878_v50, %v1876_v49 }
 0x11c   : > { %v1409_v56 = vpop.permute.xlu1 %1408  ;;  %v4118_v8 = vpop.permute.xlu0 %1360  ;;  %1921 = vmatprep.subr.bf16.mxu1 %v1906_v52 }
 0x11d   : > { %v1374_v57 = vsel %vm1372_vm4, %v1359_v43, %v4118_v8  ;;  %1922 = vmatpush1.bf16.msra.mxu1 %v1905_v55 }
 0x11e   : > { %1388 = vst [vmem:[#allocation2 + $0x270] sm:$0xf] %v1374_v57  ;;  %1364 = vrot.lane.b32.xlu1 %v4045_v2, %s5337_s9  ;;  %1362 = vrot.lane.b32.xlu0 %v4038_v54, %s5337_s9  ;;  %s5350_s9 = smov 26  }
 0x120   : > { %v1257_v0 = vpop.permute.xlu1 %1256  ;;  %v4126_v17 = vpop.permute.xlu0 %1410 }
 0x121   : > { %v1273_v58 = vsel %vm1272_vm5, %v1257_v0, %v1259_v32  ;;  %v1424_v60 = vsel %vm1422_vm3, %v1409_v56, %v4126_v17  ;;  %v1623_v36 = vld [vmem:[#allocation2 + $0x238] sm:$0xff] }
 0x122   : > { %1287 = vst [vmem:[#allocation2 + $0x230] sm:$0xf] %v1273_v58  ;;  %1438 = vst [vmem:[#allocation2 + $0x270] sm:$0xf0] %v1424_v60  ;;  %1414 = vrot.lane.b32.xlu1 %v4055_v7, %s5334_s8  ;;  %1412 = vrot.lane.b32.xlu0 %v3780_v10, %s5334_s8  ;;  %s5348_s8 = smov 28  }
 0x124   : > { %v1357_v61 = vpop.permute.xlu1 %1356  ;;  %v1307_v63 = vpop.permute.xlu0 %1306 }
 0x125   : > { %v1373_v1 = vsel %vm1372_vm4, %v1357_v61, %v1359_v43  ;;  %v1323_v19 = vsel %vm1322_vm6, %v1307_v63, %v1309_v45 }
 0x126   : > { %1387 = vst [vmem:[#allocation2 + $0x268] sm:$0xf] %v1373_v1  ;;  %1337 = vst [vmem:[#allocation2 + $0x230] sm:$0xf0] %v1323_v19  ;;  %668 = vrot.lane.b32.xlu1 %v3975_v5, %s5336_s10  ;;  %666 = vrot.lane.b32.xlu0 %v3997_v27, %s5336_s10  ;;  %s5349_s10 = smov 27  }
 0x128   : > { %v663_v33 = vpop.permute.xlu1 %662  ;;  %v1407_v14 = vpop.permute.xlu0 %1406 }
 0x129   : > { %v675_v20 = vsel %vm5345_vm7, %v3873_v59, %v663_v33  ;;  %v1423_v21 = vsel %vm1422_vm3, %v1407_v14, %v1409_v56  ;;  %v1625_v22 = vld [vmem:[#allocation2 + $0x270] sm:$0xff] }
 0x12a   : > { %689 = vst [vmem:[#allocation2 + $0xf0] sm:$0xf] %v675_v20  ;;  %1437 = vst [vmem:[#allocation2 + $0x268] sm:$0xf0] %v1423_v21  ;;  %718 = vrot.lane.b32.xlu1 %v3989_v24, %s5348_s8  ;;  %716 = vrot.lane.b32.xlu0 %v3742_v6, %s5348_s8  ;;  %v1645_v23 = vpack.c.bf16 %v1625_v22, %v1623_v36  ;;  %v277_v20 = vld [vmem:[%s3625_s26 + $0x18] sm:$0xf] }
 0x12b   : > { %293 = vst [vmem:[#allocation2 + $0x30] sm:$0xf] %v277_v20 }
 0x12c   : > { %v713_v25 = vpop.permute.xlu1 %712  ;;  %v4148_v26 = vpop.permute.xlu0 %664  ;;  %1684 = vmatprep.subr.bf16.mxu0 %v1645_v23 }
 0x12d   : > { %v725_v59 = vsel %vm5341_vm8, %v3881_v62, %v713_v25  ;;  %v676_v42 = vsel %vm5345_vm7, %v663_v33, %v4148_v26  ;;  %v1622_v45 = vld [vmem:[#allocation2 + $0x230] sm:$0xff] }
 0x12e   : > { %739 = vst [vmem:[#allocation2 + $0xf0] sm:$0xf0] %v725_v59  ;;  %690 = vst [vmem:[#allocation2 + $0xf8] sm:$0xf] %v676_v42  ;;  %768 = vrot.lane.b32.xlu1 %v3975_v5, %s5349_s10  ;;  %766 = vrot.lane.b32.xlu0 %v3997_v27, %s5349_s10 }
 0x130   : > { %v763_v30 = vpop.permute.xlu1 %762  ;;  %v4158_v32 = vpop.permute.xlu0 %714 }
 0x131   : > { %v775_v38 = vsel %vm5339_vm9, %v3889_v13, %v763_v30  ;;  %v726_v62 = vsel %vm5341_vm8, %v713_v25, %v4158_v32  ;;  %v1624_v41 = vld [vmem:[#allocation2 + $0x268] sm:$0xff]  ;;  %vm1572_vm8 = vcmask 277504  }
 0x132   : > { %789 = vst [vmem:[#allocation2 + $0x128] sm:$0xf] %v775_v38  ;;  %740 = vst [vmem:[#allocation2 + $0xf8] sm:$0xf0] %v726_v62  ;;  %818 = vrot.lane.b32.xlu1 %v3989_v24, %s5350_s9  ;;  %816 = vrot.lane.b32.xlu0 %v3742_v6, %s5350_s9  ;;  %v1644_v43 = vpack.c.bf16 %v1624_v41, %v1622_v45  ;;  %v4226_v62 = vcombine.high %v3975_v5, %v3975_v5  ;;  %v3538_v45 = vld [vmem:[%s3625_s26 + $0x10] sm:$0xff] }
 0x134   : > { %v813_v46 = vpop.permute.xlu1 %812  ;;  %v4168_v48 = vpop.permute.xlu0 %764  ;;  %1685 = vmatpush1.bf16.msra.mxu0 %v1644_v43 }
 0x135   : > { %v825_v13 = vsel %vm5340_vm10, %v3897_v16, %v813_v46  ;;  %v776_v49 = vsel %vm5339_vm9, %v763_v30, %v4168_v48  ;;  %vm1472_vm9 = vcmask 293888   ;;  %v1879_v61 = vld [vmem:[#allocation2 + $0xf0] sm:$0xff] }
 0x136   : > { %839 = vst [vmem:[#allocation2 + $0x128] sm:$0xf0] %v825_v13  ;;  %790 = vst [vmem:[#allocation2 + $0x130] sm:$0xf] %v776_v49  ;;  %1464 = vrot.lane.b32.xlu1 %v4045_v2, %s3570_s11  ;;  %1462 = vrot.lane.b32.xlu0 %v4038_v54, %s3570_s11 }
 0x138   : > { %v1459_v50 = vpop.permute.xlu1 %1458  ;;  %v4178_v52 = vpop.permute.xlu0 %814 }
 0x139   : > { %v826_v53 = vsel %vm5340_vm10, %v813_v46, %v4178_v52  ;;  %vm1522_vm10 = vcmask 285696   ;;  %v1880_v58 = vld [vmem:[#allocation2 + $0xf8] sm:$0xff] }
 0x13a   : > { %840 = vst [vmem:[#allocation2 + $0x130] sm:$0xf0] %v826_v53  ;;  %1514 = vrot.lane.b32.xlu1 %v4055_v7, %s3572_s12  ;;  %1512 = vrot.lane.b32.xlu0 %v3780_v10, %s3572_s12 }
 0x13c   : > { %v1509_v16 = vpop.permute.xlu1 %1508  ;;  %v4186_v55 = vpop.permute.xlu0 %1460 }
 0x13d   : > { %v1474_v56 = vsel %vm1472_vm9, %v1459_v50, %v4186_v55  ;;  %v1881_v0 = vld [vmem:[#allocation2 + $0x128] sm:$0xff] }
 0x13e   : > { %1488 = vst [vmem:[#allocation2 + $0x2a8] sm:$0xf] %v1474_v56  ;;  %1564 = vrot.lane.b32.xlu1 %v4045_v2, %s3573_s13  ;;  %1562 = vrot.lane.b32.xlu0 %v4038_v54, %s3573_s13  ;;  %v1907_v63 = vpack.c.bf16 %v1881_v0, %v1879_v61  ;;  %v3575_v0 = vmov 0.0|0.0  }
 0x140   : > { %v1559_v57 = vpop.permute.xlu1 %1558  ;;  %v4194_v7 = vpop.permute.xlu0 %1510 }
 0x141   : > { %v1524_v10 = vsel %vm1522_vm10, %v1509_v16, %v4194_v7  ;;  %v1882_v60 = vld [vmem:[#allocation2 + $0x130] sm:$0xff] }
 0x142   : > { %1538 = vst [vmem:[#allocation2 + $0x2a8] sm:$0xf0] %v1524_v10  ;;  %868 = vrot.lane.b32.xlu1 %v3975_v5, %s3558_s14  ;;  %866 = vrot.lane.b32.xlu0 %v3997_v27, %s3558_s14  ;;  %v1908_v54 = vpack.c.bf16 %v1882_v60, %v1880_v58  ;;  %v4256_v10 = vld [vmem:[%s5309_s1] sm:$0xff]  }
 0x144   : > { %v1457_v1 = vpop.permute.xlu1 %1456  ;;  %v4202_v19 = vpop.permute.xlu0 %1560  ;;  %1923 = vmatprep.subr.bf16.mxu1 %v1908_v54 }
 0x145   : > { %v1473_v33 = vsel %vm1472_vm9, %v1457_v1, %v1459_v50  ;;  %v1574_v14 = vsel %vm1572_vm8, %v1559_v57, %v4202_v19  ;;  %1924 = vmatpush1.bf16.msra.mxu1 %v1907_v63 }
 0x146   : > { %1487 = vst [vmem:[#allocation2 + $0x2a0] sm:$0xf] %v1473_v33  ;;  %1588 = vst [vmem:[#allocation2 + $0x2e0] sm:$0xf] %v1574_v14  ;;  %918 = vrot.lane.b32.xlu1 %v3989_v24, %s3559_s15  ;;  %916 = vrot.lane.b32.xlu0 %v3742_v6, %s3559_s15  ;;  %v4285_v33 = vld [vmem:[%s3625_s26 + $0x1c] sm:$0xff]  ;;  %s5357_s26 = smov 117  }
 0x148   : > { %v1557_v21 = vpop.permute.xlu1 %1556  ;;  %v1507_v36 = vpop.permute.xlu0 %1506 }
 0x149   : > { %v1573_v22 = vsel %vm1572_vm8, %v1557_v21, %v1559_v57  ;;  %v1523_v23 = vsel %vm1522_vm10, %v1507_v36, %v1509_v16  ;;  %v1627_v30 = vld [vmem:[#allocation2 + $0x2a8] sm:$0xff] }
 0x14a   : > { %1587 = vst [vmem:[#allocation2 + $0x2d8] sm:$0xf] %v1573_v22  ;;  %1537 = vst [vmem:[#allocation2 + $0x2a0] sm:$0xf0] %v1523_v23  ;;  %968 = vrot.lane.b32.xlu1 %v3975_v5, %s3560_s16  ;;  %966 = vrot.lane.b32.xlu0 %v3997_v27, %s3560_s16 }
 0x14c   : > { %v4218_v25 = vpop.permute.xlu1 %864  ;;  %v863_v59 = vpop.permute.xlu0 %862 }
 0x14d   : > { %v875_v6 = vsel %vm872_vm11, %v3917_v35, %v863_v59  ;;  %v876_v42 = vsel %vm872_vm11, %v863_v59, %v4218_v25  ;;  %v1629_v38 = vld [vmem:[#allocation2 + $0x2e0] sm:$0xff] }
 0x14e   : > { %889 = vst [vmem:[#allocation2 + $0x160] sm:$0xf] %v875_v6  ;;  %890 = vst [vmem:[#allocation2 + $0x168] sm:$0xf] %v876_v42  ;;  %1018 = vrot.lane.b32.xlu1 %v3989_v24, %s3561_s17  ;;  %1016 = vrot.lane.b32.xlu0 %v3538_v45, %s3561_s17  ;;  %v1647_v41 = vpack.c.bf16 %v1629_v38, %v1627_v30  ;;  %v4299_v42 = vcombine.low %v4285_v33, %v4285_v33 }
 0x150   : > { %v4232_v43 = vpop.permute.xlu1 %914  ;;  %v913_v35 = vpop.permute.xlu0 %912  ;;  %1686 = vmatprep.subr.bf16.mxu0 %v1647_v41 }
 0x151   : > { %v925_v46 = vsel %vm5344_vm12, %v3925_v39, %v913_v35  ;;  %v926_v13 = vsel %vm5344_vm12, %v913_v35, %v4232_v43  ;;  %v1626_v49 = vld [vmem:[#allocation2 + $0x2a0] sm:$0xff]  ;;  %v1628_v50 = vld [vmem:[#allocation2 + $0x2d8] sm:$0xff]  ;;  %vm5353_vm12 = vcmask 1031168  }
 0x152   : > { %939 = vst [vmem:[#allocation2 + $0x160] sm:$0xf0] %v925_v46  ;;  %940 = vst [vmem:[#allocation2 + $0x168] sm:$0xf0] %v926_v13  ;;  %370 = vrot.lane.b32.xlu1 %v4226_v62, %s3547_s27  ;;  %320 = vrot.lane.b32.xlu0 %v3975_v5, %s3548_s28  ;;  %v1646_v53 = vpack.c.bf16 %v1628_v50, %v1626_v49  ;;  %s5365_s27 = smov 106  }
 0x154   : > { %v4242_v16 = vpop.permute.xlu1 %964  ;;  %v963_v56 = vpop.permute.xlu0 %962  ;;  %1687 = vmatpush1.bf16.msra.mxu0 %v1646_v53 }
 0x155   : > { %v975_v39 = vsel %vm5343_vm13, %v3933_v47, %v963_v56  ;;  %v976_v57 = vsel %vm5343_vm13, %v963_v56, %v4242_v16  ;;  %1688 = vmatprep.subr.bf16.mxu0 %v3575_v0 }
 0x156   : > { %989 = vst [vmem:[#allocation2 + $0x198] sm:$0xf] %v975_v39  ;;  %990 = vst [vmem:[#allocation2 + $0x1a0] sm:$0xf] %v976_v57  ;;  %1066 = vrot.lane.b32.xlu1 %v3997_v27, %s3562_s18  ;;  %420 = vrot.lane.b32.xlu0 %v3975_v5, %s3549_s29  ;;  %v4267_v27 = vcombine.high %v4045_v2, %v4045_v2  ;;  %s5358_s29 = smov 116  }
 0x158   : > { %v4258_v47 = vpop.permute.xlu1 %1014  ;;  %v1013_v58 = vpop.permute.xlu0 %1012  ;;  %1689 = vmatpush1.bf16.msra.mxu0 %v3575_v0 }
 0x159   : > { %v1025_v60 = vsel %vm5342_vm14, %v3941_v11, %v1013_v58  ;;  %v1026_v54 = vsel %vm5342_vm14, %v1013_v58, %v4258_v47  ;;  %vm5351_vm14 = vcmask 1039360   ;;  %v1884_v21 = vld [vmem:[#allocation2 + $0x168] sm:$0xff]  ;;  %v1883_v23 = vld [vmem:[#allocation2 + $0x160] sm:$0xff] }
 0x15a   : > { %1039 = vst [vmem:[#allocation2 + $0x198] sm:$0xf0] %v1025_v60  ;;  %1040 = vst [vmem:[#allocation2 + $0x1a0] sm:$0xf0] %v1026_v54  ;;  %1116 = vrot.lane.b32.xlu1 %v3538_v45, %s3563_s19  ;;  %1068 = vrot.lane.b32.xlu0 %v3975_v5, %s3562_s18 }
 0x15b   : > { %1707 = vmatmul.mubr.bf16.vlgmr.msra.gmra.mrb[0].mxu0 %v4256_v10  ;;  %vm5352_vm13 = vmmov %vm5351_vm14 }
 0x15c   : > { %v4273_v61 = vpop.permute.xlu1 %318  ;;  %v317_v11 = vpop.permute.xlu0 %316  ;;  %1716 = vmatprep.mubr.bf16.mxu0 %v3574_v31 }
 0x15d   : > { %v327_v63 = vsel %vm5351_vm14, %v3964_v3, %v317_v11  ;;  %v328_v1 = vsel %vm5352_vm13, %v317_v11, %v4273_v61  ;;  %vm5354_vm14 = vmmov %vm5353_vm12 }
 0x15e   : > { %341 = vst [vmem:[#allocation2 + $0x20] sm:$0xf0] %v327_v63  ;;  %342 = vst [vmem:[#allocation2 + $0x28] sm:$0xf0] %v328_v1  ;;  %1166 = vrot.lane.b32.xlu1 %v4267_v27, %s3564_s20  ;;  %1118 = vrot.lane.b32.xlu0 %v3989_v24, %s3563_s19 }
 0x160   : > { %v4287_v14 = vpop.permute.xlu1 %368  ;;  %v367_v20 = vpop.permute.xlu0 %366 }
 0x161   : > { %v377_v3 = vsel %vm5353_vm12, %v3977_v15, %v367_v20  ;;  %v378_v36 = vsel %vm5354_vm14, %v367_v20, %v4287_v14  ;;  %v1886_v22 = vld [vmem:[#allocation2 + $0x1a0] sm:$0xff]  ;;  %v1885_v59 = vld [vmem:[#allocation2 + $0x198] sm:$0xff]  ;;  %vm5355_vm12 = vcmask 965632   ;;  %vm5360_vm14 = vcmask 957440  }
 0x162   : > { %391 = vst [vmem:[#allocation2 + $0x58] sm:$0xf] %v377_v3  ;;  %392 = vst [vmem:[#allocation2 + $0x60] sm:$0xf] %v378_v36  ;;  %1216 = vrot.lane.b32.xlu1 %v4045_v2, %s3565_s23  ;;  %1168 = vrot.lane.b32.xlu0 %v4285_v33, %s3564_s20  ;;  %v1910_v24 = vpack.c.bf16 %v1886_v22, %v1884_v21  ;;  %v1909_v6 = vpack.c.bf16 %v1885_v59, %v1883_v23 }
 0x163   : > { %vm5356_vm13 = vmmov %vm5355_vm12 }
 0x164   : > { %v4301_v15 = vpop.permute.xlu1 %418  ;;  %v417_v30 = vpop.permute.xlu0 %416  ;;  %1925 = vmatprep.subr.bf16.mxu1 %v1910_v24 }
 0x165   : > { %v427_v38 = vsel %vm5355_vm12, %v3991_v18, %v417_v30  ;;  %v428_v45 = vsel %vm5356_vm13, %v417_v30, %v4301_v15  ;;  %1926 = vmatpush1.bf16.msra.mxu1 %v1909_v6  ;;  %v2117_v50 = vld [vmem:[#allocation2 + $0x28] sm:$0xff]  ;;  %v2116_v39 = vld [vmem:[#allocation2 + $0x20] sm:$0xff]  ;;  %vm5361_vm12 = vmmov %vm5360_vm14  ;;  %vm5363_vm13 = vcmask 949248  }
 0x166   : > { %441 = vst [vmem:[#allocation2 + $0x58] sm:$0xf0] %v427_v38  ;;  %442 = vst [vmem:[#allocation2 + $0x60] sm:$0xf0] %v428_v45  ;;  %470 = vrot.lane.b32.xlu1 %v4226_v62, %s5357_s26  ;;  %1218 = vrot.lane.b32.xlu0 %v4299_v42, %s3565_s23 }
 0x168   : > { %v4311_v41 = vpop.permute.xlu1 %1064  ;;  %v1063_v35 = vpop.permute.xlu0 %1062 }
 0x169   : > { %v1075_v46 = vsel %vm1072_vm15, %v4003_v29, %v1063_v35  ;;  %v1076_v18 = vsel %vm1072_vm15, %v1063_v35, %v4311_v41 }
 0x16a   : > { %1089 = vst [vmem:[#allocation2 + $0x1d0] sm:$0xf] %v1075_v46  ;;  %1090 = vst [vmem:[#allocation2 + $0x1d8] sm:$0xf] %v1076_v18  ;;  %570 = vrot.lane.b32.xlu1 %v4226_v62, %s5346_s30  ;;  %520 = vrot.lane.b32.xlu0 %v3975_v5, %s5358_s29  ;;  %s5359_s30 = smov 45  }
 0x16c   : > { %v4321_v13 = vpop.permute.xlu1 %1114  ;;  %v1113_v49 = vpop.permute.xlu0 %1112 }
 0x16d   : > { %v1125_v53 = vsel %vm1122_vm1, %v4013_v34, %v1113_v49  ;;  %v1126_v29 = vsel %vm1122_vm1, %v1113_v49, %v4321_v13  ;;  %v2119_v56 = vld [vmem:[#allocation2 + $0x60] sm:$0xff]  ;;  %v2118_v57 = vld [vmem:[#allocation2 + $0x58] sm:$0xff] }
 0x16e   : > { %1139 = vst [vmem:[#allocation2 + $0x1d0] sm:$0xf0] %v1125_v53  ;;  %1140 = vst [vmem:[#allocation2 + $0x1d8] sm:$0xf0] %v1126_v29  ;;  %1266 = vrot.lane.b32.xlu1 %v4267_v27, %s3566_s24  ;;  %620 = vrot.lane.b32.xlu0 %v3975_v5, %s5347_s7  ;;  %v2149_v58 = vpack.c.bf16 %v2119_v56, %v2117_v50  ;;  %v2148_v60 = vpack.c.bf16 %v2118_v57, %v2116_v39  ;;  %s5362_s7 = smov 44   ;;  %v4401_v57 = vld [vmem:[%s5309_s1 + $0x10] sm:$0xff]  }
 0x170   : > { %v4331_v54 = vpop.permute.xlu1 %1164  ;;  %v1163_v11 = vpop.permute.xlu0 %1162  ;;  %2164 = vmatprep.subr.bf16.mxu0 %v2149_v58 }
 0x171   : > { %v1175_v34 = vsel %vm1172_vm0, %v4023_v9, %v1163_v11  ;;  %v1176_v63 = vsel %vm1172_vm0, %v1163_v11, %v4331_v54  ;;  %2165 = vmatpush1.bf16.msra.mxu0 %v2148_v60 }
 0x172   : > { %1189 = vst [vmem:[#allocation2 + $0x208] sm:$0xf] %v1175_v34  ;;  %1190 = vst [vmem:[#allocation2 + $0x210] sm:$0xf] %v1176_v63  ;;  %1316 = vrot.lane.b32.xlu1 %v4045_v2, %s3567_s25  ;;  %1268 = vrot.lane.b32.xlu0 %v4285_v33, %s3566_s24 }
 0x174   : > { %v4341_v1 = vpop.permute.xlu1 %1214  ;;  %v1213_v20 = vpop.permute.xlu0 %1212 }
 0x175   : > { %v1225_v21 = vsel %vm1222_vm2, %v4031_v51, %v1213_v20  ;;  %v1226_v9 = vsel %vm1222_vm2, %v1213_v20, %v4341_v1  ;;  %v1888_v24 = vld [vmem:[#allocation2 + $0x1d8] sm:$0xff]  ;;  %v1887_v38 = vld [vmem:[#allocation2 + $0x1d0] sm:$0xff] }
 0x176   : > { %1239 = vst [vmem:[#allocation2 + $0x208] sm:$0xf0] %v1225_v21  ;;  %1240 = vst [vmem:[#allocation2 + $0x210] sm:$0xf0] %v1226_v9  ;;  %1366 = vrot.lane.b32.xlu1 %v4267_v27, %s5359_s30  ;;  %1318 = vrot.lane.b32.xlu0 %v4299_v42, %s3567_s25 }
 0x178   : > { %v4351_v3 = vpop.permute.xlu1 %468  ;;  %v467_v36 = vpop.permute.xlu0 %466 }
 0x179   : > { %v477_v22 = vsel %vm5360_vm14, %v4064_v4, %v467_v36  ;;  %v478_v51 = vsel %vm5361_vm12, %v467_v36, %v4351_v3  ;;  %vm5364_vm14 = vmmov %vm5363_vm13  ;;  %vm5366_vm12 = vcmask 883712  }
 0x17a   : > { %491 = vst [vmem:[#allocation2 + $0x90] sm:$0xf] %v477_v22  ;;  %492 = vst [vmem:[#allocation2 + $0x98] sm:$0xf] %v478_v51  ;;  %1416 = vrot.lane.b32.xlu1 %v4045_v2, %s5362_s7  ;;  %1368 = vrot.lane.b32.xlu0 %v4285_v33, %s5359_s30 }
 0x17c   : > { %v4361_v23 = vpop.permute.xlu1 %518  ;;  %v517_v59 = vpop.permute.xlu0 %516 }
 0x17d   : > { %v527_v6 = vsel %vm5363_vm13, %v4074_v12, %v517_v59  ;;  %v528_v4 = vsel %vm5364_vm14, %v517_v59, %v4361_v23  ;;  %v1890_v30 = vld [vmem:[#allocation2 + $0x210] sm:$0xff]  ;;  %v1889_v45 = vld [vmem:[#allocation2 + $0x208] sm:$0xff]  ;;  %vm5367_vm13 = vmmov %vm5366_vm12  ;;  %vm5368_vm14 = vcmask 875520  }
 0x17e   : > { %541 = vst [vmem:[#allocation2 + $0x90] sm:$0xf0] %v527_v6  ;;  %542 = vst [vmem:[#allocation2 + $0x98] sm:$0xf0] %v528_v4  ;;  %670 = vrot.lane.b32.xlu1 %v4226_v62, %s5365_s27  ;;  %1418 = vrot.lane.b32.xlu0 %v4299_v42, %s5362_s7  ;;  %v1912_v35 = vpack.c.bf16 %v1890_v30, %v1888_v24  ;;  %v1911_v46 = vpack.c.bf16 %v1889_v45, %v1887_v38  ;;  %v4374_v12 = vld [vmem:[%s5309_s1 + $0x8] sm:$0xff]  }
 0x17f   : > { %1717 = vmatmul.mubr.bf16.gmra.mrb[4].mxu0 %v4374_v12 }
 0x180   : > { %v4376_v18 = vpop.permute.xlu1 %568  ;;  %v567_v49 = vpop.permute.xlu0 %566  ;;  %1927 = vmatprep.subr.bf16.mxu1 %v1912_v35  ;;  %1726 = vmatprep.mubr.bf16.mxu0 %v3574_v31 }
 0x181   : > { %v577_v50 = vsel %vm5366_vm12, %v4084_v28, %v567_v49  ;;  %v578_v53 = vsel %vm5367_vm13, %v567_v49, %v4376_v18  ;;  %1928 = vmatpush1.bf16.msra.mxu1 %v1911_v46  ;;  %vm5369_vm12 = vmmov %vm5368_vm14  ;;  %v1155_v46 = vcombine.high %v4285_v33, %v4285_v33  ;;  %vm5370_vm13 = vcmask 228352  }
 0x182   : > { %591 = vst [vmem:[#allocation2 + $0xc8] sm:$0xf] %v577_v50  ;;  %592 = vst [vmem:[#allocation2 + $0xd0] sm:$0xf] %v578_v53  ;;  %770 = vrot.lane.b32.xlu1 %v4226_v62, %s5349_s10  ;;  %720 = vrot.lane.b32.xlu0 %v3975_v5, %s5348_s8 }
 0x184   : > { %v4388_v29 = vpop.permute.xlu1 %618  ;;  %v617_v56 = vpop.permute.xlu0 %616 }
 0x185   : > { %v627_v28 = vsel %vm5368_vm14, %v4094_v37, %v617_v56  ;;  %v628_v39 = vsel %vm5369_vm12, %v617_v56, %v4388_v29  ;;  %v2121_v20 = vld [vmem:[#allocation2 + $0x98] sm:$0xff]  ;;  %v2120_v36 = vld [vmem:[#allocation2 + $0x90] sm:$0xff]  ;;  %vm5371_vm14 = vmmov %vm5370_vm13  ;;  %vm5372_vm12 = vcmask 220160  }
 0x186   : > { %641 = vst [vmem:[#allocation2 + $0xc8] sm:$0xf0] %v627_v28  ;;  %642 = vst [vmem:[#allocation2 + $0xd0] sm:$0xf0] %v628_v39  ;;  %1466 = vrot.lane.b32.xlu1 %v4267_v27, %s3570_s11  ;;  %820 = vrot.lane.b32.xlu0 %v3975_v5, %s5350_s9 }
 0x187   : > { %1727 = vmatmul.mubr.bf16.gmra.mrb[8].mxu0 %v4401_v57 }
 0x188   : > { %v4403_v58 = vpop.permute.xlu1 %1264  ;;  %v1263_v60 = vpop.permute.xlu0 %1262  ;;  %1736 = vmatprep.mubr.bf16.mxu0 %v3574_v31 }
 0x189   : > { %v1275_v37 = vsel %vm1272_vm5, %v4102_v40, %v1263_v60  ;;  %v1276_v11 = vsel %vm1272_vm5, %v1263_v60, %v4403_v58 }
 0x18a   : > { %1289 = vst [vmem:[#allocation2 + $0x240] sm:$0xf] %v1275_v37  ;;  %1290 = vst [vmem:[#allocation2 + $0x248] sm:$0xf] %v1276_v11  ;;  %1516 = vrot.lane.b32.xlu1 %v4045_v2, %s3572_s12  ;;  %1468 = vrot.lane.b32.xlu0 %v4285_v33, %s3570_s11 }
 0x18c   : > { %v4415_v34 = vpop.permute.xlu1 %1314  ;;  %v1313_v63 = vpop.permute.xlu0 %1312 }
 0x18d   : > { %v1325_v40 = vsel %vm1322_vm6, %v4110_v44, %v1313_v63  ;;  %v1326_v21 = vsel %vm1322_vm6, %v1313_v63, %v4415_v34  ;;  %v2123_v9 = vld [vmem:[#allocation2 + $0xd0] sm:$0xff]  ;;  %v2122_v22 = vld [vmem:[#allocation2 + $0xc8] sm:$0xff]  ;;  %v4428_v44 = vld [vmem:[%s5309_s1 + $0x18] sm:$0xff]  }
 0x18e   : > { %1339 = vst [vmem:[#allocation2 + $0x240] sm:$0xf0] %v1325_v40  ;;  %1340 = vst [vmem:[#allocation2 + $0x248] sm:$0xf0] %v1326_v21  ;;  %1566 = vrot.lane.b32.xlu1 %v4267_v27, %s3573_s13  ;;  %1518 = vrot.lane.b32.xlu0 %v4299_v42, %s3572_s12  ;;  %v2151_v2 = vpack.c.bf16 %v2123_v9, %v2121_v20  ;;  %v2150_v51 = vpack.c.bf16 %v2122_v22, %v2120_v36 }
 0x18f   : > { %1737 = vmatmul.mubr.bf16.gmra.mrb[12].mxu0 %v4428_v44 }
 0x190   : > { %v4430_v59 = vpop.permute.xlu1 %1364  ;;  %v1363_v24 = vpop.permute.xlu0 %1362  ;;  %2166 = vmatprep.subr.bf16.mxu0 %v2151_v2  ;;  %2196 = vmatprep.mubr.bf16.mxu0 %v3574_v31 }
 0x191   : > { %v1375_v6 = vsel %vm1372_vm4, %v4118_v8, %v1363_v24  ;;  %v1376_v27 = vsel %vm1372_vm4, %v1363_v24, %v4430_v59  ;;  %2167 = vmatpush1.bf16.msra.mxu0 %v2150_v51 }
 0x192   : > { %1389 = vst [vmem:[#allocation2 + $0x278] sm:$0xf] %v1375_v6  ;;  %1390 = vst [vmem:[#allocation2 + $0x280] sm:$0xf] %v1376_v27  ;;  %870 = vrot.lane.b32.xlu1 %v4226_v62, %s3558_s14  ;;  %1568 = vrot.lane.b32.xlu0 %v4285_v33, %s3573_s13 }
 0x194   : > { %v4442_v42 = vpop.permute.xlu1 %1414  ;;  %v1413_v4 = vpop.permute.xlu0 %1412 }
 0x195   : > { %v1425_v8 = vsel %vm1422_vm3, %v4126_v17, %v1413_v4  ;;  %v1426_v30 = vsel %vm1422_vm3, %v1413_v4, %v4442_v42  ;;  %v1892_v53 = vld [vmem:[#allocation2 + $0x248] sm:$0xff]  ;;  %v1891_v39 = vld [vmem:[#allocation2 + $0x240] sm:$0xff] }
 0x196   : > { %1439 = vst [vmem:[#allocation2 + $0x278] sm:$0xf0] %v1425_v8  ;;  %1440 = vst [vmem:[#allocation2 + $0x280] sm:$0xf0] %v1426_v30  ;;  %970 = vrot.lane.b32.xlu1 %v4226_v62, %s3560_s16  ;;  %920 = vrot.lane.b32.xlu0 %v3975_v5, %s3559_s15 }
 0x198   : > { %v4452_v38 = vpop.permute.xlu1 %668  ;;  %v667_v45 = vpop.permute.xlu0 %666 }
 0x199   : > { %v677_v35 = vsel %vm5345_vm7, %v4148_v26, %v667_v45  ;;  %v678_v17 = vsel %vm5345_vm7, %v667_v45, %v4452_v38 }
 0x19a   : > { %691 = vst [vmem:[#allocation2 + $0x100] sm:$0xf] %v677_v35  ;;  %692 = vst [vmem:[#allocation2 + $0x108] sm:$0xf] %v678_v17  ;;  %1070 = vrot.lane.b32.xlu1 %v4226_v62, %s3562_s18  ;;  %1020 = vrot.lane.b32.xlu0 %v3975_v5, %s3561_s17 }
 0x19c   : > { %v4464_v49 = vpop.permute.xlu1 %718  ;;  %v717_v50 = vpop.permute.xlu0 %716 }
 0x19d   : > { %v727_v26 = vsel %vm5370_vm13, %v4158_v32, %v717_v50  ;;  %v728_v56 = vsel %vm5371_vm14, %v717_v50, %v4464_v49  ;;  %v1894_v28 = vld [vmem:[#allocation2 + $0x280] sm:$0xff]  ;;  %v1893_v60 = vld [vmem:[#allocation2 + $0x278] sm:$0xff]  ;;  %vm5373_vm13 = vmmov %vm5372_vm12  ;;  %vm5374_vm14 = vcmask 211968  }
 0x19e   : > { %741 = vst [vmem:[#allocation2 + $0x100] sm:$0xf0] %v727_v26  ;;  %742 = vst [vmem:[#allocation2 + $0x108] sm:$0xf0] %v728_v56  ;;  %1170 = vrot.lane.b32.xlu1 %v1155_v46, %s3564_s20  ;;  %1120 = vrot.lane.b32.xlu0 %v3975_v5, %s3563_s19  ;;  %v1914_v62 = vpack.c.bf16 %v1894_v28, %v1892_v53  ;;  %v1913_v37 = vpack.c.bf16 %v1893_v60, %v1891_v39 }
 0x19f   : > { %vm5375_vm7 = vmmov %vm5374_vm14 }
 0x1a0   : > { %v4473_v11 = vpop.permute.xlu1 %768  ;;  %v767_v63 = vpop.permute.xlu0 %766  ;;  %1929 = vmatprep.subr.bf16.mxu1 %v1914_v62 }
 0x1a1   : > { %v777_v32 = vsel %vm5372_vm12, %v4168_v48, %v767_v63  ;;  %v778_v20 = vsel %vm5373_vm13, %v767_v63, %v4473_v11  ;;  %1930 = vmatpush1.bf16.msra.mxu1 %v1913_v37  ;;  %vm5378_vm13 = vcmask 130048  }
 0x1a2   : > { %791 = vst [vmem:[#allocation2 + $0x138] sm:$0xf] %v777_v32  ;;  %792 = vst [vmem:[#allocation2 + $0x140] sm:$0xf] %v778_v20  ;;  %1270 = vrot.lane.b32.xlu1 %v1155_v46, %s3566_s24  ;;  %1220 = vrot.lane.b32.xlu0 %v4285_v33, %s3565_s23 }
 0x1a4   : > { %v4482_v5 = vpop.permute.xlu1 %818  ;;  %v817_v40 = vpop.permute.xlu0 %816 }
 0x1a5   : > { %v827_v21 = vsel %vm5374_vm14, %v4178_v52, %v817_v40  ;;  %v828_v48 = vsel %vm5375_vm7, %v817_v40, %v4482_v5  ;;  %v2125_v24 = vld [vmem:[#allocation2 + $0x108] sm:$0xff]  ;;  %v2124_v4 = vld [vmem:[#allocation2 + $0x100] sm:$0xff]  ;;  %vm5376_vm7 = vcmask 138240   ;;  %vm5379_vm14 = vmmov %vm5378_vm13 }
 0x1a6   : > { %841 = vst [vmem:[#allocation2 + $0x138] sm:$0xf0] %v827_v21  ;;  %842 = vst [vmem:[#allocation2 + $0x140] sm:$0xf0] %v828_v48  ;;  %1370 = vrot.lane.b32.xlu1 %v1155_v46, %s5359_s30  ;;  %1320 = vrot.lane.b32.xlu0 %v4285_v33, %s3567_s25 }
 0x1a7   : > { %vm5377_vm12 = vmmov %vm5376_vm7 }
 0x1a8   : > { %v4491_v9 = vpop.permute.xlu1 %1464  ;;  %v1463_v36 = vpop.permute.xlu0 %1462 }
 0x1a9   : > { %v1475_v22 = vsel %vm1472_vm9, %v4186_v55, %v1463_v36  ;;  %v1476_v2 = vsel %vm1472_vm9, %v1463_v36, %v4491_v9 }
 0x1aa   : > { %1489 = vst [vmem:[#allocation2 + $0x2b0] sm:$0xf] %v1475_v22  ;;  %1490 = vst [vmem:[#allocation2 + $0x2b8] sm:$0xf] %v1476_v2  ;;  %1470 = vrot.lane.b32.xlu1 %v1155_v46, %s3570_s11  ;;  %1420 = vrot.lane.b32.xlu0 %v4285_v33, %s5362_s7  ;;  %s3462_s11 = smul.u32 448, %s5397_s22 }
 0x1ac   : > { %v4500_v52 = vpop.permute.xlu1 %1514  ;;  %v1513_v51 = vpop.permute.xlu0 %1512  ;;  %s4689_s15 = scalar_lea.vmem %s5314_s6, %s3462_s11 }
 0x1ad   : > { %v1525_v6 = vsel %vm1522_vm10, %v4194_v7, %v1513_v51  ;;  %v1526_v55 = vsel %vm1522_vm10, %v1513_v51, %v4500_v52  ;;  %v2127_v27 = vld [vmem:[#allocation2 + $0x140] sm:$0xff]  ;;  %v2126_v8 = vld [vmem:[#allocation2 + $0x138] sm:$0xff] }
 0x1ae   : > { %1539 = vst [vmem:[#allocation2 + $0x2b0] sm:$0xf0] %v1525_v6  ;;  %1540 = vst [vmem:[#allocation2 + $0x2b8] sm:$0xf0] %v1526_v55  ;;  %1570 = vrot.lane.b32.xlu1 %v1155_v46, %s3573_s13  ;;  %1520 = vrot.lane.b32.xlu0 %v4285_v33, %s3572_s12  ;;  %v2153_v30 = vpack.c.bf16 %v2127_v27, %v2125_v24  ;;  %v2152_v45 = vpack.c.bf16 %v2126_v8, %v2124_v4 }
 0x1b0   : > { %v4509_v35 = vpop.permute.xlu1 %1564  ;;  %v1563_v17 = vpop.permute.xlu0 %1562  ;;  %2168 = vmatprep.subr.bf16.mxu0 %v2153_v30 }
 0x1b1   : > { %v1575_v7 = vsel %vm1572_vm8, %v4202_v19, %v1563_v17  ;;  %v1576_v50 = vsel %vm1572_vm8, %v1563_v17, %v4509_v35  ;;  %2169 = vmatpush1.bf16.msra.mxu0 %v2152_v45 }
 0x1b2   : > { %1589 = vst [vmem:[#allocation2 + $0x2e8] sm:$0xf] %v1575_v7  ;;  %1590 = vst [vmem:[#allocation2 + $0x2f0] sm:$0xf] %v1576_v50 }
 0x1b4   : > { %v4515_v53 = vpop.permute.xlu1 %868  ;;  %v867_v46 = vpop.permute.xlu0 %866 }
 0x1b5   : > { %v877_v33 = vsel %vm872_vm11, %v4218_v25, %v867_v46  ;;  %v878_v26 = vsel %vm872_vm11, %v867_v46, %v4515_v53  ;;  %v1896_v28 = vld [vmem:[#allocation2 + $0x2b8] sm:$0xff]  ;;  %v1895_v37 = vld [vmem:[#allocation2 + $0x2b0] sm:$0xff] }
 0x1b6   : > { %891 = vst [vmem:[#allocation2 + $0x170] sm:$0xf] %v877_v33  ;;  %892 = vst [vmem:[#allocation2 + $0x178] sm:$0xf] %v878_v26 }
 0x1b8   : > { %v4521_v56 = vpop.permute.xlu1 %918  ;;  %v917_v19 = vpop.permute.xlu0 %916 }
 0x1b9   : > { %v927_v39 = vsel %vm5376_vm7, %v4232_v43, %v917_v19  ;;  %v928_v60 = vsel %vm5377_vm12, %v917_v19, %v4521_v56  ;;  %v1898_v62 = vld [vmem:[#allocation2 + $0x2f0] sm:$0xff]  ;;  %v1897_v63 = vld [vmem:[#allocation2 + $0x2e8] sm:$0xff]  ;;  %vm5380_vm7 = vcmask 64512  }
 0x1ba   : > { %941 = vst [vmem:[#allocation2 + $0x170] sm:$0xf0] %v927_v39  ;;  %942 = vst [vmem:[#allocation2 + $0x178] sm:$0xf0] %v928_v60  ;;  %v1916_v25 = vpack.c.bf16 %v1898_v62, %v1896_v28  ;;  %v1915_v32 = vpack.c.bf16 %v1897_v63, %v1895_v37 }
 0x1bb   : > { %vm5381_vm12 = vmmov %vm5380_vm7 }
 0x1bc   : > { %v4527_v20 = vpop.permute.xlu1 %968  ;;  %v967_v40 = vpop.permute.xlu0 %966  ;;  %1931 = vmatprep.subr.bf16.mxu1 %v1916_v25 }
 0x1bd   : > { %v977_v21 = vsel %vm5378_vm13, %v4242_v16, %v967_v40  ;;  %v978_v43 = vsel %vm5379_vm14, %v967_v40, %v4527_v20  ;;  %1932 = vmatpush1.bf16.msra.mxu1 %v1915_v32  ;;  %vm5382_vm13 = vcmask 1031168   ;;  %vm5383_vm14 = vcmask 1039360  }
 0x1be   : > { %991 = vst [vmem:[#allocation2 + $0x1a8] sm:$0xf] %v977_v21  ;;  %992 = vst [vmem:[#allocation2 + $0x1b0] sm:$0xf] %v978_v43  ;;  %1933 = vmatprep.subr.bf16.mxu1 %v3575_v0 }
 0x1c0   : > { %v4534_v48 = vpop.permute.xlu1 %1018  ;;  %v1017_v36 = vpop.permute.xlu0 %1016 }
 0x1c1   : > { %v1027_v22 = vsel %vm5380_vm7, %v4258_v47, %v1017_v36  ;;  %v1028_v2 = vsel %vm5381_vm12, %v1017_v36, %v4534_v48  ;;  %1934 = vmatpush1.bf16.msra.mxu1 %v3575_v0  ;;  %v2129_v27 = vld [vmem:[#allocation2 + $0x178] sm:$0xff]  ;;  %vm5384_vm7 = vcmask 965632   ;;  %v2128_v45 = vld [vmem:[#allocation2 + $0x170] sm:$0xff]  ;;  %vm5385_vm12 = vcmask 957440  }
 0x1c2   : > { %1041 = vst [vmem:[#allocation2 + $0x1a8] sm:$0xf0] %v1027_v22  ;;  %1042 = vst [vmem:[#allocation2 + $0x1b0] sm:$0xf0] %v1028_v2 }
 0x1c4   : > { %v371_v16 = vpop.permute.xlu1 %370  ;;  %v321_v51 = vpop.permute.xlu0 %320  ;;  %1952 = vmatmul.mubr.bf16.vlgmr.msra.gmra.mrb[0].mxu1 %v4256_v10 }
 0x1c5   : > { %v379_v24 = vsel %vm5382_vm13, %v4287_v14, %v371_v16  ;;  %v329_v6 = vsel %vm5383_vm14, %v4273_v61, %v321_v51  ;;  %1961 = vmatprep.mubr.bf16.mxu1 %v3574_v31  ;;  %vm5386_vm13 = vcmask 883712   ;;  %vm5387_vm14 = vcmask 949248  }
 0x1c6   : > { %393 = vst [vmem:[#allocation2 + $0x68] sm:$0xf] %v379_v24  ;;  %343 = vst [vmem:[#allocation2 + $0x30] sm:$0xf0] %v329_v6 }
 0x1c8   : > { %v1067_v47 = vpop.permute.xlu1 %1066  ;;  %v421_v55 = vpop.permute.xlu0 %420 }
 0x1c9   : > { %v1077_v4 = vsel %vm1072_vm15, %v4311_v41, %v1067_v47  ;;  %v429_v8 = vsel %vm5384_vm7, %v4301_v15, %v421_v55  ;;  %v2131_v30 = vld [vmem:[#allocation2 + $0x1b0] sm:$0xff]  ;;  %v2130_v17 = vld [vmem:[#allocation2 + $0x1a8] sm:$0xff]  ;;  %vm5388_vm7 = vcmask 875520  }
 0x1ca   : > { %1091 = vst [vmem:[#allocation2 + $0x1e0] sm:$0xf] %v1077_v4  ;;  %443 = vst [vmem:[#allocation2 + $0x68] sm:$0xf0] %v429_v8  ;;  %v2155_v14 = vpack.c.bf16 %v2131_v30, %v2129_v27  ;;  %v2154_v61 = vpack.c.bf16 %v2130_v17, %v2128_v45 }
 0x1cc   : > { %v1117_v7 = vpop.permute.xlu1 %1116  ;;  %v4551_v50 = vpop.permute.xlu0 %1068  ;;  %2170 = vmatprep.subr.bf16.mxu0 %v2155_v14  ;;  %1962 = vmatmul.mubr.bf16.gmra.mrb[4].mxu1 %v4374_v12 }
 0x1cd   : > { %v1127_v46 = vsel %vm1122_vm1, %v4321_v13, %v1117_v7  ;;  %v1078_v41 = vsel %vm1072_vm15, %v1067_v47, %v4551_v50  ;;  %2171 = vmatpush1.bf16.msra.mxu0 %v2154_v61  ;;  %1971 = vmatprep.mubr.bf16.mxu1 %v3574_v31  ;;  %v2361_v28 = vld [vmem:[#allocation2 + $0x30] sm:$0xff] }
 0x1ce   : > { %1141 = vst [vmem:[#allocation2 + $0x1e0] sm:$0xf0] %v1127_v46  ;;  %1092 = vst [vmem:[#allocation2 + $0x1e8] sm:$0xf] %v1078_v41 }
 0x1d0   : > { %v1167_v15 = vpop.permute.xlu1 %1166  ;;  %v4559_v33 = vpop.permute.xlu0 %1118 }
 0x1d1   : > { %v1177_v26 = vsel %vm1172_vm0, %v4331_v54, %v1167_v15  ;;  %v1128_v19 = vsel %vm1122_vm1, %v1117_v7, %v4559_v33  ;;  %v2362_v39 = vld [vmem:[#allocation2 + $0x68] sm:$0xff] }
 0x1d2   : > { %1191 = vst [vmem:[#allocation2 + $0x218] sm:$0xf] %v1177_v26  ;;  %1142 = vst [vmem:[#allocation2 + $0x1e8] sm:$0xf0] %v1128_v19  ;;  %v2377_v13 = vpack.c.bf16 %v2362_v39, %v2361_v28 }
 0x1d4   : > { %v1217_v60 = vpop.permute.xlu1 %1216  ;;  %v4565_v62 = vpop.permute.xlu0 %1168  ;;  %3341 = vmatprep.subr.bf16.mxu1 %v2377_v13  ;;  %1972 = vmatmul.mubr.bf16.gmra.mrb[8].mxu1 %v4401_v57 }
 0x1d5   : > { %v1227_v37 = vsel %vm1222_vm2, %v4341_v1, %v1217_v60  ;;  %v1178_v54 = vsel %vm1172_vm0, %v1167_v15, %v4565_v62  ;;  %3342 = vmatpush3.bf16.msra.mxu1 %v2377_v13  ;;  %1981 = vmatprep.mubr.bf16.mxu1 %v3574_v31  ;;  %v2132_v47 = vld [vmem:[#allocation2 + $0x1e0] sm:$0xff] }
 0x1d6   : > { %1241 = vst [vmem:[#allocation2 + $0x218] sm:$0xf0] %v1227_v37  ;;  %1192 = vst [vmem:[#allocation2 + $0x220] sm:$0xf] %v1178_v54 }
 0x1d8   : > { %v471_v63 = vpop.permute.xlu1 %470  ;;  %v4573_v25 = vpop.permute.xlu0 %1218 }
 0x1d9   : > { %v479_v32 = vsel %vm5385_vm12, %v4351_v3, %v471_v63  ;;  %v1228_v40 = vsel %vm1222_vm2, %v1217_v60, %v4573_v25  ;;  %v2133_v24 = vld [vmem:[#allocation2 + $0x1e8] sm:$0xff]  ;;  %vm5389_vm12 = vcmask 867328  }
 0x1da   : > { %493 = vst [vmem:[#allocation2 + $0xa0] sm:$0xf] %v479_v32  ;;  %1242 = vst [vmem:[#allocation2 + $0x220] sm:$0xf0] %v1228_v40 }
 0x1dc   : > { %v571_v1 = vpop.permute.xlu1 %570  ;;  %v521_v21 = vpop.permute.xlu0 %520  ;;  %1982 = vmatmul.mubr.bf16.gmra.mrb[12].mxu1 %v4428_v44 }
 0x1dd   : > { %v579_v43 = vsel %vm5386_vm13, %v4376_v18, %v571_v1  ;;  %v529_v36 = vsel %vm5387_vm14, %v4361_v23, %v521_v21  ;;  %3357 = vmatprep.mubr.bf16.mxu1 %v4256_v10  ;;  %v2134_v2 = vld [vmem:[#allocation2 + $0x218] sm:$0xff]  ;;  %vm5390_vm13 = vcmask 220160   ;;  %vm5391_vm14 = vcmask 228352  }
 0x1de   : > { %593 = vst [vmem:[#allocation2 + $0xd8] sm:$0xf] %v579_v43  ;;  %543 = vst [vmem:[#allocation2 + $0xa0] sm:$0xf0] %v529_v36  ;;  %v2156_v23 = vpack.c.bf16 %v2134_v2, %v2132_v47 }
 0x1e0   : > { %v1267_v3 = vpop.permute.xlu1 %1266  ;;  %v621_v22 = vpop.permute.xlu0 %620 }
 0x1e1   : > { %v1277_v16 = vsel %vm1272_vm5, %v4403_v58, %v1267_v3  ;;  %v629_v51 = vsel %vm5388_vm7, %v4388_v29, %v621_v22  ;;  %v2135_v6 = vld [vmem:[#allocation2 + $0x220] sm:$0xff]  ;;  %vm5392_vm7 = vcmask 211968  }
 0x1e2   : > { %1291 = vst [vmem:[#allocation2 + $0x250] sm:$0xf] %v1277_v16  ;;  %643 = vst [vmem:[#allocation2 + $0xd8] sm:$0xf0] %v629_v51  ;;  %v2157_v18 = vpack.c.bf16 %v2135_v6, %v2133_v24 }
 0x1e4   : > { %v1317_v55 = vpop.permute.xlu1 %1316  ;;  %v4589_v27 = vpop.permute.xlu0 %1268  ;;  %2172 = vmatprep.subr.bf16.mxu0 %v2157_v18 }
 0x1e5   : > { %v1327_v4 = vsel %vm1322_vm6, %v4415_v34, %v1317_v55  ;;  %v1278_v58 = vsel %vm1272_vm5, %v1267_v3, %v4589_v27  ;;  %2173 = vmatpush1.bf16.msra.mxu0 %v2156_v23  ;;  %v2363_v17 = vld [vmem:[#allocation2 + $0xa0] sm:$0xff] }
 0x1e6   : > { %1341 = vst [vmem:[#allocation2 + $0x250] sm:$0xf0] %v1327_v4  ;;  %1292 = vst [vmem:[#allocation2 + $0x258] sm:$0xf] %v1278_v58 }
 0x1e8   : > { %v1367_v29 = vpop.permute.xlu1 %1366  ;;  %v4595_v8 = vpop.permute.xlu0 %1318 }
 0x1e9   : > { %v1377_v30 = vsel %vm1372_vm4, %v4430_v59, %v1367_v29  ;;  %v1328_v45 = vsel %vm1322_vm6, %v1317_v55, %v4595_v8  ;;  %v2364_v14 = vld [vmem:[#allocation2 + $0xd8] sm:$0xff] }
 0x1ea   : > { %1391 = vst [vmem:[#allocation2 + $0x288] sm:$0xf] %v1377_v30  ;;  %1342 = vst [vmem:[#allocation2 + $0x258] sm:$0xf0] %v1328_v45  ;;  %v2378_v34 = vpack.c.bf16 %v2364_v14, %v2363_v17 }
 0x1ec   : > { %v1417_v61 = vpop.permute.xlu1 %1416  ;;  %v4601_v7 = vpop.permute.xlu0 %1368  ;;  %3343 = vmatprep.subr.bf16.mxu1 %v2378_v34 }
 0x1ed   : > { %v1427_v46 = vsel %vm1422_vm3, %v4442_v42, %v1417_v61  ;;  %v1378_v41 = vsel %vm1372_vm4, %v1367_v29, %v4601_v7  ;;  %3344 = vmatpush3.bf16.msra.mxu1 %v2378_v34 }
 0x1ee   : > { %1441 = vst [vmem:[#allocation2 + $0x288] sm:$0xf0] %v1427_v46  ;;  %1392 = vst [vmem:[#allocation2 + $0x290] sm:$0xf] %v1378_v41 }
 0x1f0   : > { %v671_v59 = vpop.permute.xlu1 %670  ;;  %v4607_v15 = vpop.permute.xlu0 %1418 }
 0x1f1   : > { %v679_v26 = vsel %vm5389_vm12, %v4452_v38, %v671_v59  ;;  %v1428_v19 = vsel %vm1422_vm3, %v1417_v61, %v4607_v15  ;;  %v2137_v32 = vld [vmem:[#allocation2 + $0x258] sm:$0xff]  ;;  %vm5393_vm12 = vcmask 130048  }
 0x1f2   : > { %693 = vst [vmem:[#allocation2 + $0x110] sm:$0xf] %v679_v26  ;;  %1442 = vst [vmem:[#allocation2 + $0x290] sm:$0xf0] %v1428_v19 }
 0x1f4   : > { %v771_v28 = vpop.permute.xlu1 %770  ;;  %v721_v39 = vpop.permute.xlu0 %720 }
 0x1f5   : > { %v779_v42 = vsel %vm5390_vm13, %v4473_v11, %v771_v28  ;;  %v729_v13 = vsel %vm5391_vm14, %v4464_v49, %v721_v39  ;;  %v2138_v54 = vld [vmem:[#allocation2 + $0x288] sm:$0xff]  ;;  %v2136_v11 = vld [vmem:[#allocation2 + $0x250] sm:$0xff]  ;;  %vm5394_vm13 = vcmask 138240  }
 0x1f6   : > { %793 = vst [vmem:[#allocation2 + $0x148] sm:$0xf] %v779_v42  ;;  %743 = vst [vmem:[#allocation2 + $0x110] sm:$0xf0] %v729_v13  ;;  %v2158_v21 = vpack.c.bf16 %v2138_v54, %v2136_v11 }
 0x1f8   : > { %v1467_v60 = vpop.permute.xlu1 %1466  ;;  %v821_v37 = vpop.permute.xlu0 %820 }
 0x1f9   : > { %v1477_v38 = vsel %vm1472_vm9, %v4491_v9, %v1467_v60  ;;  %v829_v63 = vsel %vm5392_vm7, %v4482_v5, %v821_v37  ;;  %v2139_v40 = vld [vmem:[#allocation2 + $0x290] sm:$0xff] }
 0x1fa   : > { %1491 = vst [vmem:[#allocation2 + $0x2c0] sm:$0xf] %v1477_v38  ;;  %843 = vst [vmem:[#allocation2 + $0x148] sm:$0xf0] %v829_v63  ;;  %v2159_v1 = vpack.c.bf16 %v2139_v40, %v2137_v32  ;;  %v1749_v63 = vlaneseq }
 0x1fc   : > { %v1517_v43 = vpop.permute.xlu1 %1516  ;;  %v4621_v49 = vpop.permute.xlu0 %1468  ;;  %2174 = vmatprep.subr.bf16.mxu0 %v2159_v1 }
 0x1fd   : > { %v1527_v36 = vsel %vm1522_vm10, %v4500_v52, %v1517_v43  ;;  %v1478_v9 = vsel %vm1472_vm9, %v1467_v60, %v4621_v49  ;;  %2175 = vmatpush1.bf16.msra.mxu0 %v2158_v21  ;;  %v2365_v16 = vld [vmem:[#allocation2 + $0x110] sm:$0xff] }
 0x1fe   : > { %1541 = vst [vmem:[#allocation2 + $0x2c0] sm:$0xf0] %v1527_v36  ;;  %1492 = vst [vmem:[#allocation2 + $0x2c8] sm:$0xf] %v1478_v9  ;;  %v1747_v36 = vld [vmem:[%s5313_s5] sm:$0x3] }
 0x200   : > { %v1567_v5 = vpop.permute.xlu1 %1566  ;;  %v4627_v3 = vpop.permute.xlu0 %1518 }
 0x201   : > { %v1577_v22 = vsel %vm1572_vm8, %v4509_v35, %v1567_v5  ;;  %v1528_v2 = vsel %vm1522_vm10, %v1517_v43, %v4627_v3  ;;  %v2366_v51 = vld [vmem:[#allocation2 + $0x148] sm:$0xff] }
 0x202   : > { %1591 = vst [vmem:[#allocation2 + $0x2f8] sm:$0xf] %v1577_v22  ;;  %1542 = vst [vmem:[#allocation2 + $0x2c8] sm:$0xf0] %v1528_v2  ;;  %v2379_v52 = vpack.c.bf16 %v2366_v51, %v2365_v16 }
 0x204   : > { %v871_v24 = vpop.permute.xlu1 %870  ;;  %v4633_v6 = vpop.permute.xlu0 %1568  ;;  %3345 = vmatprep.subr.bf16.mxu1 %v2379_v52 }
 0x205   : > { %v879_v18 = vsel %vm872_vm11, %v4515_v53, %v871_v24  ;;  %v1578_v47 = vsel %vm1572_vm8, %v1567_v5, %v4633_v6  ;;  %3346 = vmatpush3.bf16.msra.mxu1 %v2379_v52  ;;  %vm5395_vm11 = vcmask 64512  }
 0x206   : > { %893 = vst [vmem:[#allocation2 + $0x180] sm:$0xf] %v879_v18  ;;  %1592 = vst [vmem:[#allocation2 + $0x300] sm:$0xf] %v1578_v47 }
 0x208   : > { %v971_v35 = vpop.permute.xlu1 %970  ;;  %v921_v23 = vpop.permute.xlu0 %920 }
 0x209   : > { %v979_v55 = vsel %vm5393_vm12, %v4527_v20, %v971_v35  ;;  %v929_v4 = vsel %vm5394_vm13, %v4521_v56, %v921_v23  ;;  %v2142_v30 = vld [vmem:[#allocation2 + $0x2f8] sm:$0xff]  ;;  %v2141_v17 = vld [vmem:[#allocation2 + $0x2c8] sm:$0xff]  ;;  %v2140_v20 = vld [vmem:[#allocation2 + $0x2c0] sm:$0xff] }
 0x20a   : > { %993 = vst [vmem:[#allocation2 + $0x1b8] sm:$0xf] %v979_v55  ;;  %943 = vst [vmem:[#allocation2 + $0x180] sm:$0xf0] %v929_v4  ;;  %v2160_v61 = vpack.c.bf16 %v2142_v30, %v2140_v20 }
 0x20c   : > { %v1071_v58 = vpop.permute.xlu1 %1070  ;;  %v1021_v29 = vpop.permute.xlu0 %1020 }
 0x20d   : > { %v1079_v53 = vsel %vm1072_vm15, %v4551_v50, %v1071_v58  ;;  %v1029_v45 = vsel %vm5395_vm11, %v4534_v48, %v1021_v29  ;;  %v2143_v14 = vld [vmem:[#allocation2 + $0x300] sm:$0xff] }
 0x20e   : > { %1093 = vst [vmem:[#allocation2 + $0x1f0] sm:$0xf] %v1079_v53  ;;  %1043 = vst [vmem:[#allocation2 + $0x1b8] sm:$0xf0] %v1029_v45  ;;  %v2161_v34 = vpack.c.bf16 %v2143_v14, %v2141_v17 }
 0x210   : > { %v1171_v46 = vpop.permute.xlu1 %1170  ;;  %v1121_v56 = vpop.permute.xlu0 %1120  ;;  %2176 = vmatprep.subr.bf16.mxu0 %v2161_v34 }
 0x211   : > { %v1179_v41 = vsel %vm1172_vm0, %v4565_v62, %v1171_v46  ;;  %v1129_v59 = vsel %vm1122_vm1, %v4559_v33, %v1121_v56  ;;  %2177 = vmatpush1.bf16.msra.mxu0 %v2160_v61  ;;  %v2367_v28 = vld [vmem:[#allocation2 + $0x180] sm:$0xff]  ;;  %vm2537_vm0 = vcmask 523264  }
 0x212   : > { %1193 = vst [vmem:[#allocation2 + $0x228] sm:$0xf] %v1179_v41  ;;  %1143 = vst [vmem:[#allocation2 + $0x1f0] sm:$0xf0] %v1129_v59  ;;  %2178 = vmatprep.subr.bf16.mxu0 %v3575_v0 }
 0x214   : > { %v1271_v48 = vpop.permute.xlu1 %1270  ;;  %v1221_v50 = vpop.permute.xlu0 %1220 }
 0x215   : > { %v1279_v26 = vsel %vm1272_vm5, %v4589_v27, %v1271_v48  ;;  %v1229_v19 = vsel %vm1222_vm2, %v4573_v25, %v1221_v50  ;;  %2179 = vmatpush1.bf16.msra.mxu0 %v3575_v0  ;;  %v2368_v62 = vld [vmem:[#allocation2 + $0x1b8] sm:$0xff] }
 0x216   : > { %1293 = vst [vmem:[#allocation2 + $0x260] sm:$0xf] %v1279_v26  ;;  %1243 = vst [vmem:[#allocation2 + $0x228] sm:$0xf0] %v1229_v19  ;;  %v2380_v33 = vpack.c.bf16 %v2368_v62, %v2367_v28 }
 0x218   : > { %v1371_v39 = vpop.permute.xlu1 %1370  ;;  %v1321_v42 = vpop.permute.xlu0 %1320  ;;  %2197 = vmatmul.mubr.bf16.vlgmr.msra.gmra.mrb[16].mxu0 %v4256_v10  ;;  %3347 = vmatprep.subr.bf16.mxu1 %v2380_v33 }
 0x219   : > { %v1379_v13 = vsel %vm1372_vm4, %v4601_v7, %v1371_v39  ;;  %v1329_v27 = vsel %vm1322_vm6, %v4595_v8, %v1321_v42  ;;  %3348 = vmatpush3.bf16.msra.mxu1 %v2380_v33  ;;  %2206 = vmatprep.mubr.bf16.mxu0 %v3574_v31  ;;  %v2369_v54 = vld [vmem:[#allocation2 + $0x1f0] sm:$0xff] }
 0x21a   : > { %1393 = vst [vmem:[#allocation2 + $0x298] sm:$0xf] %v1379_v13  ;;  %1343 = vst [vmem:[#allocation2 + $0x260] sm:$0xf0] %v1329_v27 }
 0x21c   : > { %v1471_v25 = vpop.permute.xlu1 %1470  ;;  %v1421_v60 = vpop.permute.xlu0 %1420 }
 0x21d   : > { %v1479_v37 = vsel %vm1472_vm9, %v4621_v49, %v1471_v25  ;;  %v1429_v10 = vsel %vm1422_vm3, %v4607_v15, %v1421_v60  ;;  %v2370_v38 = vld [vmem:[#allocation2 + $0x228] sm:$0xff]  ;;  %v1750_v15 = vshrl.u32 %v1749_v63, 7 }
 0x21e   : > { %1493 = vst [vmem:[#allocation2 + $0x2d0] sm:$0xf] %v1479_v37  ;;  %1443 = vst [vmem:[#allocation2 + $0x298] sm:$0xf0] %v1429_v10  ;;  %v2381_v7 = vpack.c.bf16 %v2370_v38, %v2369_v54 }
 0x21f   : > { %v4673_v49 = vsub.s32 0, %v1750_v15  ;;  %v4680_v9 = vsub.s32 1, %v1750_v15 }
 0x220   : > { %v1571_v8 = vpop.permute.xlu1 %1570  ;;  %v1521_v32 = vpop.permute.xlu0 %1520  ;;  %3349 = vmatprep.subr.bf16.mxu1 %v2381_v7  ;;  %2207 = vmatmul.mubr.bf16.gmra.mrb[20].mxu0 %v4374_v12 }
 0x221   : > { %v1579_v40 = vsel %vm1572_vm8, %v4633_v6, %v1571_v8  ;;  %v1529_v1 = vsel %vm1522_vm10, %v4627_v3, %v1521_v32  ;;  %3350 = vmatpush3.bf16.msra.mxu1 %v2381_v7  ;;  %2216 = vmatprep.mubr.bf16.mxu0 %v3574_v31  ;;  %v2371_v11 = vld [vmem:[#allocation2 + $0x260] sm:$0xff]  ;;  %v4684_v2 = vrot.slane %v1747_v36, %v4673_v49 }
 0x222   : > { %1593 = vst [vmem:[#allocation2 + $0x308] sm:$0xf] %v1579_v40  ;;  %1543 = vst [vmem:[#allocation2 + $0x2d0] sm:$0xf0] %v1529_v1  ;;  %v4692_v16 = vrot.slane %v1747_v36, %v4680_v9 }
 0x225   : > { %v2372_v21 = vld [vmem:[#allocation2 + $0x298] sm:$0xff] }
 0x226   : > { %v2382_v43 = vpack.c.bf16 %v2372_v21, %v2371_v11 }
 0x228   : > { %3351 = vmatprep.subr.bf16.mxu1 %v2382_v43  ;;  %2217 = vmatmul.mubr.bf16.gmra.mrb[24].mxu0 %v4401_v57 }
 0x229   : > { %3352 = vmatpush3.bf16.msra.mxu1 %v2382_v43  ;;  %v2373_v5 = vld [vmem:[#allocation2 + $0x2d0] sm:$0xff]  ;;  %v2374_v3 = vld [vmem:[#allocation2 + $0x308] sm:$0xff]  ;;  %2226 = vmatprep.mubr.bf16.mxu0 %v3574_v31 }
 0x22a   : > { %v2383_v22 = vpack.c.bf16 %v2374_v3, %v2373_v5 }
 0x22c   : > { %3353 = vmatprep.subr.bf16.mxu1 %v2383_v22 }
 0x22d   : > { %3354 = vmatpush3.bf16.msra.mxu1 %v2383_v22 }
 0x22e   : > { %3355 = vmatprep.subr.bf16.mxu1 %v3575_v0  ;;  %v1708_v31 = vpop.f32.mrb[0].mxu0 }
 0x22f   : > { %v1759_v51 = vmul.f32 %v4684_v2, %v1708_v31  ;;  %1855 = vst [vmem:[%s4689_s15] sm:$0xff] %v1708_v31  ;;  %v1710_v52 = vpop.f32.mrb[1].mxu0 }
 0x230   : > { %2227 = vmatmul.mubr.bf16.gmra.mrb[28].mxu0 %v4428_v44  ;;  %v1760_v24 = vmul.f32 %v4692_v16, %v1710_v52  ;;  %1856 = vst [vmem:[%s4689_s15 + $0x8] sm:$0xff] %v1710_v52  ;;  %v1712_v6 = vpop.f32.mrb[2].mxu0 }
 0x231   : > { %3356 = vmatpush3.bf16.msra.mxu1 %v3575_v0  ;;  %v1807_v18 = vmul.f32 %v1759_v51, %v1708_v31  ;;  %v1761_v47 = vmul.f32 %v4684_v2, %v1712_v6  ;;  %1857 = vst [vmem:[%s4689_s15 + $0x38] sm:$0xff] %v1712_v6  ;;  %v1714_v35 = vpop.f32.mrb[3].mxu0 }
 0x232   : > { %v1808_v23 = vmul.f32 %v1760_v24, %v1710_v52  ;;  %v1775_v55 = vadd.f32 %v1760_v24, %v1759_v51  ;;  %v1762_v4 = vmul.f32 %v4692_v16, %v1714_v35  ;;  %1858 = vst [vmem:[%s4689_s15 + $0x40] sm:$0xff] %v1714_v35  ;;  %v1992_v52 = vld [vmem:[%s5313_s5 + $0x2] sm:$0x3] }
 0x233   : > { %v1809_v58 = vmul.f32 %v1761_v47, %v1712_v6  ;;  %v4764_v24 = vrot.slane %v1992_v52, %v4673_v49  ;;  %v4767_v6 = vrot.slane %v1992_v52, %v4680_v9 }
 0x234   : > { %3358 = vmatmul.mubr.bf16.vlgmr.msra.gmra.mrb[16].mxu1 %v4374_v12  ;;  %1776 = vadd.xlane.f32.xlu0 %v1775_v55  ;;  %v1810_v29 = vmul.f32 %v1762_v4, %v1714_v35  ;;  %v1778_v30 = vadd.f32 %v1762_v4, %v1761_v47  ;;  %v4718_v48 = vadd.f32 %v1808_v23, %v1807_v18 }
 0x235   : > { %3361 = vmatprep.mubr.bf16.mxu1 %v4401_v57 }
 0x236   : > { %1779 = vadd.xlane.f32.xlu1 %v1778_v30  ;;  %v4720_v50 = vadd.f32 %v1810_v29, %v1809_v58 }
 0x23c   : > { %3362 = vmatmul.mubr.bf16.gmra.mrb[20].mxu1 %v4428_v44 }
 0x252   : > { %v1718_v0 = vpop.f32.mrb[4].mxu0 }
 0x253   : > { %v1763_v53 = vmul.f32 %v4684_v2, %v1718_v0  ;;  %1859 = vst [vmem:[%s4689_s15 + $0x70] sm:$0xff] %v1718_v0  ;;  %v1720_v45 = vpop.f32.mrb[5].mxu0 }
 0x254   : > { %v1764_v17 = vmul.f32 %v4692_v16, %v1720_v45  ;;  %1860 = vst [vmem:[%s4689_s15 + $0x78] sm:$0xff] %v1720_v45  ;;  %v1722_v12 = vpop.f32.mrb[6].mxu0 }
 0x255   : > { %v1811_v14 = vmul.f32 %v1763_v53, %v1718_v0  ;;  %v1765_v34 = vmul.f32 %v4684_v2, %v1722_v12  ;;  %1861 = vst [vmem:[%s4689_s15 + $0xa8] sm:$0xff] %v1722_v12  ;;  %v1724_v57 = vpop.f32.mrb[7].mxu0 }
 0x256   : > { %v1812_v20 = vmul.f32 %v1764_v17, %v1720_v45  ;;  %v1766_v44 = vmul.f32 %v4692_v16, %v1724_v57  ;;  %1862 = vst [vmem:[%s4689_s15 + $0xb0] sm:$0xff] %v1724_v57  ;;  %v4730_v10 = vadd.f32 %v1764_v17, %v1763_v53 }
 0x257   : > { %v1813_v61 = vmul.f32 %v1765_v34, %v1722_v12 }
 0x258   : > { %v1814_v46 = vmul.f32 %v1766_v44, %v1724_v57  ;;  %v4732_v54 = vadd.f32 %v1766_v44, %v1765_v34  ;;  %v4734_v38 = vadd.f32 %v1812_v20, %v1811_v14 }
 0x25a   : > { %v1728_v56 = vpop.f32.mrb[8].mxu0  ;;  %v4738_v8 = vadd.f32 %v1814_v46, %v1813_v61 }
 0x25b   : > { %v1767_v41 = vmul.f32 %v4684_v2, %v1728_v56  ;;  %1863 = vst [vmem:[%s4689_s15 + $0xe0] sm:$0xff] %v1728_v56  ;;  %v1730_v59 = vpop.f32.mrb[9].mxu0 }
 0x25c   : > { %v1768_v26 = vmul.f32 %v4692_v16, %v1730_v59  ;;  %1864 = vst [vmem:[%s4689_s15 + $0xe8] sm:$0xff] %v1730_v59  ;;  %v1732_v19 = vpop.f32.mrb[10].mxu0 }
 0x25d   : > { %v1815_v28 = vmul.f32 %v1767_v41, %v1728_v56  ;;  %v1769_v62 = vmul.f32 %v4684_v2, %v1732_v19  ;;  %1865 = vst [vmem:[%s4689_s15 + $0x118] sm:$0xff] %v1732_v19  ;;  %v1734_v33 = vpop.f32.mrb[11].mxu0 }
 0x25e   : > { %v1816_v39 = vmul.f32 %v1768_v26, %v1730_v59  ;;  %v1770_v42 = vmul.f32 %v4692_v16, %v1734_v33  ;;  %1866 = vst [vmem:[%s4689_s15 + $0x120] sm:$0xff] %v1734_v33  ;;  %v4744_v36 = vadd.f32 %v1768_v26, %v1767_v41 }
 0x25f   : > { %v1817_v13 = vmul.f32 %v1769_v62, %v1732_v19 }
 0x260   : > { %v1818_v27 = vmul.f32 %v1770_v42, %v1734_v33  ;;  %v4746_v5 = vadd.f32 %v1770_v42, %v1769_v62  ;;  %v4748_v3 = vadd.f32 %v1816_v39, %v1815_v28 }
 0x262   : > { %v1738_v25 = vpop.f32.mrb[12].mxu0  ;;  %v4750_v22 = vadd.f32 %v1818_v27, %v1817_v13 }
 0x263   : > { %v1771_v60 = vmul.f32 %v4684_v2, %v1738_v25  ;;  %1867 = vst [vmem:[%s4689_s15 + $0x150] sm:$0xff] %v1738_v25  ;;  %v1740_v37 = vpop.f32.mrb[13].mxu0 }
 0x264   : > { %v1772_v7 = vmul.f32 %v4692_v16, %v1740_v37  ;;  %1868 = vst [vmem:[%s4689_s15 + $0x158] sm:$0xff] %v1740_v37  ;;  %v1742_v63 = vpop.f32.mrb[14].mxu0 }
 0x265   : > { %v1819_v32 = vmul.f32 %v1771_v60, %v1738_v25  ;;  %v1773_v40 = vmul.f32 %v4684_v2, %v1742_v63  ;;  %1869 = vst [vmem:[%s4689_s15 + $0x188] sm:$0xff] %v1742_v63  ;;  %v1744_v1 = vpop.f32.mrb[15].mxu0 }
 0x266   : > { %v1820_v15 = vmul.f32 %v1772_v7, %v1740_v37  ;;  %v1774_v11 = vmul.f32 %v4692_v16, %v1744_v1  ;;  %1870 = vst [vmem:[%s4689_s15 + $0x190] sm:$0xff] %v1744_v1  ;;  %v4752_v31 = vadd.f32 %v1772_v7, %v1771_v60 }
 0x267   : > { %v1821_v21 = vmul.f32 %v1773_v40, %v1742_v63 }
 0x268   : > { %v1822_v43 = vmul.f32 %v1774_v11, %v1744_v1  ;;  %v4754_v2 = vadd.f32 %v1774_v11, %v1773_v40  ;;  %v4756_v51 = vadd.f32 %v1820_v15, %v1819_v32 }
 0x26a   : > { %v4758_v16 = vadd.f32 %v1822_v43, %v1821_v21 }
 0x297   : > { %v1953_v18 = vpop.f32.mrb[0].mxu1 }
 0x298   : > { %v2004_v47 = vmul.f32 %v4764_v24, %v1953_v18  ;;  %2100 = vst [vmem:[%s4689_s15 + $0x10] sm:$0xff] %v1953_v18  ;;  %v1955_v35 = vpop.f32.mrb[1].mxu1 }
 0x299   : > { %v2005_v23 = vmul.f32 %v4767_v6, %v1955_v35  ;;  %2101 = vst [vmem:[%s4689_s15 + $0x18] sm:$0xff] %v1955_v35  ;;  %v1957_v55 = vpop.f32.mrb[2].mxu1 }
 0x29a   : > { %v2052_v4 = vmul.f32 %v2004_v47, %v1953_v18  ;;  %v2006_v58 = vmul.f32 %v4764_v24, %v1957_v55  ;;  %2102 = vst [vmem:[%s4689_s15 + $0x48] sm:$0xff] %v1957_v55  ;;  %v1959_v29 = vpop.f32.mrb[3].mxu1 }
 0x29b   : > { %v2053_v30 = vmul.f32 %v2005_v23, %v1955_v35  ;;  %v2007_v0 = vmul.f32 %v4767_v6, %v1959_v29  ;;  %2103 = vst [vmem:[%s4689_s15 + $0x50] sm:$0xff] %v1959_v29  ;;  %v2020_v53 = vadd.f32 %v2005_v23, %v2004_v47 }
 0x29c   : > { %v2054_v45 = vmul.f32 %v2006_v58, %v1957_v55 }
 0x29d   : > { %v2055_v17 = vmul.f32 %v2007_v0, %v1959_v29  ;;  %2021 = vadd.xlane.f32.xlu0 %v2020_v53  ;;  %v2023_v12 = vadd.f32 %v2007_v0, %v2006_v58  ;;  %v4777_v14 = vadd.f32 %v2053_v30, %v2052_v4 }
 0x29f   : > { %v1963_v34 = vpop.f32.mrb[4].mxu1  ;;  %v4779_v57 = vadd.f32 %v2055_v17, %v2054_v45 }
 0x2a0   : > { %v2008_v20 = vmul.f32 %v4764_v24, %v1963_v34  ;;  %2104 = vst [vmem:[%s4689_s15 + $0x80] sm:$0xff] %v1963_v34  ;;  %v1965_v44 = vpop.f32.mrb[5].mxu1 }
 0x2a1   : > { %2024 = vadd.xlane.f32.xlu0 %v2023_v12  ;;  %v2009_v61 = vmul.f32 %v4767_v6, %v1965_v44  ;;  %2105 = vst [vmem:[%s4689_s15 + $0x88] sm:$0xff] %v1965_v44  ;;  %v1967_v46 = vpop.f32.mrb[6].mxu1 }
 0x2a2   : > { %v2056_v56 = vmul.f32 %v2008_v20, %v1963_v34  ;;  %v2010_v41 = vmul.f32 %v4764_v24, %v1967_v46  ;;  %2106 = vst [vmem:[%s4689_s15 + $0xb8] sm:$0xff] %v1967_v46  ;;  %v1969_v59 = vpop.f32.mrb[7].mxu1 }
 0x2a3   : > { %v2057_v26 = vmul.f32 %v2009_v61, %v1965_v44  ;;  %v2011_v19 = vmul.f32 %v4767_v6, %v1969_v59  ;;  %2107 = vst [vmem:[%s4689_s15 + $0xc0] sm:$0xff] %v1969_v59  ;;  %v4789_v28 = vadd.f32 %v2009_v61, %v2008_v20 }
 0x2a4   : > { %v2058_v62 = vmul.f32 %v2010_v41, %v1967_v46 }
 0x2a5   : > { %v2059_v33 = vmul.f32 %v2011_v19, %v1969_v59  ;;  %v4791_v39 = vadd.f32 %v2011_v19, %v2010_v41  ;;  %v4793_v42 = vadd.f32 %v2057_v26, %v2056_v56 }
 0x2a7   : > { %v1973_v13 = vpop.f32.mrb[8].mxu1  ;;  %v4795_v27 = vadd.f32 %v2059_v33, %v2058_v62 }
 0x2a8   : > { %v2012_v25 = vmul.f32 %v4764_v24, %v1973_v13  ;;  %2108 = vst [vmem:[%s4689_s15 + $0xf0] sm:$0xff] %v1973_v13  ;;  %v1975_v60 = vpop.f32.mrb[9].mxu1 }
 0x2a9   : > { %v2013_v37 = vmul.f32 %v4767_v6, %v1975_v60  ;;  %2109 = vst [vmem:[%s4689_s15 + $0xf8] sm:$0xff] %v1975_v60  ;;  %v1977_v7 = vpop.f32.mrb[10].mxu1 }
 0x2aa   : > { %v2060_v63 = vmul.f32 %v2012_v25, %v1973_v13  ;;  %v2014_v32 = vmul.f32 %v4764_v24, %v1977_v7  ;;  %2110 = vst [vmem:[%s4689_s15 + $0x128] sm:$0xff] %v1977_v7  ;;  %v1979_v40 = vpop.f32.mrb[11].mxu1 }
 0x2ab   : > { %v2061_v1 = vmul.f32 %v2013_v37, %v1975_v60  ;;  %v2015_v15 = vmul.f32 %v4767_v6, %v1979_v40  ;;  %2111 = vst [vmem:[%s4689_s15 + $0x130] sm:$0xff] %v1979_v40  ;;  %v4805_v11 = vadd.f32 %v2013_v37, %v2012_v25 }
 0x2ac   : > { %v2062_v21 = vmul.f32 %v2014_v32, %v1977_v7 }
 0x2ad   : > { %v2063_v43 = vmul.f32 %v2015_v15, %v1979_v40  ;;  %v4807_v52 = vadd.f32 %v2015_v15, %v2014_v32  ;;  %v4809_v18 = vadd.f32 %v2061_v1, %v2060_v63 }
 0x2af   : > { %v1983_v47 = vpop.f32.mrb[12].mxu1  ;;  %v4811_v35 = vadd.f32 %v2063_v43, %v2062_v21 }
 0x2b0   : > { %v2016_v23 = vmul.f32 %v4764_v24, %v1983_v47  ;;  %2112 = vst [vmem:[%s4689_s15 + $0x160] sm:$0xff] %v1983_v47  ;;  %v1985_v55 = vpop.f32.mrb[13].mxu1 }
 0x2b1   : > { %v2017_v4 = vmul.f32 %v4767_v6, %v1985_v55  ;;  %2113 = vst [vmem:[%s4689_s15 + $0x168] sm:$0xff] %v1985_v55  ;;  %v1987_v58 = vpop.f32.mrb[14].mxu1 }
 0x2b2   : > { %v2064_v29 = vmul.f32 %v2016_v23, %v1983_v47  ;;  %v2018_v30 = vmul.f32 %v4764_v24, %v1987_v58  ;;  %2114 = vst [vmem:[%s4689_s15 + $0x198] sm:$0xff] %v1987_v58  ;;  %v1989_v0 = vpop.f32.mrb[15].mxu1  ;;  %v2237_v24 = vld [vmem:[%s5313_s5 + $0x4] sm:$0x3] }
 0x2b3   : > { %v2065_v53 = vmul.f32 %v2017_v4, %v1985_v55  ;;  %v2019_v45 = vmul.f32 %v4767_v6, %v1989_v0  ;;  %2115 = vst [vmem:[%s4689_s15 + $0x1a0] sm:$0xff] %v1989_v0  ;;  %v4821_v17 = vadd.f32 %v2017_v4, %v2016_v23  ;;  %v4833_v46 = vrot.slane %v2237_v24, %v4673_v49 }
 0x2b4   : > { %v2066_v12 = vmul.f32 %v2018_v30, %v1987_v58  ;;  %v4836_v6 = vrot.slane %v2237_v24, %v4680_v9 }
 0x2b5   : > { %v2067_v34 = vmul.f32 %v2019_v45, %v1989_v0  ;;  %v4823_v20 = vadd.f32 %v2019_v45, %v2018_v30  ;;  %v4825_v44 = vadd.f32 %v2065_v53, %v2064_v29 }
 0x2b7   : > { %v4827_v61 = vadd.f32 %v2067_v34, %v2066_v12 }
 0x2eb   : > { %v2198_v56 = vpop.f32.mrb[16].mxu0 }
 0x2ec   : > { %v2249_v41 = vmul.f32 %v4833_v46, %v2198_v56  ;;  %2345 = vst [vmem:[%s4689_s15 + $0x20] sm:$0xff] %v2198_v56  ;;  %v2200_v59 = vpop.f32.mrb[17].mxu0 }
 0x2ed   : > { %v2250_v26 = vmul.f32 %v4836_v6, %v2200_v59  ;;  %2346 = vst [vmem:[%s4689_s15 + $0x28] sm:$0xff] %v2200_v59  ;;  %v4842_v19 = vpop.f32.mrb[18].mxu0 }
 0x2ee   : > { %v2297_v62 = vmul.f32 %v2249_v41, %v2198_v56  ;;  %v2251_v33 = vmul.f32 %v4833_v46, %v4842_v19  ;;  %v4846_v49 = vpop.f32.mrb[19].mxu0 }
 0x2ef   : > { %v2298_v13 = vmul.f32 %v2250_v26, %v2200_v59  ;;  %v2252_v9 = vmul.f32 %v4836_v6, %v4846_v49  ;;  %v2265_v25 = vadd.f32 %v2250_v26, %v2249_v41 }
 0x2f0   : > { %v2299_v60 = vmul.f32 %v2251_v33, %v4842_v19 }
 0x2f1   : > { %v2300_v37 = vmul.f32 %v2252_v9, %v4846_v49  ;;  %2266 = vadd.xlane.f32.xlu1 %v2265_v25  ;;  %v2268_v7 = vadd.f32 %v2252_v9, %v2251_v33  ;;  %v4852_v63 = vadd.f32 %v2298_v13, %v2297_v62 }
 0x2f3   : > { %2269 = vadd.xlane.f32.xlu0 %v2268_v7  ;;  %v2208_v32 = vpop.f32.mrb[20].mxu0  ;;  %v4854_v40 = vadd.f32 %v2300_v37, %v2299_v60 }
 0x2f4   : > { %v2253_v1 = vmul.f32 %v4833_v46, %v2208_v32  ;;  %2349 = vst [vmem:[%s4689_s15 + $0x90] sm:$0xff] %v2208_v32  ;;  %v2210_v15 = vpop.f32.mrb[21].mxu0 }
 0x2f5   : > { %1782 = vadd.xlane.f32.xlu1 %v4730_v10  ;;  %v2254_v21 = vmul.f32 %v4836_v6, %v2210_v15  ;;  %2350 = vst [vmem:[%s4689_s15 + $0x98] sm:$0xff] %v2210_v15  ;;  %v4861_v43 = vpop.f32.mrb[22].mxu0 }
 0x2f6   : > { %v2301_v47 = vmul.f32 %v2253_v1, %v2208_v32  ;;  %v2255_v23 = vmul.f32 %v4833_v46, %v4861_v43  ;;  %v4865_v55 = vpop.f32.mrb[23].mxu0 }
 0x2f7   : > { %1785 = vadd.xlane.f32.xlu0 %v4732_v54  ;;  %v2302_v4 = vmul.f32 %v2254_v21, %v2210_v15  ;;  %v2256_v58 = vmul.f32 %v4836_v6, %v4865_v55  ;;  %v2271_v10 = vadd.f32 %v2254_v21, %v2253_v1  ;;  %v3278_v21 = vld [vmem:[%s5313_s5 + $0x6] ss:$0 sm:$0xff] }
 0x2f8   : > { %v2303_v29 = vmul.f32 %v2255_v23, %v4861_v43 }
 0x2f9   : > { %2027 = vadd.xlane.f32.xlu1 %v4789_v28  ;;  %v2304_v30 = vmul.f32 %v2256_v58, %v4865_v55  ;;  %v2274_v0 = vadd.f32 %v2256_v58, %v2255_v23  ;;  %v4873_v53 = vadd.f32 %v2302_v4, %v2301_v47 }
 0x2fb   : > { %2030 = vadd.xlane.f32.xlu0 %v4791_v39  ;;  %v2218_v54 = vpop.f32.mrb[24].mxu0  ;;  %v4876_v45 = vadd.f32 %v2304_v30, %v2303_v29 }
 0x2fc   : > { %v2257_v12 = vmul.f32 %v4833_v46, %v2218_v54  ;;  %2353 = vst [vmem:[%s4689_s15 + $0x100] sm:$0xff] %v2218_v54  ;;  %v2220_v34 = vpop.f32.mrb[25].mxu0 }
 0x2fd   : > { %v2258_v24 = vmul.f32 %v4836_v6, %v2220_v34  ;;  %2354 = vst [vmem:[%s4689_s15 + $0x108] sm:$0xff] %v2220_v34  ;;  %v2222_v56 = vpop.f32.mrb[26].mxu0 }
 0x2fe   : > { %v2305_v28 = vmul.f32 %v2257_v12, %v2218_v54  ;;  %v2259_v41 = vmul.f32 %v4833_v46, %v2222_v56  ;;  %2355 = vst [vmem:[%s4689_s15 + $0x138] sm:$0xff] %v2222_v56  ;;  %v2224_v59 = vpop.f32.mrb[27].mxu0 }
 0x2ff   : > { %v2306_v26 = vmul.f32 %v2258_v24, %v2220_v34  ;;  %v2260_v39 = vmul.f32 %v4836_v6, %v2224_v59  ;;  %2356 = vst [vmem:[%s4689_s15 + $0x140] sm:$0xff] %v2224_v59  ;;  %v2277_v62 = vadd.f32 %v2258_v24, %v2257_v12 }
 0x300   : > { %v2307_v33 = vmul.f32 %v2259_v41, %v2222_v56 }
 0x301   : > { %v2308_v13 = vmul.f32 %v2260_v39, %v2224_v59  ;;  %v2280_v9 = vadd.f32 %v2260_v39, %v2259_v41  ;;  %v4886_v25 = vadd.f32 %v2306_v26, %v2305_v28 }
 0x303   : > { %v2228_v60 = vpop.f32.mrb[28].mxu0  ;;  %v4888_v37 = vadd.f32 %v2308_v13, %v2307_v33 }
 0x304   : > { %v2261_v7 = vmul.f32 %v4833_v46, %v2228_v60  ;;  %2357 = vst [vmem:[%s4689_s15 + $0x170] sm:$0xff] %v2228_v60  ;;  %v2230_v32 = vpop.f32.mrb[29].mxu0 }
 0x305   : > { %v2262_v1 = vmul.f32 %v4836_v6, %v2230_v32  ;;  %2358 = vst [vmem:[%s4689_s15 + $0x178] sm:$0xff] %v2230_v32  ;;  %v2232_v15 = vpop.f32.mrb[30].mxu0 }
 0x306   : > { %v2309_v47 = vmul.f32 %v2261_v7, %v2228_v60  ;;  %v2263_v23 = vmul.f32 %v4833_v46, %v2232_v15  ;;  %2359 = vst [vmem:[%s4689_s15 + $0x1a8] sm:$0xff] %v2232_v15  ;;  %v2234_v4 = vpop.f32.mrb[31].mxu0 }
 0x307   : > { %v4899_v58 = vpop.f32.mrb[16].mxu1  ;;  %v2310_v29 = vmul.f32 %v2262_v1, %v2230_v32  ;;  %v2264_v30 = vmul.f32 %v4836_v6, %v2234_v4  ;;  %2360 = vst [vmem:[%s4689_s15 + $0x1b0] sm:$0xff] %v2234_v4  ;;  %v2283_v54 = vadd.f32 %v2262_v1, %v2261_v7 }
 0x308   : > { %v4903_v12 = vpop.f32.mrb[17].mxu1  ;;  %v2311_v34 = vmul.f32 %v2263_v23, %v2232_v15 }
 0x309   : > { %v2457_v24 = vmul.f32 %v3278_v21, %v4903_v12  ;;  %v4906_v56 = vpop.f32.mrb[18].mxu1  ;;  %v2312_v46 = vmul.f32 %v2264_v30, %v2234_v4  ;;  %v2286_v28 = vadd.f32 %v2264_v30, %v2263_v23  ;;  %v4908_v41 = vadd.f32 %v2310_v29, %v2309_v47 }
 0x30a   : > { %v4910_v59 = vpop.f32.mrb[19].mxu1 }
 0x30b   : > { %v2458_v6 = vmul.f32 %v3278_v21, %v4910_v59  ;;  %2465 = vadd.xlane.f32.xlu1 %v2457_v24  ;;  %v4913_v26 = vadd.f32 %v2312_v46, %v2311_v34 }
 0x30d   : > { %2467 = vadd.xlane.f32.xlu0 %v2458_v6 }
 0x30f   : > { %2272 = vadd.xlane.f32.xlu1 %v2271_v10  ;;  %v4915_v39 = vpop.f32.mrb[20].mxu1  ;;  %v2459_v10 = vmul.f32 %v4899_v58, %v3278_v21 }
 0x310   : > { %2527 = vst [vmem:[%s4689_s15 + $0x180] sm:$0xff] %v4915_v39  ;;  %v4919_v33 = vpop.f32.mrb[21].mxu1 }
 0x311   : > { %2275 = vadd.xlane.f32.xlu0 %v2274_v0  ;;  %2525 = vst [vmem:[%s4689_s15 + $0x110] sm:$0xff] %v4919_v33  ;;  %v4923_v13 = vpop.f32.mrb[22].mxu1  ;;  %v2460_v0 = vmul.f32 %v4906_v56, %v3278_v21 }
 0x312   : > { %2528 = vst [vmem:[%s4689_s15 + $0x1b8] sm:$0xff] %v4923_v13  ;;  %v2438_v60 = vpop.f32.mrb[23].mxu1 }
 0x313   : > { %1788 = vadd.xlane.f32.xlu1 %v4744_v36  ;;  %2526 = vst [vmem:[%s4689_s15 + $0x148] sm:$0xff] %v2438_v60  ;;  %v2461_v36 = vmul.f32 %v3278_v21, %v4919_v33 }
 0x315   : > { %1791 = vadd.xlane.f32.xlu0 %v4746_v5  ;;  %v2462_v5 = vmul.f32 %v3278_v21, %v2438_v60 }
 0x317   : > { %2033 = vadd.xlane.f32.xlu1 %v4805_v11 }
 0x319   : > { %2036 = vadd.xlane.f32.xlu0 %v4807_v52 }
 0x31b   : > { %2469 = vadd.xlane.f32.xlu1 %v2459_v10 }
 0x31d   : > { %2471 = vadd.xlane.f32.xlu0 %v2460_v0 }
 0x31f   : > { %2278 = vadd.xlane.f32.xlu1 %v2277_v62 }
 0x321   : > { %2281 = vadd.xlane.f32.xlu0 %v2280_v9 }
 0x323   : > { %1794 = vadd.xlane.f32.xlu1 %v4752_v31  ;;  %v2463_v31 = vmul.f32 %v4915_v39, %v3278_v21 }
 0x325   : > { %1797 = vadd.xlane.f32.xlu0 %v4754_v2  ;;  %v2464_v2 = vmul.f32 %v4923_v13, %v3278_v21 }
 0x327   : > { %2039 = vadd.xlane.f32.xlu1 %v4821_v17 }
 0x329   : > { %2042 = vadd.xlane.f32.xlu0 %v4823_v20 }
 0x32b   : > { %2473 = vadd.xlane.f32.xlu1 %v2461_v36 }
 0x32d   : > { %2475 = vadd.xlane.f32.xlu0 %v2462_v5 }
 0x32f   : > { %2284 = vadd.xlane.f32.xlu1 %v2283_v54 }
 0x331   : > { %2287 = vadd.xlane.f32.xlu0 %v2286_v28 }
 0x333   : > { %1824 = vadd.xlane.f32.xlu1 %v4718_v48  ;;  %v2489_v48 = vmul.f32 %v2457_v24, %v4903_v12 }
 0x335   : > { %1827 = vadd.xlane.f32.xlu0 %v4720_v50  ;;  %v2490_v50 = vmul.f32 %v2458_v6, %v4910_v59 }
 0x337   : > { %2069 = vadd.xlane.f32.xlu1 %v4777_v14  ;;  %v2529_v14 = vld [vmem:[%s5310_s2] sm:$0xff] }
 0x338   : > { %3381 = vmatprep.mubr.msk.f32.mxu1 %vm2537_vm0, %v2529_v14  ;;  %3409 = vmatprep.mubr.msk.f32.mxu0 %vm2537_vm0, %v2529_v14 }
 0x339   : > { %2072 = vadd.xlane.f32.xlu0 %v4779_v57  ;;  %v2495_v57 = vmul.f32 %v4915_v39, %v2463_v31 }
 0x33b   : > { %2477 = vadd.xlane.f32.xlu1 %v2463_v31 }
 0x33d   : > { %2479 = vadd.xlane.f32.xlu0 %v2464_v2 }
 0x33f   : > { %2314 = vadd.xlane.f32.xlu1 %v4852_v63 }
 0x341   : > { %2317 = vadd.xlane.f32.xlu0 %v4854_v40 }
 0x343   : > { %1830 = vadd.xlane.f32.xlu1 %v4734_v38  ;;  %v2491_v38 = vmul.f32 %v4899_v58, %v2459_v10 }
 0x345   : > { %1833 = vadd.xlane.f32.xlu0 %v4738_v8  ;;  %v2492_v8 = vmul.f32 %v4906_v56, %v2460_v0 }
 0x347   : > { %2075 = vadd.xlane.f32.xlu1 %v4793_v42  ;;  %v2496_v42 = vmul.f32 %v4923_v13, %v2464_v2 }
 0x349   : > { %2078 = vadd.xlane.f32.xlu0 %v4795_v27  ;;  %v1780_v27 = vpop.xlane.xlu1 %1779 }
 0x34b   : > { %2497 = vadd.xlane.f32.xlu1 %v2489_v48 }
 0x34d   : > { %2499 = vadd.xlane.f32.xlu0 %v2490_v50 }
 0x34f   : > { %2320 = vadd.xlane.f32.xlu1 %v4873_v53 }
 0x351   : > { %2323 = vadd.xlane.f32.xlu0 %v4876_v45 }
 0x353   : > { %1836 = vadd.xlane.f32.xlu1 %v4748_v3  ;;  %v2493_v3 = vmul.f32 %v2461_v36, %v4919_v33 }
 0x355   : > { %1839 = vadd.xlane.f32.xlu0 %v4750_v22  ;;  %v2494_v22 = vmul.f32 %v2462_v5, %v2438_v60 }
 0x357   : > { %2081 = vadd.xlane.f32.xlu1 %v4809_v18 }
 0x359   : > { %2084 = vadd.xlane.f32.xlu0 %v4811_v35 }
 0x35b   : > { %2501 = vadd.xlane.f32.xlu1 %v2491_v38 }
 0x35d   : > { %2503 = vadd.xlane.f32.xlu0 %v2492_v8 }
 0x35f   : > { %2326 = vadd.xlane.f32.xlu1 %v4886_v25 }
 0x361   : > { %2329 = vadd.xlane.f32.xlu0 %v4888_v37 }
 0x363   : > { %1842 = vadd.xlane.f32.xlu1 %v4756_v51  ;;  %v1777_v51 = vpop.xlane.xlu0 %1776 }
 0x365   : > { %1845 = vadd.xlane.f32.xlu0 %v4758_v16 }
 0x367   : > { %2087 = vadd.xlane.f32.xlu1 %v4825_v44  ;;  %v2022_v16 = vpop.xlane.xlu0 %2021 }
 0x369   : > { %2090 = vadd.xlane.f32.xlu0 %v4827_v61  ;;  %v2044_v61 = vadd.f32 %v2022_v16, %v1777_v51 }
 0x36b   : > { %2505 = vadd.xlane.f32.xlu1 %v2493_v3  ;;  %v2025_v11 = vpop.xlane.xlu0 %2024 }
 0x36c   : > { %v2045_v63 = vadd.f32 %v2025_v11, %v1780_v27 }
 0x36d   : > { %2507 = vadd.xlane.f32.xlu0 %v2494_v22 }
 0x36f   : > { %2332 = vadd.xlane.f32.xlu1 %v4908_v41 }
 0x371   : > { %2335 = vadd.xlane.f32.xlu0 %v4913_v26 }
 0x373   : > { %2509 = vadd.xlane.f32.xlu1 %v2495_v57 }
 0x375   : > { %2511 = vadd.xlane.f32.xlu0 %v2496_v42 }
 0x37e   : > { %v2267_v52 = vpop.xlane.xlu1 %2266 }
 0x37f   : > { %v2289_v53 = vadd.f32 %v2267_v52, %v2044_v61 }
 0x380   : > { %v2270_v18 = vpop.xlane.xlu0 %2269 }
 0x381   : > { %v2290_v45 = vadd.f32 %v2270_v18, %v2045_v63  ;;  %v4980_v63 = vld [vmem:[%s5310_s2 + $0x8] sm:$0xff] }
 0x382   : > { %v1783_v35 = vpop.xlane.xlu1 %1782 }
 0x384   : > { %v1786_v17 = vpop.xlane.xlu0 %1785 }
 0x386   : > { %v2028_v20 = vpop.xlane.xlu1 %2027 }
 0x387   : > { %v2046_v23 = vadd.f32 %v2028_v20, %v1783_v35 }
 0x388   : > { %v2031_v44 = vpop.xlane.xlu0 %2030 }
 0x389   : > { %v2047_v4 = vadd.f32 %v2031_v44, %v1786_v17 }
 0x398   : > { %v2466_v40 = vpop.xlane.xlu1 %2465 }
 0x399   : > { %v2481_v9 = vadd.f32 %v2466_v40, %v2289_v53  ;;  %v4985_v40 = vld [vmem:[%s5310_s2 + $0x10] sm:$0xff] }
 0x39a   : > { %v2468_v62 = vpop.xlane.xlu0 %2467 }
 0x39b   : > { %v2482_v25 = vadd.f32 %v2468_v62, %v2290_v45  ;;  %v4994_v62 = vld [vmem:[%s5310_s2 + $0x18] sm:$0xff] }
 0x39c   : > { %v2273_v37 = vpop.xlane.xlu1 %2272 }
 0x39d   : > { %v3421_v7 = vpack.c.bf16 %v2482_v25, %v2481_v9  ;;  %v2291_v30 = vadd.f32 %v2273_v37, %v2046_v23  ;;  %v2533_v9 = vld [vmem:[%s5310_s2 + $0x20] sm:$0xff] }
 0x39e   : > { %v2276_v32 = vpop.xlane.xlu0 %2275 }
 0x39f   : > { %3422 = vmatprep.subr.bf16.mxu1 %v3421_v7  ;;  %v2292_v54 = vadd.f32 %v2276_v32, %v2047_v4 }
 0x3a0   : > { %3424 = vmatpush3.bf16.msra.mxu1 %v3421_v7  ;;  %v1789_v1 = vpop.xlane.xlu1 %1788 }
 0x3a2   : > { %v1792_v15 = vpop.xlane.xlu0 %1791 }
 0x3a4   : > { %v2034_v21 = vpop.xlane.xlu1 %2033 }
 0x3a5   : > { %v2048_v60 = vadd.f32 %v2034_v21, %v1789_v1  ;;  %v5005_v1 = vld [vmem:[%s5310_s2 + $0x28] sm:$0xff] }
 0x3a6   : > { %v2037_v47 = vpop.xlane.xlu0 %2036 }
 0x3a7   : > { %v2049_v10 = vadd.f32 %v2037_v47, %v1792_v15  ;;  %v5010_v47 = vld [vmem:[%s5310_s2 + $0x30] sm:$0xff] }
 0x3a8   : > { %v2470_v29 = vpop.xlane.xlu1 %2469 }
 0x3a9   : > { %v2483_v24 = vadd.f32 %v2470_v29, %v2291_v30 }
 0x3aa   : > { %v2472_v34 = vpop.xlane.xlu0 %2471 }
 0x3ab   : > { %v2484_v46 = vadd.f32 %v2472_v34, %v2292_v54 }
 0x3ac   : > { %v2279_v28 = vpop.xlane.xlu1 %2278 }
 0x3ad   : > { %v3425_v41 = vpack.c.bf16 %v2484_v46, %v2483_v24  ;;  %v2293_v36 = vadd.f32 %v2279_v28, %v2048_v60  ;;  %v5019_v24 = vld [vmem:[%s5310_s2 + $0x38] sm:$0xff] }
 0x3ae   : > { %v2282_v6 = vpop.xlane.xlu0 %2281 }
 0x3af   : > { %3426 = vmatprep.subr.bf16.mxu1 %v3425_v41  ;;  %v2294_v5 = vadd.f32 %v2282_v6, %v2049_v10 }
 0x3b0   : > { %3428 = vmatpush3.bf16.msra.mxu1 %v3425_v41  ;;  %v1795_v26 = vpop.xlane.xlu1 %1794 }
 0x3b2   : > { %v1798_v39 = vpop.xlane.xlu0 %1797 }
 0x3b4   : > { %v2040_v33 = vpop.xlane.xlu1 %2039 }
 0x3b5   : > { %v2050_v42 = vadd.f32 %v2040_v33, %v1795_v26 }
 0x3b6   : > { %v2043_v13 = vpop.xlane.xlu0 %2042 }
 0x3b7   : > { %v2051_v51 = vadd.f32 %v2043_v13, %v1798_v39 }
 0x3b8   : > { %v2474_v0 = vpop.xlane.xlu1 %2473 }
 0x3b9   : > { %v2485_v2 = vadd.f32 %v2474_v0, %v2293_v36 }
 0x3ba   : > { %v2476_v31 = vpop.xlane.xlu0 %2475 }
 0x3bb   : > { %v2486_v48 = vadd.f32 %v2476_v31, %v2294_v5 }
 0x3bc   : > { %v2285_v50 = vpop.xlane.xlu1 %2284 }
 0x3bd   : > { %v3429_v38 = vpack.c.bf16 %v2486_v48, %v2485_v2  ;;  %v2295_v27 = vadd.f32 %v2285_v50, %v2050_v42 }
 0x3be   : > { %v2288_v8 = vpop.xlane.xlu0 %2287 }
 0x3bf   : > { %3430 = vmatprep.subr.bf16.mxu1 %v3429_v38  ;;  %v2296_v11 = vadd.f32 %v2288_v8, %v2051_v51 }
 0x3c0   : > { %v1825_v14 = vpop.xlane.xlu1 %1824  ;;  %3432 = vmatpush3.bf16.msra.mxu1 %v3429_v38 }
 0x3c2   : > { %v1828_v3 = vpop.xlane.xlu0 %1827 }
 0x3c4   : > { %v2070_v22 = vpop.xlane.xlu1 %2069 }
 0x3c5   : > { %v2092_v37 = vadd.f32 %v2070_v22, %v1825_v14 }
 0x3c6   : > { %v2073_v57 = vpop.xlane.xlu0 %2072 }
 0x3c7   : > { %v2093_v7 = vadd.f32 %v2073_v57, %v1828_v3 }
 0x3c8   : > { %v2478_v16 = vpop.xlane.xlu1 %2477 }
 0x3c9   : > { %v2487_v18 = vadd.f32 %v2478_v16, %v2295_v27 }
 0x3ca   : > { %v2480_v52 = vpop.xlane.xlu0 %2479 }
 0x3cb   : > { %v2488_v35 = vadd.f32 %v2480_v52, %v2296_v11 }
 0x3cc   : > { %v2315_v17 = vpop.xlane.xlu1 %2314 }
 0x3cd   : > { %v3433_v20 = vpack.c.bf16 %v2488_v35, %v2487_v18  ;;  %v2337_v15 = vadd.f32 %v2315_v17, %v2092_v37 }
 0x3ce   : > { %v2318_v44 = vpop.xlane.xlu0 %2317 }
 0x3cf   : > { %3434 = vmatprep.subr.bf16.mxu1 %v3433_v20  ;;  %v2338_v21 = vadd.f32 %v2318_v44, %v2093_v7 }
 0x3d0   : > { %v1831_v61 = vpop.xlane.xlu1 %1830  ;;  %3436 = vmatpush3.bf16.msra.mxu1 %v3433_v20 }
 0x3d2   : > { %v1834_v53 = vpop.xlane.xlu0 %1833 }
 0x3d3   : > { %3382 = vmatmul.mubr.msk.f32.vlgmr.msra.gmra.mrb[24].mxu1 %vm2537_vm0, %v4980_v63 }
 0x3d4   : > { %v2076_v45 = vpop.xlane.xlu1 %2075  ;;  %3384 = vmatprep.mubr.msk.f32.mxu1 %vm2537_vm0, %v4985_v40 }
 0x3d5   : > { %v2094_v26 = vadd.f32 %v2076_v45, %v1831_v61 }
 0x3d6   : > { %v2079_v25 = vpop.xlane.xlu0 %2078 }
 0x3d7   : > { %3385 = vmatmul.mubr.msk.f32.gmra.mrb[26].mxu1 %vm2537_vm0, %v4994_v62  ;;  %v2095_v39 = vadd.f32 %v2079_v25, %v1834_v53 }
 0x3d8   : > { %v2498_v32 = vpop.xlane.xlu1 %2497  ;;  %3387 = vmatprep.mubr.msk.f32.mxu1 %vm2537_vm0, %v2533_v9 }
 0x3d9   : > { %v2513_v4 = vadd.f32 %v2498_v32, %v2337_v15 }
 0x3da   : > { %v2500_v23 = vpop.xlane.xlu0 %2499 }
 0x3db   : > { %v2514_v29 = vadd.f32 %v2500_v23, %v2338_v21  ;;  %3388 = vmatmul.mubr.msk.f32.gmra.mrb[28].mxu1 %vm2537_vm0, %v5005_v1 }
 0x3dc   : > { %v2321_v30 = vpop.xlane.xlu1 %2320  ;;  %3390 = vmatprep.mubr.msk.f32.mxu1 %vm2537_vm0, %v5010_v47 }
 0x3dd   : > { %v3437_v54 = vpack.c.bf16 %v2514_v29, %v2513_v4  ;;  %v2339_v13 = vadd.f32 %v2321_v30, %v2094_v26 }
 0x3de   : > { %v2324_v34 = vpop.xlane.xlu0 %2323 }
 0x3df   : > { %3438 = vmatprep.subr.bf16.mxu0 %v3437_v54  ;;  %3453 = vmatprep.subr.bf16.mxu1 %v3437_v54  ;;  %v2340_v60 = vadd.f32 %v2324_v34, %v2095_v39 }
 0x3e0   : > { %v1837_v46 = vpop.xlane.xlu1 %1836  ;;  %3440 = vmatpush3.bf16.msra.mxu0 %v3437_v54  ;;  %3457 = vmatpush3.bf16.msra.mxu1 %v3437_v54 }
 0x3e1   : > { %3391 = vmatmul.mubr.msk.f32.gmra.mrb[30].mxu1 %vm2537_vm0, %v5019_v24 }
 0x3e2   : > { %v1840_v28 = vpop.xlane.xlu0 %1839  ;;  %3415 = vmatprep.mubr.msk.f32.mxu1 %vm2537_vm0, %v2533_v9 }
 0x3e4   : > { %v2082_v41 = vpop.xlane.xlu1 %2081 }
 0x3e5   : > { %v2096_v14 = vadd.f32 %v2082_v41, %v1837_v46 }
 0x3e6   : > { %v2085_v6 = vpop.xlane.xlu0 %2084 }
 0x3e7   : > { %v2097_v3 = vadd.f32 %v2085_v6, %v1840_v28 }
 0x3e8   : > { %v2502_v33 = vpop.xlane.xlu1 %2501 }
 0x3e9   : > { %v2515_v0 = vadd.f32 %v2502_v33, %v2339_v13 }
 0x3ea   : > { %v2504_v10 = vpop.xlane.xlu0 %2503 }
 0x3eb   : > { %v2516_v36 = vadd.f32 %v2504_v10, %v2340_v60 }
 0x3ec   : > { %v2327_v5 = vpop.xlane.xlu1 %2326 }
 0x3ed   : > { %v3441_v31 = vpack.c.bf16 %v2516_v36, %v2515_v0  ;;  %v2341_v57 = vadd.f32 %v2327_v5, %v2096_v14 }
 0x3ee   : > { %v2330_v2 = vpop.xlane.xlu0 %2329 }
 0x3ef   : > { %3442 = vmatprep.subr.bf16.mxu0 %v3441_v31  ;;  %3454 = vmatprep.subr.bf16.mxu1 %v3441_v31  ;;  %v2342_v42 = vadd.f32 %v2330_v2, %v2097_v3 }
 0x3f0   : > { %v1843_v48 = vpop.xlane.xlu1 %1842  ;;  %3444 = vmatpush3.bf16.msra.mxu0 %v3441_v31  ;;  %3458 = vmatpush3.bf16.msra.mxu1 %v3441_v31 }
 0x3f2   : > { %v1846_v50 = vpop.xlane.xlu0 %1845 }
 0x3f4   : > { %v2088_v38 = vpop.xlane.xlu1 %2087 }
 0x3f5   : > { %v2098_v35 = vadd.f32 %v2088_v38, %v1843_v48 }
 0x3f6   : > { %v2091_v8 = vpop.xlane.xlu0 %2090 }
 0x3f7   : > { %v2099_v17 = vadd.f32 %v2091_v8, %v1846_v50 }
 0x3f8   : > { %v2506_v22 = vpop.xlane.xlu1 %2505 }
 0x3f9   : > { %v2517_v16 = vadd.f32 %v2506_v22, %v2341_v57 }
 0x3fa   : > { %v2508_v51 = vpop.xlane.xlu0 %2507 }
 0x3fb   : > { %v2518_v27 = vadd.f32 %v2508_v51, %v2342_v42 }
 0x3fc   : > { %v2333_v11 = vpop.xlane.xlu1 %2332 }
 0x3fd   : > { %v3445_v52 = vpack.c.bf16 %v2518_v27, %v2517_v16  ;;  %v2343_v44 = vadd.f32 %v2333_v11, %v2098_v35 }
 0x3fe   : > { %v2336_v18 = vpop.xlane.xlu0 %2335 }
 0x3ff   : > { %3446 = vmatprep.subr.bf16.mxu0 %v3445_v52  ;;  %3455 = vmatprep.subr.bf16.mxu1 %v3445_v52  ;;  %v2344_v61 = vadd.f32 %v2336_v18, %v2099_v17  ;;  %v2813_v17 = vld [vmem:[%s5311_s3 + $0x8] sm:$0xff] }
 0x400   : > { %v2510_v20 = vpop.xlane.xlu1 %2509  ;;  %3448 = vmatpush3.bf16.msra.mxu0 %v3445_v52  ;;  %3459 = vmatpush3.bf16.msra.mxu1 %v3445_v52 }
 0x401   : > { %v2519_v45 = vadd.f32 %v2510_v20, %v2343_v44  ;;  %v2812_v20 = vld [vmem:[%s5311_s3] sm:$0xff] }
 0x402   : > { %v2512_v53 = vpop.xlane.xlu0 %2511 }
 0x403   : > { %v2520_v9 = vadd.f32 %v2512_v53, %v2344_v61  ;;  %v2817_v61 = vld [vmem:[%s5311_s3 + $0x28] sm:$0xff] }
 0x405   : > { %v3449_v25 = vpack.c.bf16 %v2520_v9, %v2519_v45  ;;  %v2816_v9 = vld [vmem:[%s5311_s3 + $0x20] sm:$0xff] }
 0x407   : > { %3450 = vmatprep.subr.bf16.mxu0 %v3449_v25  ;;  %3456 = vmatprep.subr.bf16.mxu1 %v3449_v25 }
 0x408   : > { %3452 = vmatpush3.bf16.msra.mxu0 %v3449_v25  ;;  %3460 = vmatpush3.bf16.msra.mxu1 %v3449_v25 }
 0x40b   : > { %3410 = vmatmul.mubr.msk.f32.vlgmr.msra.gmra.mrb[32].mxu0 %vm2537_vm0, %v4980_v63  ;;  %3416 = vmatmul.mubr.msk.f32.vlgmr.msra.gmra.mrb[32].mxu1 %vm2537_vm0, %v5005_v1 }
 0x40c   : > { %3412 = vmatprep.mubr.msk.f32.mxu0 %vm2537_vm0, %v4985_v40  ;;  %3418 = vmatprep.mubr.msk.f32.mxu1 %vm2537_vm0, %v5010_v47 }
 0x40f   : > { %3413 = vmatmul.mubr.msk.f32.gmra.mrb[34].mxu0 %vm2537_vm0, %v4994_v62  ;;  %3419 = vmatmul.mubr.msk.f32.gmra.mrb[34].mxu1 %vm2537_vm0, %v5019_v24 }
 0x4a6   : > { %v5036_v37 = vpop.f32.mrb[24].mxu1 }
 0x4a7   : > { %v5038_v7 = vpop.f32.mrb[25].mxu1  ;;  %v2773_v62 = vmul.f32 %v5036_v37, %v5036_v37 }
 0x4a8   : > { %v2772_v23 = vmul.f32 %v5038_v7, %v5038_v7 }
 0x4aa   : > { %v5040_v63 = vpop.f32.mrb[26].mxu1 }
 0x4ab   : > { %v5042_v32 = vpop.f32.mrb[27].mxu1  ;;  %v2775_v54 = vmul.f32 %v5040_v63, %v5040_v63 }
 0x4ac   : > { %v2774_v6 = vmul.f32 %v5042_v32, %v5042_v32 }
 0x4ae   : > { %v5044_v1 = vpop.f32.mrb[28].mxu1 }
 0x4af   : > { %v5046_v40 = vpop.f32.mrb[29].mxu1  ;;  %v2777_v47 = vmul.f32 %v5044_v1, %v5044_v1 }
 0x4b0   : > { %v2776_v4 = vmul.f32 %v5046_v40, %v5046_v40 }
 0x4b4   : > { %v5048_v15 = vpop.f32.mrb[30].mxu1 }
 0x4b5   : > { %v5050_v21 = vpop.f32.mrb[31].mxu1  ;;  %v2779_v34 = vmul.f32 %v5048_v15, %v5048_v15 }
 0x4b6   : > { %v2778_v26 = vmul.f32 %v5050_v21, %v5050_v21 }
 0x4de   : > { %v3411_v29 = vpop.f32.mrb[32].mxu0  ;;  %v3417_v30 = vpop.f32.mrb[32].mxu1 }
 0x4df   : > { %v2781_v24 = vsub.f32 %v3411_v29, %v2773_v62  ;;  %v2733_v46 = vpop.f32.mrb[33].mxu0  ;;  %v2785_v28 = vsub.f32 %v3417_v30, %v2777_v47  ;;  %v2753_v41 = vpop.f32.mrb[33].mxu1  ;;  %v2815_v47 = vld [vmem:[%s5311_s3 + $0x18] sm:$0xff]  ;;  %v2814_v29 = vld [vmem:[%s5311_s3 + $0x10] sm:$0xff] }
 0x4e0   : > { %v2780_v39 = vsub.f32 %v2733_v46, %v2772_v23  ;;  %v2784_v33 = vsub.f32 %v2753_v41, %v2776_v4  ;;  %v2819_v46 = vld [vmem:[%s5311_s3 + $0x38] sm:$0xff] }
 0x4e1   : > { %v2789_v13 = vmax.f32 %v2781_v24, 0.0  ;;  %v2793_v60 = vmax.f32 %v2785_v28, 0.0 }
 0x4e2   : > { %v2788_v10 = vmax.f32 %v2780_v39, 0.0  ;;  %v2792_v0 = vmax.f32 %v2784_v33, 0.0  ;;  %v3414_v36 = vpop.f32.mrb[34].mxu0  ;;  %v3420_v5 = vpop.f32.mrb[34].mxu1 }
 0x4e3   : > { %v2797_v31 = vadd.f32 1e-05, %v2789_v13  ;;  %v2801_v2 = vadd.f32 1e-05, %v2793_v60  ;;  %v2783_v48 = vsub.f32 %v3414_v36, %v2775_v54  ;;  %v2743_v50 = vpop.f32.mrb[35].mxu0  ;;  %v2787_v38 = vsub.f32 %v3420_v5, %v2779_v34  ;;  %v2763_v8 = vpop.f32.mrb[35].mxu1 }
 0x4e4   : > { %v2796_v14 = vadd.f32 1e-05, %v2788_v10  ;;  %v2800_v3 = vadd.f32 1e-05, %v2792_v0  ;;  %v2782_v22 = vsub.f32 %v2743_v50, %v2774_v6  ;;  %v2786_v57 = vsub.f32 %v2763_v8, %v2778_v26  ;;  %v2830_v60 = vld [vmem:[%s5312_s4 + $0x10] sm:$0xff] }
 0x4e5   : > { %3522 = vrsqrt.f32 %v2797_v31  ;;  %v2791_v42 = vmax.f32 %v2783_v48, 0.0  ;;  %v2795_v51 = vmax.f32 %v2787_v38, 0.0  ;;  %v2832_v48 = vld [vmem:[%s5312_s4 + $0x20] sm:$0xff] }
 0x4e6   : > { %3524 = vrsqrt.f32 %v2796_v14  ;;  %v2790_v16 = vmax.f32 %v2782_v22, 0.0  ;;  %v2794_v27 = vmax.f32 %v2786_v57, 0.0  ;;  %v2833_v14 = vld [vmem:[%s5312_s4 + $0x28] sm:$0xff]  ;;  %v2835_v22 = vld [vmem:[%s5312_s4 + $0x38] sm:$0xff] }
 0x4e7   : > { %3526 = vrsqrt.f32 %v2801_v2  ;;  %v2799_v11 = vadd.f32 1e-05, %v2791_v42  ;;  %v2803_v52 = vadd.f32 1e-05, %v2795_v51 }
 0x4e8   : > { %3528 = vrsqrt.f32 %v2800_v3  ;;  %v2798_v18 = vadd.f32 1e-05, %v2790_v16  ;;  %v2802_v35 = vadd.f32 1e-05, %v2794_v27  ;;  %v2854_v16 = vld [vmem:[%s4689_s15 + $0x38] sm:$0xff]  ;;  %v2855_v27 = vld [vmem:[%s4689_s15 + $0x40] sm:$0xff] }
 0x4e9   : > { %3530 = vrsqrt.f32 %v2799_v11  ;;  %v3014_v11 = vld [vmem:[%s4689_s15 + $0x48] sm:$0xff] }
 0x4ea   : > { %3532 = vrsqrt.f32 %v2798_v18 }
 0x4eb   : > { %3534 = vrsqrt.f32 %v2803_v52  ;;  %v3015_v52 = vld [vmem:[%s4689_s15 + $0x50] sm:$0xff] }
 0x4ec   : > { %3536 = vrsqrt.f32 %v2802_v35 }
 0x4ef   : > { %v3523_v44 = vpop.eup %3522 }
 0x4f0   : > { %v3525_v53 = vpop.eup %3524  ;;  %v2821_v45 = vmul.f32 %v3523_v44, %v2813_v17 }
 0x4f1   : > { %v3527_v25 = vpop.eup %3526  ;;  %v2820_v62 = vmul.f32 %v3525_v53, %v2812_v20  ;;  %v2853_v53 = vld [vmem:[%s4689_s15 + $0x8] sm:$0xff] }
 0x4f2   : > { %v3529_v23 = vpop.eup %3528  ;;  %2875 = vperm.xlu0 %3499, %v2821_v45   ;;  %v2837_v4 = vmul.f32 %v5036_v37, %v2821_v45  ;;  %v2825_v30 = vmul.f32 %v3527_v25, %v2817_v61  ;;  %v2818_v37 = vld [vmem:[%s5311_s3 + $0x30] sm:$0xff]  ;;  %v2852_v61 = vld [vmem:[%s4689_s15] sm:$0xff] }
 0x4f3   : > { %v3531_v54 = vpop.eup %3530  ;;  %2870 = vperm.xlu1 %3500, %v2820_v62   ;;  %v2824_v34 = vmul.f32 %v3529_v23, %v2816_v9  ;;  %v2836_v24 = vmul.f32 %v2820_v62, %v5038_v7  ;;  %v2829_v7 = vld [vmem:[%s5312_s4 + $0x8] sm:$0xff]  ;;  %v3012_v62 = vld [vmem:[%s4689_s15 + $0x10] sm:$0xff]  ;;  %v3092_v23 = vld [vmem:[%s4689_s15 + $0x20] sm:$0xff] }
 0x4f4   : > { %v3533_v28 = vpop.eup %3532  ;;  %v2823_v41 = vmul.f32 %v3531_v54, %v2815_v47  ;;  %v2841_v6 = vmul.f32 %v5044_v1, %v2825_v30  ;;  %v2845_v31 = vsub.f32 %v2829_v7, %v2837_v4  ;;  %v3013_v47 = vld [vmem:[%s4689_s15 + $0x18] sm:$0xff] }
 0x4f5   : > { %v3535_v26 = vpop.eup %3534  ;;  %v2822_v39 = vmul.f32 %v3533_v28, %v2814_v29  ;;  %v2840_v33 = vmul.f32 %v2824_v34, %v5046_v40  ;;  %v3093_v29 = vld [vmem:[%s4689_s15 + $0x28] sm:$0xff] }
 0x4f6   : > { %v3537_v13 = vpop.eup %3536  ;;  %v2839_v10 = vmul.f32 %v5040_v63, %v2823_v41  ;;  %v2827_v0 = vmul.f32 %v3535_v26, %v2819_v46  ;;  %v2828_v63 = vld [vmem:[%s5312_s4] sm:$0xff]  ;;  %v2849_v3 = vsub.f32 %v2833_v14, %v2841_v6  ;;  %v3018_v6 = vld [vmem:[%s4689_s15 + $0xb8] sm:$0xff] }
 0x4f7   : > { %2885 = vperm.xlu1 %3500, %v2823_v41   ;;  %v2838_v36 = vmul.f32 %v2822_v39, %v5042_v32  ;;  %v2826_v1 = vmul.f32 %v3537_v13, %v2818_v37  ;;  %v2848_v50 = vsub.f32 %v2832_v48, %v2840_v33  ;;  %v2834_v32 = vld [vmem:[%s5312_s4 + $0x30] sm:$0xff]  ;;  %v3097_v14 = vld [vmem:[%s4689_s15 + $0x98] sm:$0xff] }
 0x4f8   : > { %v2843_v5 = vmul.f32 %v5048_v15, %v2827_v0  ;;  %v2844_v15 = vsub.f32 %v2828_v63, %v2836_v24 }
 0x4f9   : > { %v2846_v40 = vsub.f32 %v2830_v60, %v2838_v36  ;;  %v2842_v2 = vmul.f32 %v2826_v1, %v5050_v21  ;;  %v2831_v21 = vld [vmem:[%s5312_s4 + $0x18] sm:$0xff] }
 0x4fa   : > { %v2847_v8 = vsub.f32 %v2831_v21, %v2839_v10  ;;  %v2851_v57 = vsub.f32 %v2835_v22, %v2843_v5 }
 0x4fb   : > { %2931 = vperm.xlu1 %3500, %v2845_v31   ;;  %2936 = vperm.xlu0 %3499, %v2846_v40   ;;  %v2850_v38 = vsub.f32 %v2834_v32, %v2842_v2  ;;  %v2856_v40 = vld [vmem:[%s4689_s15 + $0x70] sm:$0xff]  ;;  %v2857_v32 = vld [vmem:[%s4689_s15 + $0x78] sm:$0xff] }
 0x4ff   : > { %2880 = vperm.xlu1 %3500, %v2822_v39   ;;  %2946 = vperm.xlu0 %3499, %v2848_v50  }
 0x503   : > { %2926 = vperm.xlu1 %3500, %v2844_v15   ;;  %2956 = vperm.xlu0 %3499, %v2850_v38   ;;  %v3016_v15 = vld [vmem:[%s4689_s15 + $0x80] sm:$0xff]  ;;  %v3017_v38 = vld [vmem:[%s4689_s15 + $0x88] sm:$0xff] }
 0x507   : > { %2941 = vperm.xlu1 %3500, %v2847_v8   ;;  %v3096_v8 = vld [vmem:[%s4689_s15 + $0x90] sm:$0xff] }
 0x50b   : > { %2895 = vperm.xlu1 %3500, %v2825_v30  }
 0x50f   : > { %2890 = vperm.xlu1 %3500, %v2824_v34  }
 0x513   : > { %2905 = vperm.xlu1 %3500, %v2827_v0   ;;  %v3019_v0 = vld [vmem:[%s4689_s15 + $0xc0] sm:$0xff] }
 0x517   : > { %2951 = vperm.xlu1 %3500, %v2849_v3  }
 0x51b   : > { %2900 = vperm.xlu1 %3500, %v2826_v1  }
 0x51f   : > { %2961 = vperm.xlu1 %3500, %v2851_v57  }
 0x571   : > { %v2876_v51 = vpop.permute.xlu0 %2875 }
 0x572   : > { %v2871_v42 = vpop.permute.xlu1 %2870  ;;  %v2910_v35 = vmul.f32 %v2876_v51, %v2854_v16  ;;  %v2911_v17 = vmul.f32 %v2876_v51, %v2855_v27  ;;  %v3030_v20 = vmul.f32 %v3014_v11, %v2876_v51  ;;  %v3031_v44 = vmul.f32 %v3015_v52, %v2876_v51 }
 0x573   : > { %v3110_v45 = vmul.f32 %v2876_v51, %v4842_v19  ;;  %v3111_v9 = vmul.f32 %v2876_v51, %v4846_v49  ;;  %v3181_v25 = vmul.f32 %v2876_v51, %v4910_v59  ;;  %v5138_v4 = vmul.f32 %v2871_v42, %v2852_v61  ;;  %v2858_v19 = vld [vmem:[%s4689_s15 + $0xa8] sm:$0xff]  ;;  %v2859_v49 = vld [vmem:[%s4689_s15 + $0xb0] sm:$0xff] }
 0x574   : > { %v5141_v30 = vmul.f32 %v2871_v42, %v2853_v53  ;;  %v5143_v54 = vmul.f32 %v3012_v62, %v2871_v42  ;;  %v5145_v34 = vmul.f32 %v3013_v47, %v2871_v42  ;;  %v5147_v24 = vmul.f32 %v3092_v23, %v2871_v42 }
 0x575   : > { %v5151_v46 = vmul.f32 %v3093_v29, %v2871_v42  ;;  %v5154_v59 = vmul.f32 %v2871_v42, %v4903_v12 }
 0x576   : > { %v5128_v18 = vpop.permute.xlu1 %2885 }
 0x577   : > { %v5157_v28 = vmul.f32 %v5128_v18, %v2858_v19  ;;  %v5160_v41 = vmul.f32 %v5128_v18, %v2859_v49  ;;  %v5164_v7 = vmul.f32 %v3018_v6, %v5128_v18  ;;  %v5169_v2 = vmul.f32 %v3019_v0, %v5128_v18 }
 0x578   : > { %v3114_v51 = vmul.f32 %v5128_v18, %v4861_v43  ;;  %v3115_v61 = vmul.f32 %v5128_v18, %v4865_v55 }
 0x57a   : > { %v2932_v37 = vpop.permute.xlu1 %2931  ;;  %v2937_v16 = vpop.permute.xlu0 %2936 }
 0x57b   : > { %v2966_v26 = vadd.f32 %v2932_v37, %v2910_v35  ;;  %v2967_v39 = vadd.f32 %v2932_v37, %v2911_v17  ;;  %v3046_v33 = vadd.f32 %v3030_v20, %v2932_v37  ;;  %v3047_v13 = vadd.f32 %v3031_v44, %v2932_v37 }
 0x57c   : > { %v3126_v12 = vadd.f32 %v3110_v45, %v2932_v37  ;;  %v3127_v60 = vadd.f32 %v3111_v9, %v2932_v37  ;;  %v3189_v10 = vadd.f32 %v3181_v25, %v2932_v37 }
 0x57d   : > { %v2982_v36 = vmax.f32 %v2966_v26, 0.0  ;;  %v2983_v1 = vmax.f32 %v2967_v39, 0.0  ;;  %v3062_v5 = vmax.f32 %v3046_v33, 0.0  ;;  %v3063_v31 = vmax.f32 %v3047_v13, 0.0 }
 0x57e   : > { %v3142_v48 = vmax.f32 %v3126_v12, 0.0  ;;  %v3143_v50 = vmax.f32 %v3127_v60, 0.0  ;;  %v3197_v63 = vmax.f32 %v3189_v10, 0.0  ;;  %v2881_v21 = vpop.permute.xlu1 %2880  ;;  %v3183_v39 = vmul.f32 %v4906_v56, %v5128_v18 }
 0x57f   : > { %2998 = vst [vmem:[%s4689_s15 + $0x38] sm:$0xff] %v2982_v36  ;;  %2999 = vst [vmem:[%s4689_s15 + $0x40] sm:$0xff] %v2983_v1  ;;  %v2912_v3 = vmul.f32 %v2881_v21, %v2856_v40  ;;  %v2913_v22 = vmul.f32 %v2881_v21, %v2857_v32  ;;  %v3032_v57 = vmul.f32 %v3016_v15, %v2881_v21  ;;  %v3020_v32 = vld [vmem:[%s4689_s15 + $0xf0] sm:$0xff]  ;;  %v3021_v15 = vld [vmem:[%s4689_s15 + $0xf8] sm:$0xff] }
 0x580   : > { %3078 = vst [vmem:[%s4689_s15 + $0x48] sm:$0xff] %v3062_v5  ;;  %3079 = vst [vmem:[%s4689_s15 + $0x50] sm:$0xff] %v3063_v31  ;;  %v3033_v42 = vmul.f32 %v3017_v38, %v2881_v21  ;;  %v3112_v27 = vmul.f32 %v3096_v8, %v2881_v21  ;;  %v3113_v11 = vmul.f32 %v3097_v14, %v2881_v21  ;;  %v3101_v8 = vld [vmem:[%s4689_s15 + $0x108] sm:$0xff]  ;;  %v3176_v14 = vld [vmem:[%s4689_s15 + $0x110] sm:$0xff] }
 0x581   : > { %3158 = vst [vmem:[%s4689_s15 + $0x58] sm:$0xff] %v3142_v48  ;;  %3159 = vst [vmem:[%s4689_s15 + $0x60] sm:$0xff] %v3143_v50  ;;  %v3182_v52 = vmul.f32 %v4899_v58, %v2881_v21  ;;  %v2968_v35 = vadd.f32 %v2937_v16, %v2912_v3  ;;  %v2969_v17 = vadd.f32 %v2937_v16, %v2913_v22  ;;  %v2860_v50 = vld [vmem:[%s4689_s15 + $0xe0] sm:$0xff] }
 0x582   : > { %3205 = vst [vmem:[%s4689_s15 + $0x68] sm:$0xff] %v3197_v63  ;;  %v3048_v20 = vadd.f32 %v3032_v57, %v2937_v16  ;;  %v3049_v44 = vadd.f32 %v3033_v42, %v2937_v16  ;;  %v3128_v43 = vadd.f32 %v3112_v27, %v2937_v16  ;;  %v3129_v53 = vadd.f32 %v3113_v11, %v2937_v16  ;;  %v2927_v9 = vpop.permute.xlu1 %2926  ;;  %v2861_v63 = vld [vmem:[%s4689_s15 + $0xe8] sm:$0xff]  ;;  %v3100_v21 = vld [vmem:[%s4689_s15 + $0x100] sm:$0xff] }
 0x583   : > { %v3190_v45 = vadd.f32 %v3182_v52, %v2937_v16  ;;  %v2984_v25 = vmax.f32 %v2968_v35, 0.0  ;;  %v2985_v62 = vmax.f32 %v2969_v17, 0.0  ;;  %v2964_v49 = vadd.f32 %v2927_v9, %v5138_v4  ;;  %v2862_v52 = vld [vmem:[%s4689_s15 + $0x118] sm:$0xff] }
 0x584   : > { %v3064_v47 = vmax.f32 %v3048_v20, 0.0  ;;  %v3065_v58 = vmax.f32 %v3049_v44, 0.0  ;;  %v3144_v23 = vmax.f32 %v3128_v43, 0.0  ;;  %v3145_v29 = vmax.f32 %v3129_v53, 0.0 }
 0x585   : > { %v3198_v19 = vmax.f32 %v3190_v45, 0.0  ;;  %3000 = vst [vmem:[%s4689_s15 + $0x70] sm:$0xff] %v2984_v25  ;;  %3001 = vst [vmem:[%s4689_s15 + $0x78] sm:$0xff] %v2985_v62  ;;  %v2965_v55 = vadd.f32 %v2927_v9, %v5141_v30  ;;  %v3044_v37 = vadd.f32 %v5143_v54, %v2927_v9  ;;  %v3045_v6 = vadd.f32 %v5145_v34, %v2927_v9  ;;  %v3022_v62 = vld [vmem:[%s4689_s15 + $0x128] sm:$0xff] }
 0x586   : > { %3080 = vst [vmem:[%s4689_s15 + $0x80] sm:$0xff] %v3064_v47  ;;  %3081 = vst [vmem:[%s4689_s15 + $0x88] sm:$0xff] %v3065_v58  ;;  %v3124_v26 = vadd.f32 %v5147_v24, %v2927_v9  ;;  %v2980_v4 = vmax.f32 %v2964_v49, 0.0  ;;  %v3125_v30 = vadd.f32 %v5151_v46, %v2927_v9  ;;  %v3188_v33 = vadd.f32 %v5154_v59, %v2927_v9  ;;  %v2942_v54 = vpop.permute.xlu1 %2941  ;;  %v3023_v49 = vld [vmem:[%s4689_s15 + $0x130] sm:$0xff] }
 0x587   : > { %3160 = vst [vmem:[%s4689_s15 + $0x90] sm:$0xff] %v3144_v23  ;;  %3161 = vst [vmem:[%s4689_s15 + $0x98] sm:$0xff] %v3145_v29  ;;  %v2981_v13 = vmax.f32 %v2965_v55, 0.0  ;;  %v3060_v34 = vmax.f32 %v3044_v37, 0.0  ;;  %v3061_v24 = vmax.f32 %v3045_v6, 0.0  ;;  %v2970_v60 = vadd.f32 %v2942_v54, %v5157_v28  ;;  %v3102_v55 = vld [vmem:[%s4689_s15 + $0x138] sm:$0xff] }
 0x588   : > { %3206 = vst [vmem:[%s4689_s15 + $0xa0] sm:$0xff] %v3198_v19  ;;  %v3140_v12 = vmax.f32 %v3124_v26, 0.0  ;;  %2996 = vst [vmem:[%s4689_s15] sm:$0xff] %v2980_v4  ;;  %v3141_v56 = vmax.f32 %v3125_v30, 0.0  ;;  %v3196_v18 = vmax.f32 %v3188_v33, 0.0  ;;  %v2971_v10 = vadd.f32 %v2942_v54, %v5160_v41  ;;  %v2866_v19 = vld [vmem:[%s4689_s15 + $0x188] sm:$0xff]  ;;  %v3103_v37 = vld [vmem:[%s4689_s15 + $0x140] sm:$0xff] }
 0x589   : > { %2997 = vst [vmem:[%s4689_s15 + $0x8] sm:$0xff] %v2981_v13  ;;  %3076 = vst [vmem:[%s4689_s15 + $0x10] sm:$0xff] %v3060_v34  ;;  %v3050_v46 = vadd.f32 %v5164_v7, %v2942_v54  ;;  %v3051_v59 = vadd.f32 %v5169_v2, %v2942_v54  ;;  %v3130_v0 = vadd.f32 %v3114_v51, %v2942_v54  ;;  %v2986_v28 = vmax.f32 %v2970_v60, 0.0  ;;  %v2947_v51 = vpop.permute.xlu0 %2946  ;;  %v3177_v30 = vld [vmem:[%s4689_s15 + $0x148] sm:$0xff] }
 0x58a   : > { %3077 = vst [vmem:[%s4689_s15 + $0x18] sm:$0xff] %v3061_v24  ;;  %3156 = vst [vmem:[%s4689_s15 + $0x20] sm:$0xff] %v3140_v12  ;;  %v3131_v36 = vadd.f32 %v3115_v61, %v2942_v54  ;;  %v2987_v41 = vmax.f32 %v2971_v10, 0.0  ;;  %v3191_v1 = vadd.f32 %v3183_v39, %v2942_v54  ;;  %v5215_v5 = vpop.permute.xlu1 %2895  ;;  %v2863_v61 = vld [vmem:[%s4689_s15 + $0x120] sm:$0xff]  ;;  %v2867_v24 = vld [vmem:[%s4689_s15 + $0x190] sm:$0xff] }
 0x58b   : > { %3157 = vst [vmem:[%s4689_s15 + $0x28] sm:$0xff] %v3141_v56  ;;  %3204 = vst [vmem:[%s4689_s15 + $0x30] sm:$0xff] %v3196_v18  ;;  %v3066_v7 = vmax.f32 %v3050_v46, 0.0  ;;  %v3067_v31 = vmax.f32 %v3051_v59, 0.0  ;;  %v3146_v40 = vmax.f32 %v3130_v0, 0.0  ;;  %v2918_v43 = vmul.f32 %v5215_v5, %v2862_v52  ;;  %v3026_v12 = vld [vmem:[%s4689_s15 + $0x198] sm:$0xff] }
 0x58c   : > { %v3147_v2 = vmax.f32 %v3131_v36, 0.0  ;;  %3002 = vst [vmem:[%s4689_s15 + $0xa8] sm:$0xff] %v2986_v28  ;;  %3003 = vst [vmem:[%s4689_s15 + $0xb0] sm:$0xff] %v2987_v41  ;;  %v3199_v48 = vmax.f32 %v3191_v1, 0.0  ;;  %v2919_v6 = vmul.f32 %v5215_v5, %v2863_v61  ;;  %v3038_v33 = vmul.f32 %v3022_v62, %v5215_v5  ;;  %v3027_v41 = vld [vmem:[%s4689_s15 + $0x1a0] sm:$0xff] }
 0x58d   : > { %3082 = vst [vmem:[%s4689_s15 + $0xb8] sm:$0xff] %v3066_v7  ;;  %3083 = vst [vmem:[%s4689_s15 + $0xc0] sm:$0xff] %v3067_v31  ;;  %v3039_v54 = vmul.f32 %v3023_v49, %v5215_v5  ;;  %v3118_v13 = vmul.f32 %v3102_v55, %v5215_v5  ;;  %v3119_v34 = vmul.f32 %v3103_v37, %v5215_v5  ;;  %v2864_v31 = vld [vmem:[%s4689_s15 + $0x150] sm:$0xff] }
 0x58e   : > { %3162 = vst [vmem:[%s4689_s15 + $0xc8] sm:$0xff] %v3146_v40  ;;  %3163 = vst [vmem:[%s4689_s15 + $0xd0] sm:$0xff] %v3147_v2  ;;  %v2891_v38 = vpop.permute.xlu1 %2890  ;;  %v3185_v56 = vmul.f32 %v3177_v30, %v5215_v5 }
 0x58f   : > { %3207 = vst [vmem:[%s4689_s15 + $0xd8] sm:$0xff] %v3199_v48  ;;  %v2916_v3 = vmul.f32 %v2891_v38, %v2860_v50  ;;  %v2917_v22 = vmul.f32 %v2891_v38, %v2861_v63  ;;  %v3036_v57 = vmul.f32 %v3020_v32, %v2891_v38  ;;  %v3037_v42 = vmul.f32 %v3021_v15, %v2891_v38  ;;  %v2865_v32 = vld [vmem:[%s4689_s15 + $0x158] sm:$0xff]  ;;  %v3106_v15 = vld [vmem:[%s4689_s15 + $0x1a8] sm:$0xff] }
 0x590   : > { %v3116_v16 = vmul.f32 %v3100_v21, %v2891_v38  ;;  %v3117_v27 = vmul.f32 %v3101_v8, %v2891_v38  ;;  %v3184_v11 = vmul.f32 %v3176_v14, %v2891_v38  ;;  %v3024_v14 = vld [vmem:[%s4689_s15 + $0x160] sm:$0xff] }
 0x591   : > { %v2972_v35 = vadd.f32 %v2947_v51, %v2916_v3  ;;  %v2973_v17 = vadd.f32 %v2947_v51, %v2917_v22  ;;  %v3052_v20 = vadd.f32 %v3036_v57, %v2947_v51  ;;  %v3053_v44 = vadd.f32 %v3037_v42, %v2947_v51  ;;  %v3025_v3 = vld [vmem:[%s4689_s15 + $0x168] sm:$0xff]  ;;  %v3104_v22 = vld [vmem:[%s4689_s15 + $0x170] sm:$0xff] }
 0x592   : > { %v3132_v53 = vadd.f32 %v3116_v16, %v2947_v51  ;;  %v3133_v45 = vadd.f32 %v3117_v27, %v2947_v51  ;;  %v3192_v9 = vadd.f32 %v3184_v11, %v2947_v51  ;;  %v5234_v25 = vpop.permute.xlu1 %2905  ;;  %v3105_v51 = vld [vmem:[%s4689_s15 + $0x178] sm:$0xff]  ;;  %v3178_v16 = vld [vmem:[%s4689_s15 + $0x180] sm:$0xff] }
 0x593   : > { %v2988_v47 = vmax.f32 %v2972_v35, 0.0  ;;  %v2989_v58 = vmax.f32 %v2973_v17, 0.0  ;;  %v3068_v23 = vmax.f32 %v3052_v20, 0.0  ;;  %v3069_v29 = vmax.f32 %v3053_v44, 0.0  ;;  %v3107_v17 = vld [vmem:[%s4689_s15 + $0x1b0] sm:$0xff]  ;;  %v2957_v20 = vpop.permute.xlu0 %2956 }
 0x594   : > { %v3148_v26 = vmax.f32 %v3132_v53, 0.0  ;;  %v3149_v39 = vmax.f32 %v3133_v45, 0.0  ;;  %v3200_v4 = vmax.f32 %v3192_v9, 0.0  ;;  %v5258_v60 = vmul.f32 %v5234_v25, %v2866_v19 }
 0x595   : > { %3004 = vst [vmem:[%s4689_s15 + $0xe0] sm:$0xff] %v2988_v47  ;;  %3005 = vst [vmem:[%s4689_s15 + $0xe8] sm:$0xff] %v2989_v58  ;;  %v5261_v10 = vmul.f32 %v5234_v25, %v2867_v24  ;;  %v5264_v46 = vmul.f32 %v3026_v12, %v5234_v25  ;;  %v3043_v40 = vmul.f32 %v3027_v41, %v5234_v25  ;;  %v3179_v58 = vld [vmem:[%s4689_s15 + $0x1b8] sm:$0xff] }
 0x596   : > { %3084 = vst [vmem:[%s4689_s15 + $0xf0] sm:$0xff] %v3068_v23  ;;  %3085 = vst [vmem:[%s4689_s15 + $0xf8] sm:$0xff] %v3069_v29  ;;  %v2952_v18 = vpop.permute.xlu1 %2951  ;;  %v3122_v42 = vmul.f32 %v3106_v15, %v5234_v25  ;;  %v3123_v53 = vmul.f32 %v3107_v17, %v5234_v25  ;;  %v3187_v49 = vmul.f32 %v3179_v58, %v5234_v25 }
 0x597   : > { %3164 = vst [vmem:[%s4689_s15 + $0x100] sm:$0xff] %v3148_v26  ;;  %3165 = vst [vmem:[%s4689_s15 + $0x108] sm:$0xff] %v3149_v39  ;;  %v2974_v59 = vadd.f32 %v2952_v18, %v2918_v43  ;;  %v2975_v0 = vadd.f32 %v2952_v18, %v2919_v6  ;;  %v3054_v36 = vadd.f32 %v3038_v33, %v2952_v18 }
 0x598   : > { %3208 = vst [vmem:[%s4689_s15 + $0x110] sm:$0xff] %v3200_v4  ;;  %v3055_v28 = vadd.f32 %v3039_v54, %v2952_v18  ;;  %v3134_v1 = vadd.f32 %v3118_v13, %v2952_v18  ;;  %v3135_v5 = vadd.f32 %v3119_v34, %v2952_v18  ;;  %v3193_v7 = vadd.f32 %v3185_v56, %v2952_v18 }
 0x599   : > { %v2990_v2 = vmax.f32 %v2974_v59, 0.0  ;;  %v2991_v48 = vmax.f32 %v2975_v0, 0.0  ;;  %v3070_v50 = vmax.f32 %v3054_v36, 0.0 }
 0x59a   : > { %v3071_v63 = vmax.f32 %v3055_v28, 0.0  ;;  %v3150_v38 = vmax.f32 %v3134_v1, 0.0  ;;  %v3151_v21 = vmax.f32 %v3135_v5, 0.0  ;;  %v3201_v8 = vmax.f32 %v3193_v7, 0.0  ;;  %v2901_v57 = vpop.permute.xlu1 %2900 }
 0x59b   : > { %3006 = vst [vmem:[%s4689_s15 + $0x118] sm:$0xff] %v2990_v2  ;;  %3007 = vst [vmem:[%s4689_s15 + $0x120] sm:$0xff] %v2991_v48  ;;  %v2920_v27 = vmul.f32 %v2901_v57, %v2864_v31  ;;  %v2921_v11 = vmul.f32 %v2901_v57, %v2865_v32  ;;  %v3040_v52 = vmul.f32 %v3024_v14, %v2901_v57 }
 0x59c   : > { %3086 = vst [vmem:[%s4689_s15 + $0x128] sm:$0xff] %v3070_v50  ;;  %3087 = vst [vmem:[%s4689_s15 + $0x130] sm:$0xff] %v3071_v63  ;;  %v3041_v35 = vmul.f32 %v3025_v3, %v2901_v57  ;;  %v3120_v44 = vmul.f32 %v3104_v22, %v2901_v57  ;;  %v3121_v61 = vmul.f32 %v3105_v51, %v2901_v57 }
 0x59d   : > { %3166 = vst [vmem:[%s4689_s15 + $0x138] sm:$0xff] %v3150_v38  ;;  %3167 = vst [vmem:[%s4689_s15 + $0x140] sm:$0xff] %v3151_v21  ;;  %v3186_v43 = vmul.f32 %v3178_v16, %v2901_v57  ;;  %v2976_v45 = vadd.f32 %v2957_v20, %v2920_v27  ;;  %v2977_v9 = vadd.f32 %v2957_v20, %v2921_v11 }
 0x59e   : > { %3209 = vst [vmem:[%s4689_s15 + $0x148] sm:$0xff] %v3201_v8  ;;  %v3056_v62 = vadd.f32 %v3040_v52, %v2957_v20  ;;  %v3057_v47 = vadd.f32 %v3041_v35, %v2957_v20  ;;  %v3136_v23 = vadd.f32 %v3120_v44, %v2957_v20  ;;  %v3137_v29 = vadd.f32 %v3121_v61, %v2957_v20  ;;  %v2962_v55 = vpop.permute.xlu1 %2961 }
 0x59f   : > { %v3194_v19 = vadd.f32 %v3186_v43, %v2957_v20  ;;  %v2992_v37 = vmax.f32 %v2976_v45, 0.0  ;;  %v2993_v6 = vmax.f32 %v2977_v9, 0.0  ;;  %v2978_v54 = vadd.f32 %v2962_v55, %v5258_v60 }
 0x5a0   : > { %v3072_v26 = vmax.f32 %v3056_v62, 0.0  ;;  %v3073_v39 = vmax.f32 %v3057_v47, 0.0  ;;  %v3152_v4 = vmax.f32 %v3136_v23, 0.0  ;;  %v3153_v30 = vmax.f32 %v3137_v29, 0.0 }
 0x5a1   : > { %v3202_v33 = vmax.f32 %v3194_v19, 0.0  ;;  %3008 = vst [vmem:[%s4689_s15 + $0x150] sm:$0xff] %v2992_v37  ;;  %3009 = vst [vmem:[%s4689_s15 + $0x158] sm:$0xff] %v2993_v6  ;;  %v2979_v25 = vadd.f32 %v2962_v55, %v5261_v10  ;;  %v3058_v13 = vadd.f32 %v5264_v46, %v2962_v55  ;;  %v3059_v34 = vadd.f32 %v3043_v40, %v2962_v55 }
 0x5a2   : > { %3088 = vst [vmem:[%s4689_s15 + $0x160] sm:$0xff] %v3072_v26  ;;  %3089 = vst [vmem:[%s4689_s15 + $0x168] sm:$0xff] %v3073_v39  ;;  %v3138_v24 = vadd.f32 %v3122_v42, %v2962_v55  ;;  %v2994_v12 = vmax.f32 %v2978_v54, 0.0  ;;  %v3139_v56 = vadd.f32 %v3123_v53, %v2962_v55  ;;  %v3195_v18 = vadd.f32 %v3187_v49, %v2962_v55 }
 0x5a3   : > { %3168 = vst [vmem:[%s4689_s15 + $0x170] sm:$0xff] %v3152_v4  ;;  %3169 = vst [vmem:[%s4689_s15 + $0x178] sm:$0xff] %v3153_v30  ;;  %v2995_v60 = vmax.f32 %v2979_v25, 0.0  ;;  %v3074_v59 = vmax.f32 %v3058_v13, 0.0  ;;  %v3075_v0 = vmax.f32 %v3059_v34, 0.0 }
 0x5a4   : > { %3210 = vst [vmem:[%s4689_s15 + $0x180] sm:$0xff] %v3202_v33  ;;  %v3154_v10 = vmax.f32 %v3138_v24, 0.0  ;;  %3010 = vst [vmem:[%s4689_s15 + $0x188] sm:$0xff] %v2994_v12  ;;  %v3155_v46 = vmax.f32 %v3139_v56, 0.0  ;;  %v3203_v36 = vmax.f32 %v3195_v18, 0.0 }
 0x5a5   : > { %3011 = vst [vmem:[%s4689_s15 + $0x190] sm:$0xff] %v2995_v60  ;;  %3090 = vst [vmem:[%s4689_s15 + $0x198] sm:$0xff] %v3074_v59 }
 0x5a6   : > { %3091 = vst [vmem:[%s4689_s15 + $0x1a0] sm:$0xff] %v3075_v0  ;;  %3170 = vst [vmem:[%s4689_s15 + $0x1a8] sm:$0xff] %v3154_v10 }
 0x5a7   : > { %3171 = vst [vmem:[%s4689_s15 + $0x1b0] sm:$0xff] %v3155_v46  ;;  %3211 = vst [vmem:[%s4689_s15 + $0x1b8] sm:$0xff] %v3203_v36 }
 0x5a8 PF: > { %s16_s21 = sadd.s32 1, %s3545_s21  }
 0x5a9   : > { %p13_p4 = scmp.ge.s32.totalorder %s16_s21, 4  }
 0x5ab   :  { %15 = sbr.rel (!%p13_p4) target bundleno = 1 (0x1), region = 74 }

</bundles_post_ra>
